<compile_context>
chip_gen: v6e
topology: v6e:2x2x1
jax: 0.10.0
libtpu: 0.0.40
codegen_flags: <defaults>
</compile_context>

<pallas_src>
import functools

import jax
import jax.numpy as jnp
from jax.experimental import pallas as pl
from jax.experimental.pallas import tpu as pltpu

EPS = 1e-5
_VMEM = pltpu.MemorySpace.VMEM


def _fused_kernel(x_ref, w1_ref, g_ref, b_ref, w2s_ref, o_ref,
                  y_acc_ref, yp_ref, *, H, W):
    """x_ref:[Kt,P]bf16  w1_ref:[Kt,128]bf16  g/b:[1,128]f32  w2s_ref:[128,288]bf16
    o_ref:[32,P]f32  y_acc_ref: VMEM [P,128]f32  yp_ref: VMEM [pad_rows,288]f32."""
    P = H * W
    C2 = o_ref.shape[0]
    k = pl.program_id(0)

    # ---- stage 1: 1x1 conv as a K-tiled matmul (contract dim 0 of both) ----
    @pl.when(k == 0)
    def _():
        y_acc_ref[...] = jnp.zeros_like(y_acc_ref)

    y_acc_ref[...] += jax.lax.dot_general(
        x_ref[...], w1_ref[...], (((0,), (0,)), ((), ())),
        preferred_element_type=jnp.float32)                        # [P, 128] f32

    # ---- last K step: BN(train) + ReLU + tap-stacked 3x3 conv + store ------
    @pl.when(k == pl.num_programs(0) - 1)
    def _():
        y = y_acc_ref[...]                                         # [P, 128] f32
        inv_p = 1.0 / P

        # one-pass batch stats (biased variance), folded into scale/shift
        s1 = jnp.sum(y, axis=0, keepdims=True)                     # [1, 128]
        s2 = jnp.sum(y * y, axis=0, keepdims=True)                 # [1, 128]
        mean = s1 * inv_p
        var = s2 * inv_p - mean * mean
        scale = g_ref[...] * jax.lax.rsqrt(var + EPS)
        shift = b_ref[...] - mean * scale
        yn = jnp.maximum(y * scale + shift, 0.0).astype(jnp.bfloat16)

        # ONE MXU matmul producing all 9 taps' partial outputs: [P, 9*C2]
        stacked = jax.lax.dot_general(
            yn, w2s_ref[...], (((1,), (0,)), ((), ())),
            preferred_element_type=jnp.float32)

        # flat padded scratch: row r = p + W + 1 holds stacked[p]; the halo
        # rows above/below provide the vertical (ky) padding for free.
        ncols = yp_ref.shape[1]
        nrows = yp_ref.shape[0]
        yp_ref[0:W + 1, :] = jnp.zeros((W + 1, ncols), jnp.float32)
        yp_ref[W + 1 + P:nrows, :] = jnp.zeros((nrows - (W + 1 + P), ncols),
                                               jnp.float32)
        yp_ref[W + 1:W + 1 + P, :] = stacked

        # horizontal-halo masks built in-kernel (no extra input DMAs)
        col = jax.lax.broadcasted_iota(jnp.int32, (P, C2), 0) % W
        not_first = col != 0
        not_last = col != (W - 1)

        # 9 output-side shift-adds (VPU); each tap reads its own 32 lanes.
        acc = jnp.zeros((P, C2), jnp.float32)
        for ky in range(3):
            for kx in range(3):
                t = 3 * ky + kx
                s = ky * W + kx                      # static flat row offset
                blk = yp_ref[s:s + P, t * C2:(t + 1) * C2]   # [P, 32]
                # kx==0 reads column w-1 (invalid at w==0); kx==2 reads w+1
                # (invalid at w==W-1).  In the flat layout those alias a
                # neighbouring image row, so select them to zero.
                if kx == 0:
                    blk = jnp.where(not_first, blk, 0.0)
                elif kx == 2:
                    blk = jnp.where(not_last, blk, 0.0)
                acc = acc + blk

        # transposed, lane-dense output [C2, P]; wrapper reshape to NCHW is
        # metadata-only.
        o_ref[...] = jnp.transpose(acc).astype(o_ref.dtype)


@jax.jit
def forward(x_nchw, w1, gamma, beta, w2_hwio):
    N, Cin, H, W = x_nchw.shape
    C1 = w1.shape[1]          # 128
    C2 = w2_hwio.shape[3]     # 32
    assert N == 1, "fused kernel assumes batch size 1 (module spec input)"
    P = H * W

    KT = 3                    # K-reduction grid steps for the 1x1 conv
    assert Cin % KT == 0
    kblk = Cin // KT          # 160

    # bf16 MXU operands (f32 accumulation in-kernel).  In a real graph these
    # casts fuse with the producing ops; they halve the kernel's HBM DMA.
    x2d = x_nchw.reshape(Cin, P).astype(jnp.bfloat16)      # NCHW is C-major
    w1b = w1.astype(jnp.bfloat16)
    # tap-major stacked 3x3 weights: [C1, 9*C2], column = (ky*3+kx)*C2 + o
    w2s = jnp.transpose(w2_hwio, (2, 0, 1, 3)).reshape(C1, 9 * C2)
    w2s = w2s.astype(jnp.bfloat16)
    g = gamma.reshape(1, C1).astype(jnp.float32)
    b = beta.reshape(1, C1).astype(jnp.float32)

    pad_rows = ((P + 2 * W + 2 + 7) // 8) * 8   # flat padded-scratch rows

    cost = pl.CostEstimate(
        flops=2 * P * Cin * C1 + 2 * P * C1 * 9 * C2,
        transcendentals=C1,
        bytes_accessed=(x2d.size * 2 + w1b.size * 2 + w2s.size * 2
                        + g.size * 4 + b.size * 4 + C2 * P * 4),
    )

    out2d = pl.pallas_call(
        functools.partial(_fused_kernel, H=H, W=W),
        out_shape=jax.ShapeDtypeStruct((C2, P), jnp.float32),
        grid=(KT,),
        in_specs=[
            pl.BlockSpec((kblk, P), lambda k: (k, 0), memory_space=_VMEM),
            pl.BlockSpec((kblk, C1), lambda k: (k, 0), memory_space=_VMEM),
            pl.BlockSpec((1, C1), lambda k: (0, 0), memory_space=_VMEM),
            pl.BlockSpec((1, C1), lambda k: (0, 0), memory_space=_VMEM),
            pl.BlockSpec((C1, 9 * C2), lambda k: (0, 0), memory_space=_VMEM),
        ],
        out_specs=pl.BlockSpec((C2, P), lambda k: (0, 0), memory_space=_VMEM),
        scratch_shapes=[
            pltpu.VMEM((P, C1), jnp.float32),          # stage-1 accumulator
            pltpu.VMEM((pad_rows, 9 * C2), jnp.float32),   # padded tap scratch
        ],
        compiler_params=pltpu.CompilerParams(
            dimension_semantics=("arbitrary",)),
        cost_estimate=cost,
    )(x2d, w1b, g, b, w2s)

    return out2d.reshape(N, C2, H, W)


# ----------------------------------------------------------------------------
# Pure-JAX reference (f32, for correctness check)
# ----------------------------------------------------------------------------
def reference(x_nchw, w1, gamma, beta, w2_hwio):
    x = jnp.transpose(x_nchw, (0, 2, 3, 1))
    y = jnp.einsum('nhwc,co->nhwo', x, w1)
    mean = jnp.mean(y, axis=(0, 1, 2), keepdims=True)
    var = jnp.mean((y - mean) ** 2, axis=(0, 1, 2), keepdims=True)
    y = (y - mean) * jax.lax.rsqrt(var + EPS) * gamma + beta
    y = jnp.maximum(y, 0.0)
    out = jax.lax.conv_general_dilated(
        y, w2_hwio, window_strides=(1, 1), padding='SAME',
        dimension_numbers=('NHWC', 'HWIO', 'NHWC'))
    return jnp.transpose(out, (0, 3, 1, 2))


if __name__ == "__main__":
    key = jax.random.PRNGKey(0)
    k_x, k_w1, k_g, k_b, k_w2 = jax.random.split(key, 5)

    N, Cin, H, W = 1, 480, 14, 14
    C1, C2 = 128, 32

    # deterministic synthetic parameters (shapes match the module's __init__)
    x = jax.random.normal(k_x, (N, Cin, H, W), jnp.float32)
    w1 = jax.random.normal(k_w1, (Cin, C1), jnp.float32) * 0.05     # 1x1 conv
    gamma = 1.0 + 0.1 * jax.random.normal(k_g, (C1,), jnp.float32)  # BN affine
    beta = 0.1 * jax.random.normal(k_b, (C1,), jnp.float32)
    w2_hwio = jax.random.normal(k_w2, (3, 3, C1, C2), jnp.float32) * 0.05

    out = jax.block_until_ready(forward(x, w1, gamma, beta, w2_hwio))
    ref = jax.block_until_ready(reference(x, w1, gamma, beta, w2_hwio))

    assert out.shape == (N, C2, H, W), out.shape
    max_err = float(jnp.max(jnp.abs(out - ref)))
    mean_err = float(jnp.mean(jnp.abs(out - ref)))
    # Tolerance rationale: bf16 MXU operands (2^-9 relative rounding) with f32
    # accumulation over K=480 and 9*128 MACs give an expected max |err| ~1e-2
    # at this output scale (std(out) ~ 1.2); 3e-2 abs / 1e-2 rel gives ~3x
    # margin, and the mean-|err| check (expected ~2e-3) guards against gross
    # logic errors.
    assert mean_err < 1e-2, (max_err, mean_err)
    assert jnp.allclose(out, ref, atol=3e-2, rtol=1e-2), (max_err, mean_err)
    print("KERNEL_OK")
</pallas_src>

<mosaic_0001>
module attributes {stable_mosaic.version = 11 : i64} {
  func.func @_fused_kernel(%arg0: i32, %arg1: memref<160x196xbf16, #tpu.memory_space<vmem>>, %arg2: memref<160x128xbf16, #tpu.memory_space<vmem>>, %arg3: memref<1x128xf32, #tpu.memory_space<vmem>>, %arg4: memref<1x128xf32, #tpu.memory_space<vmem>>, %arg5: memref<128x288xbf16, #tpu.memory_space<vmem>>, %arg6: memref<32x196xf32, #tpu.memory_space<vmem>>, %arg7: memref<196x128xf32, #tpu.memory_space<vmem>>, %arg8: memref<232x288xf32, #tpu.memory_space<vmem>>) attributes {dimension_semantics = [#tpu.dimension_semantics<arbitrary>], iteration_bounds = array<i64: 3>, scalar_prefetch = 0 : i64, scratch_operands = 2 : i64, tpu.core_type = #tpu.core_type<tc>, window_params = [{transform_indices = @transform_0, window_bounds = array<i64: 160, 196>}, {transform_indices = @transform_1, window_bounds = array<i64: 160, 128>}, {pipeline_mode = #tpu.pipeline_mode<synchronous>, transform_indices = @transform_2, window_bounds = array<i64: 1, 128>}, {pipeline_mode = #tpu.pipeline_mode<synchronous>, transform_indices = @transform_3, window_bounds = array<i64: 1, 128>}, {pipeline_mode = #tpu.pipeline_mode<synchronous>, transform_indices = @transform_4, window_bounds = array<i64: 128, 288>}, {pipeline_mode = #tpu.pipeline_mode<synchronous>, transform_indices = @transform_5, window_bounds = array<i64: 32, 196>}]} {
    %c0_i32 = arith.constant 0 : i32
    %0 = arith.cmpi eq, %arg0, %c0_i32 : i32
    %1 = arith.extui %0 : i1 to i32
    %c0_i32_0 = arith.constant 0 : i32
    %2 = arith.cmpi ne, %1, %c0_i32_0 : i32
    scf.if %2 {
      %cst_9 = arith.constant 0.000000e+00 : f32
      %12 = vector.broadcast %cst_9 : f32 to vector<196x128xf32>
      %c0_10 = arith.constant 0 : index
      %c0_11 = arith.constant 0 : index
      %13 = vector.load %arg7[%c0_10, %c0_11] : memref<196x128xf32, #tpu.memory_space<vmem>>, vector<196x128xf32>
      tpu.vector_store %arg7[%c0_10, %c0_11], %12 {strides = array<i32>} : memref<196x128xf32, #tpu.memory_space<vmem>>, vector<196x128xf32>,
    } else {
    }
    %c0 = arith.constant 0 : index
    %c0_1 = arith.constant 0 : index
    %3 = vector.load %arg7[%c0, %c0_1] : memref<196x128xf32, #tpu.memory_space<vmem>>, vector<196x128xf32>
    %c0_2 = arith.constant 0 : index
    %c0_3 = arith.constant 0 : index
    %4 = vector.load %arg1[%c0_2, %c0_3] : memref<160x196xbf16, #tpu.memory_space<vmem>>, vector<160x196xbf16>
    %c0_4 = arith.constant 0 : index
    %c0_5 = arith.constant 0 : index
    %5 = vector.load %arg2[%c0_4, %c0_5] : memref<160x128xbf16, #tpu.memory_space<vmem>>, vector<160x128xbf16>
    %cst = arith.constant dense<0.000000e+00> : vector<196x128xf32>
    %6 = tpu.matmul %4, %5, %cst {dimension_numbers = #tpu.dot_dimension_numbers<[0], [0], [1], [1], [0, 1, 1, 1], [], []>} : vector<160x196xbf16>, vector<160x128xbf16>, vector<196x128xf32> -> vector<196x128xf32>
    %7 = arith.addf %3, %6 : vector<196x128xf32>
    %c0_6 = arith.constant 0 : index
    %c0_7 = arith.constant 0 : index
    %8 = vector.load %arg7[%c0_6, %c0_7] : memref<196x128xf32, #tpu.memory_space<vmem>>, vector<196x128xf32>
    tpu.vector_store %arg7[%c0_6, %c0_7], %7 {strides = array<i32>} : memref<196x128xf32, #tpu.memory_space<vmem>>, vector<196x128xf32>,
    %c2_i32 = arith.constant 2 : i32
    %9 = arith.cmpi eq, %arg0, %c2_i32 : i32
    %10 = arith.extui %9 : i1 to i32
    %c0_i32_8 = arith.constant 0 : i32
    %11 = arith.cmpi ne, %10, %c0_i32_8 : i32
    scf.if %11 {
      %c0_9 = arith.constant 0 : index
      %c0_10 = arith.constant 0 : index
      %12 = vector.load %arg7[%c0_9, %c0_10] : memref<196x128xf32, #tpu.memory_space<vmem>>, vector<196x128xf32>
      %cst_11 = arith.constant dense<0.000000e+00> : vector<128xf32>
      %13 = vector.multi_reduction <add>, %12, %cst_11 [0] : vector<196x128xf32> to vector<128xf32>
      %14 = vector.shape_cast %13 : vector<128xf32> to vector<1x128xf32>
      %15 = arith.mulf %12, %12 : vector<196x128xf32>
      %cst_12 = arith.constant dense<0.000000e+00> : vector<128xf32>
      %16 = vector.multi_reduction <add>, %15, %cst_12 [0] : vector<196x128xf32> to vector<128xf32>
      %17 = vector.shape_cast %16 : vector<128xf32> to vector<1x128xf32>
      %cst_13 = arith.constant 0.00510204071 : f32
      %18 = vector.broadcast %cst_13 : f32 to vector<1x128xf32>
      %19 = arith.mulf %14, %18 : vector<1x128xf32>
      %cst_14 = arith.constant 0.00510204071 : f32
      %20 = vector.broadcast %cst_14 : f32 to vector<1x128xf32>
      %21 = arith.mulf %17, %20 : vector<1x128xf32>
      %22 = arith.mulf %19, %19 : vector<1x128xf32>
      %23 = arith.subf %21, %22 : vector<1x128xf32>
      %c0_15 = arith.constant 0 : index
      %c0_16 = arith.constant 0 : index
      %24 = vector.load %arg3[%c0_15, %c0_16] : memref<1x128xf32, #tpu.memory_space<vmem>>, vector<1x128xf32>
      %cst_17 = arith.constant 9.99999974E-6 : f32
      %25 = vector.broadcast %cst_17 : f32 to vector<1x128xf32>
      %26 = arith.addf %23, %25 : vector<1x128xf32>
      %27 = math.rsqrt %26 : vector<1x128xf32>
      %28 = arith.mulf %24, %27 : vector<1x128xf32>
      %c0_18 = arith.constant 0 : index
      %c0_19 = arith.constant 0 : index
      %29 = vector.load %arg4[%c0_18, %c0_19] : memref<1x128xf32, #tpu.memory_space<vmem>>, vector<1x128xf32>
      %30 = arith.mulf %19, %28 : vector<1x128xf32>
      %31 = arith.subf %29, %30 : vector<1x128xf32>
      %32 = vector.broadcast %28 : vector<1x128xf32> to vector<196x128xf32>
      %33 = arith.mulf %12, %32 : vector<196x128xf32>
      %34 = vector.broadcast %31 : vector<1x128xf32> to vector<196x128xf32>
      %35 = arith.addf %33, %34 : vector<196x128xf32>
      %cst_20 = arith.constant 0.000000e+00 : f32
      %36 = vector.broadcast %cst_20 : f32 to vector<196x128xf32>
      %37 = arith.maximumf %35, %36 : vector<196x128xf32>
      %38 = arith.truncf %37 : vector<196x128xf32> to vector<196x128xbf16>
      %c0_21 = arith.constant 0 : index
      %c0_22 = arith.constant 0 : index
      %39 = vector.load %arg5[%c0_21, %c0_22] : memref<128x288xbf16, #tpu.memory_space<vmem>>, vector<128x288xbf16>
      %cst_23 = arith.constant dense<0.000000e+00> : vector<196x288xf32>
      %40 = tpu.matmul %38, %39, %cst_23 {dimension_numbers = #tpu.dot_dimension_numbers<[1], [0], [0], [1], [0, 0, 1, 1], [], []>} : vector<196x128xbf16>, vector<128x288xbf16>, vector<196x288xf32> -> vector<196x288xf32>
      %cst_24 = arith.constant 0.000000e+00 : f32
      %41 = vector.broadcast %cst_24 : f32 to vector<15x288xf32>
      %c0_25 = arith.constant 0 : index
      %c0_26 = arith.constant 0 : index
      %42 = vector.load %arg8[%c0_25, %c0_26] : memref<232x288xf32, #tpu.memory_space<vmem>>, vector<15x288xf32>
      tpu.vector_store %arg8[%c0_25, %c0_26], %41 {strides = array<i32>} : memref<232x288xf32, #tpu.memory_space<vmem>>, vector<15x288xf32>,
      %cst_27 = arith.constant 0.000000e+00 : f32
      %43 = vector.broadcast %cst_27 : f32 to vector<21x288xf32>
      %c211 = arith.constant 211 : index
      %c0_28 = arith.constant 0 : index
      %44 = vector.load %arg8[%c211, %c0_28] : memref<232x288xf32, #tpu.memory_space<vmem>>, vector<21x288xf32>
      tpu.vector_store %arg8[%c211, %c0_28], %43 {strides = array<i32>} : memref<232x288xf32, #tpu.memory_space<vmem>>, vector<21x288xf32>,
      %c15 = arith.constant 15 : index
      %c0_29 = arith.constant 0 : index
      %45 = vector.load %arg8[%c15, %c0_29] : memref<232x288xf32, #tpu.memory_space<vmem>>, vector<196x288xf32>
      tpu.vector_store %arg8[%c15, %c0_29], %40 {strides = array<i32>} : memref<232x288xf32, #tpu.memory_space<vmem>>, vector<196x288xf32>,
      %46 = tpu.iota {dimensions = array<i32: 0>} : vector<196x32xi32>
      %c14_i32 = arith.constant 14 : i32
      %c0_i32_30 = arith.constant 0 : i32
      %47 = arith.cmpi eq, %c14_i32, %c0_i32_30 : i32
      %c1_i32 = arith.constant 1 : i32
      %48 = arith.select %47, %c1_i32, %c14_i32 : i32
      %49 = vector.broadcast %48 : i32 to vector<196x32xi32>
      %50 = arith.remsi %46, %49 : vector<196x32xi32>
      %c0_i32_31 = arith.constant 0 : i32
      %51 = vector.broadcast %c0_i32_31 : i32 to vector<196x32xi32>
      %52 = arith.cmpi ne, %50, %51 : vector<196x32xi32>
      %c0_i32_32 = arith.constant 0 : i32
      %53 = vector.broadcast %c0_i32_32 : i32 to vector<196x32xi32>
      %54 = arith.cmpi slt, %50, %53 : vector<196x32xi32>
      %c0_i32_33 = arith.constant 0 : i32
      %55 = arith.cmpi slt, %48, %c0_i32_33 : i32
      %56 = vector.broadcast %55 : i1 to vector<196x32xi1>
      %57 = vector.broadcast %56 : vector<196x32xi1> to vector<196x32xi1>
      %58 = arith.xori %54, %57 : vector<196x32xi1>
      %59 = arith.andi %58, %52 : vector<196x32xi1>
      %60 = vector.broadcast %48 : i32 to vector<196x32xi32>
      %61 = arith.addi %50, %60 : vector<196x32xi32>
      %62 = arith.select %59, %61, %50 : vector<196x32xi1>, vector<196x32xi32>
      %c0_i32_34 = arith.constant 0 : i32
      %63 = vector.broadcast %c0_i32_34 : i32 to vector<196x32xi32>
      %64 = arith.cmpi ne, %62, %63 : vector<196x32xi32>
      %c13_i32 = arith.constant 13 : i32
      %65 = vector.broadcast %c13_i32 : i32 to vector<196x32xi32>
      %66 = arith.cmpi ne, %62, %65 : vector<196x32xi32>
      %cst_35 = arith.constant 0.000000e+00 : f32
      %67 = vector.broadcast %cst_35 : f32 to vector<196x32xf32>
      %c0_36 = arith.constant 0 : index
      %c0_37 = arith.constant 0 : index
      %68 = vector.load %arg8[%c0_36, %c0_37] : memref<232x288xf32, #tpu.memory_space<vmem>>, vector<196x32xf32>
      %cst_38 = arith.constant 0.000000e+00 : f32
      %69 = vector.broadcast %cst_38 : f32 to vector<196x32xf32>
      %70 = arith.select %64, %68, %69 : vector<196x32xi1>, vector<196x32xf32>
      %71 = arith.addf %67, %70 : vector<196x32xf32>
      %c1 = arith.constant 1 : index
      %c32 = arith.constant 32 : index
      %72 = vector.load %arg8[%c1, %c32] : memref<232x288xf32, #tpu.memory_space<vmem>>, vector<196x32xf32>
      %73 = arith.addf %71, %72 : vector<196x32xf32>
      %c2 = arith.constant 2 : index
      %c64 = arith.constant 64 : index
      %74 = vector.load %arg8[%c2, %c64] : memref<232x288xf32, #tpu.memory_space<vmem>>, vector<196x32xf32>
      %cst_39 = arith.constant 0.000000e+00 : f32
      %75 = vector.broadcast %cst_39 : f32 to vector<196x32xf32>
      %76 = arith.select %66, %74, %75 : vector<196x32xi1>, vector<196x32xf32>
      %77 = arith.addf %73, %76 : vector<196x32xf32>
      %c14 = arith.constant 14 : index
      %c96 = arith.constant 96 : index
      %78 = vector.load %arg8[%c14, %c96] : memref<232x288xf32, #tpu.memory_space<vmem>>, vector<196x32xf32>
      %cst_40 = arith.constant 0.000000e+00 : f32
      %79 = vector.broadcast %cst_40 : f32 to vector<196x32xf32>
      %80 = arith.select %64, %78, %79 : vector<196x32xi1>, vector<196x32xf32>
      %81 = arith.addf %77, %80 : vector<196x32xf32>
      %c15_41 = arith.constant 15 : index
      %c128 = arith.constant 128 : index
      %82 = vector.load %arg8[%c15_41, %c128] : memref<232x288xf32, #tpu.memory_space<vmem>>, vector<196x32xf32>
      %83 = arith.addf %81, %82 : vector<196x32xf32>
      %c16 = arith.constant 16 : index
      %c160 = arith.constant 160 : index
      %84 = vector.load %arg8[%c16, %c160] : memref<232x288xf32, #tpu.memory_space<vmem>>, vector<196x32xf32>
      %cst_42 = arith.constant 0.000000e+00 : f32
      %85 = vector.broadcast %cst_42 : f32 to vector<196x32xf32>
      %86 = arith.select %66, %84, %85 : vector<196x32xi1>, vector<196x32xf32>
      %87 = arith.addf %83, %86 : vector<196x32xf32>
      %c28 = arith.constant 28 : index
      %c192 = arith.constant 192 : index
      %88 = vector.load %arg8[%c28, %c192] : memref<232x288xf32, #tpu.memory_space<vmem>>, vector<196x32xf32>
      %cst_43 = arith.constant 0.000000e+00 : f32
      %89 = vector.broadcast %cst_43 : f32 to vector<196x32xf32>
      %90 = arith.select %64, %88, %89 : vector<196x32xi1>, vector<196x32xf32>
      %91 = arith.addf %87, %90 : vector<196x32xf32>
      %c29 = arith.constant 29 : index
      %c224 = arith.constant 224 : index
      %92 = vector.load %arg8[%c29, %c224] : memref<232x288xf32, #tpu.memory_space<vmem>>, vector<196x32xf32>
      %93 = arith.addf %91, %92 : vector<196x32xf32>
      %c30 = arith.constant 30 : index
      %c256 = arith.constant 256 : index
      %94 = vector.load %arg8[%c30, %c256] : memref<232x288xf32, #tpu.memory_space<vmem>>, vector<196x32xf32>
      %cst_44 = arith.constant 0.000000e+00 : f32
      %95 = vector.broadcast %cst_44 : f32 to vector<196x32xf32>
      %96 = arith.select %66, %94, %95 : vector<196x32xi1>, vector<196x32xf32>
      %97 = arith.addf %93, %96 : vector<196x32xf32>
      %98 = tpu.transpose %97, [1, 0] : vector<196x32xf32> -> vector<32x196xf32>
      %c0_45 = arith.constant 0 : index
      %c0_46 = arith.constant 0 : index
      %99 = vector.load %arg6[%c0_45, %c0_46] : memref<32x196xf32, #tpu.memory_space<vmem>>, vector<32x196xf32>
      tpu.vector_store %arg6[%c0_45, %c0_46], %98 {strides = array<i32>} : memref<32x196xf32, #tpu.memory_space<vmem>>, vector<32x196xf32>,
    } else {
    }
    return
  }
  func.func @transform_0(%arg0: i32) -> (i32, i32) {
    %c0_i32 = arith.constant 0 : i32
    %c0_i32_0 = arith.constant 0 : i32
    return %arg0, %c0_i32 : i32, i32
  }
  func.func @transform_1(%arg0: i32) -> (i32, i32) {
    %c0_i32 = arith.constant 0 : i32
    %c0_i32_0 = arith.constant 0 : i32
    return %arg0, %c0_i32 : i32, i32
  }
  func.func @transform_2(%arg0: i32) -> (i32, i32) {
    %c0_i32 = arith.constant 0 : i32
    %c0_i32_0 = arith.constant 0 : i32
    %c0_i32_1 = arith.constant 0 : i32
    return %c0_i32, %c0_i32_0 : i32, i32
  }
  func.func @transform_3(%arg0: i32) -> (i32, i32) {
    %c0_i32 = arith.constant 0 : i32
    %c0_i32_0 = arith.constant 0 : i32
    %c0_i32_1 = arith.constant 0 : i32
    return %c0_i32, %c0_i32_0 : i32, i32
  }
  func.func @transform_4(%arg0: i32) -> (i32, i32) {
    %c0_i32 = arith.constant 0 : i32
    %c0_i32_0 = arith.constant 0 : i32
    %c0_i32_1 = arith.constant 0 : i32
    return %c0_i32, %c0_i32_0 : i32, i32
  }
  func.func @transform_5(%arg0: i32) -> (i32, i32) {
    %c0_i32 = arith.constant 0 : i32
    %c0_i32_0 = arith.constant 0 : i32
    %c0_i32_1 = arith.constant 0 : i32
    return %c0_i32, %c0_i32_0 : i32, i32
  }
}

</mosaic_0001>

<bundles_post_ra>
// kernel: forward.1
= control target key start
LH: loop header
LB: loop body
LE: loop exit
PB: predicated region body
PF: predicated region fallthrough
CT: control target
= control target key end

     0   :  { %s4380_s18 = smov 0   ;;  %s7136_s0 = inlined_call_operand.vmem [shape: bf16[480,196], index: 0, kind: input, shape index: {}]   ;;  %s7137_s1 = inlined_call_operand.vmem [shape: bf16[480,128], index: 1, kind: input, shape index: {}]   ;;  %s7138_s2 = inlined_call_operand.vmem [shape: f32[1,128], index: 2, kind: input, shape index: {}]   ;;  %s7139_s3 = inlined_call_operand.vmem [shape: f32[1,128], index: 3, kind: input, shape index: {}]   ;;  %s7140_s4 = inlined_call_operand.vmem [shape: bf16[128,288], index: 4, kind: input, shape index: {}]   ;;  %s7141_s5 = inlined_call_operand.vmem [shape: f32[32,196], index: 5, kind: output, shape index: {}]  }
   0x1 LB: > { %s4386_s19 = sadd.s32 4294967295, %s4340_s18   ;;  %p3966_p0 = scmp.ge.s32.totalorder %s4340_s18, 1  ;;  %s4340_s18 = sphi %s4380_s18, %s15_s18  }
   0x2   : > { %p195_p1 = scmp.lt.s32.totalorder %s4340_s18, 4 }
   0x4   : > { %p196_p2 = pnand %p3966_p0, %p195_p1 }
   0x5   : > { %s224_s20 = smul.u32 (!%p196_p2), 20, %s4386_s19  ;;  %p3970_p4 = scmp.ne.s32.totalorder (!%p196_p2), %s4386_s19, 0 }
   0x6   : > { %199 = sbr.rel (%p196_p2) target bundleno = 1238 (0x4d6), region = 40 }
   0x7   : > { %p225_p3 = scmp.lt.s32.totalorder (!%p196_p2), %s224_s20, 59 }
   0xb   : > { %s7491_s20 = smov (!%p225_p3, %s224_s20), 59  ;;  %241 = sbr.rel (%p3970_p4) target bundleno = 30 (0x1e), region = 44 }
   0xc   : > { %s4041_s21 = sshll.u32 %s7491_s20, 3  ;;  %s3969_s22 = sshll.u32 %s7491_s20, 2 }
   0xd   : > { %s4394_s25 = scalar_lea.vmem %s7136_s0, %s4041_s21  ;;  %s4399_s28 = scalar_lea.vmem %s7137_s1, %s3969_s22 }
  0x10   : > { %v4342_v0 = vmov 0.0  }
  0x11   : > { %242 = vst [vmem:[#allocation2 + $0xb0] sm:$0xff] %v4342_v0  ;;  %243 = vst [vmem:[#allocation2] sm:$0xff] %v4342_v0 }
  0x12   : > { %244 = vst [vmem:[#allocation2 + $0x10] sm:$0xff] %v4342_v0  ;;  %245 = vst [vmem:[#allocation2 + $0x48] sm:$0xff] %v4342_v0 }
  0x13   : > { %246 = vst [vmem:[#allocation2 + $0x60] sm:$0xff] %v4342_v0  ;;  %247 = vst [vmem:[#allocation2 + $0x28] sm:$0xff] %v4342_v0 }
  0x14   : > { %248 = vst [vmem:[#allocation2 + $0x40] sm:$0xff] %v4342_v0  ;;  %249 = vst [vmem:[#allocation2 + $0x78] sm:$0xff] %v4342_v0 }
  0x15   : > { %250 = vst [vmem:[#allocation2 + $0x80] sm:$0xff] %v4342_v0  ;;  %251 = vst [vmem:[#allocation2 + $0x88] sm:$0xff] %v4342_v0 }
  0x16   : > { %252 = vst [vmem:[#allocation2 + $0xb8] sm:$0xff] %v4342_v0  ;;  %253 = vst [vmem:[#allocation2 + $0x70] sm:$0xff] %v4342_v0 }
  0x17   : > { %254 = vst [vmem:[#allocation2 + $0x18] sm:$0xff] %v4342_v0  ;;  %255 = vst [vmem:[#allocation2 + $0x68] sm:$0xff] %v4342_v0 }
  0x18   : > { %256 = vst [vmem:[#allocation2 + $0x98] sm:$0xff] %v4342_v0  ;;  %257 = vst [vmem:[#allocation2 + $0xa0] sm:$0xff] %v4342_v0 }
  0x19   : > { %258 = vst [vmem:[#allocation2 + $0x20] sm:$0xff] %v4342_v0  ;;  %259 = vst [vmem:[#allocation2 + $0x30] sm:$0xff] %v4342_v0 }
  0x1a   : > { %260 = vst [vmem:[#allocation2 + $0x90] sm:$0xff] %v4342_v0  ;;  %261 = vst [vmem:[#allocation2 + $0x38] sm:$0xff] %v4342_v0 }
  0x1b   : > { %262 = vst [vmem:[#allocation2 + $0x58] sm:$0xff] %v4342_v0  ;;  %263 = vst [vmem:[#allocation2 + $0x50] sm:$0xff] %v4342_v0 }
  0x1c   : > { %264 = vst [vmem:[#allocation2 + $0x8] sm:$0xff] %v4342_v0  ;;  %265 = vst [vmem:[#allocation2 + $0xa8] sm:$0xff] %v4342_v0 }
  0x1d   : > { %266 = vst [vmem:[#allocation2 + $0xc0] sm:$0xf] %v4342_v0 }
  0x1e PF: > { %v4217_v1 = vld [vmem:[%s4394_s25 + $0x80] ss:$8 sps:$4 sm:$0xff]   ;;  %v4343_v3 = vmov 0   ;;  %v4221_v4 = vld [vmem:[%s4394_s25 + $0x90] ss:$8 sps:$4 sm:$0xff]   ;;  %vm556_vm0 = vcmask 261120  }
  0x1f   : > { %v4219_v2 = vld [vmem:[%s4394_s25] ss:$8 sps:$4 sm:$0xff]   ;;  %596 = vmatprep.subr.bf16.mxu0 %v4343_v3  ;;  %4131 = vmatprep.subr.bf16.mxu1 %v4343_v3  ;;  %v4224_v5 = vld [vmem:[%s4394_s25 + $0x10] ss:$8 sps:$4 sm:$0xff]   ;;  %v4245_v16 = vld [vmem:[%s4394_s25 + $0x84] ss:$8 sps:$4 sm:$0xff]  }
  0x20   : > { %464 = vxpose.xlu0.c.b16.start [1/2] (short) %v4217_v1, 128  ;;  %432 = vxpose.xlu1.c.b16.start [1/8] %v4219_v2, 128  ;;  %v4227_v6 = vld [vmem:[%s4394_s25 + $0x20] ss:$8 sps:$4 sm:$0xff]   ;;  %v4230_v7 = vld [vmem:[%s4394_s25 + $0x30] ss:$8 sps:$4 sm:$0xff]   ;;  %v4223_v18 = vld [vmem:[%s4394_s25 + $0x94] ss:$8 sps:$4 sm:$0xff]  }
  0x21   : > { %v4247_v8 = vld [vmem:[%s4399_s28 + $0x38] sm:$0xff]   ;;  %v4233_v9 = vld [vmem:[%s4394_s25 + $0x40] ss:$8 sps:$4 sm:$0xff]   ;;  %v4248_v10 = vld [vmem:[%s4399_s28 + $0x30] sm:$0xff]   ;;  %p4014_p5 = scmp.ne.s32.totalorder %s4386_s19, 2 }
  0x22   : > { %597 = vmatpush1.bf16.msra.mxu0 %v4247_v8  ;;  %4141 = vmatpush1.bf16.msra.mxu1 %v4247_v8  ;;  %v4236_v11 = vld [vmem:[%s4394_s25 + $0x50] ss:$8 sps:$4 sm:$0xff]   ;;  %v4249_v12 = vld [vmem:[%s4399_s28 + $0x28] sm:$0xff]   ;;  %v4250_v14 = vld [vmem:[%s4399_s28 + $0x20] sm:$0xff]  }
  0x23   : > { %598 = vmatprep.subr.bf16.mxu0 %v4343_v3  ;;  %4132 = vmatprep.subr.bf16.mxu1 %v4343_v3  ;;  %v4239_v13 = vld [vmem:[%s4394_s25 + $0x60] ss:$8 sps:$4 sm:$0xff]   ;;  %v4242_v15 = vld [vmem:[%s4394_s25 + $0x70] ss:$8 sps:$4 sm:$0xff]   ;;  %v4246_v19 = vld [vmem:[%s4394_s25 + $0x4] ss:$8 sps:$4 sm:$0xff]  }
  0x24   : > { %465 = vxpose.xlu0.c.b16.end [2/2] (short) %v4221_v4, 128  ;;  %433 = vxpose.xlu1.c.b16.cont [2/8] %v4224_v5, 128  ;;  %v4251_v17 = vld [vmem:[%s4399_s28 + $0x18] sm:$0xff]   ;;  %v4252_v20 = vld [vmem:[%s4399_s28 + $0x10] sm:$0xff]   ;;  %v4253_v22 = vld [vmem:[%s4399_s28 + $0x8] sm:$0xff]  }
  0x25   : > { %v4226_v21 = vld [vmem:[%s4394_s25 + $0x14] ss:$8 sps:$4 sm:$0xff]   ;;  %v4229_v23 = vld [vmem:[%s4394_s25 + $0x24] ss:$8 sps:$4 sm:$0xff]  }
  0x26   : > { %599 = vmatpush1.bf16.msra.mxu0 %v4248_v10  ;;  %4142 = vmatpush1.bf16.msra.mxu1 %v4248_v10  ;;  %v4254_v24 = vld [vmem:[%s4399_s28] sm:$0xff]   ;;  %v4232_v25 = vld [vmem:[%s4394_s25 + $0x34] ss:$8 sps:$4 sm:$0xff]   ;;  %v4255_v26 = vld [vmem:[%s4399_s28 + $0x48] sm:$0xff]  }
  0x27   : > { %600 = vmatprep.subr.bf16.mxu0 %v4343_v3  ;;  %4133 = vmatprep.subr.bf16.mxu1 %v4343_v3  ;;  %v4235_v27 = vld [vmem:[%s4394_s25 + $0x44] ss:$8 sps:$4 sm:$0xff]   ;;  %v4238_v29 = vld [vmem:[%s4394_s25 + $0x54] ss:$8 sps:$4 sm:$0xff]  }
  0x28   : > { %434 = vxpose.xlu1.c.b16.cont [3/8] %v4227_v6, 128  ;;  %v4256_v28 = vld [vmem:[%s4399_s28 + $0x40] sm:$0xff]   ;;  %v4244_v31 = vld [vmem:[%s4394_s25 + $0x74] ss:$8 sps:$4 sm:$0xff]   ;;  %v270_v6 = vld [vmem:[#allocation2 + $0x48] sm:$0xff] }
  0x29   : > { %v4241_v30 = vld [vmem:[%s4394_s25 + $0x64] ss:$8 sps:$4 sm:$0xff]   ;;  %v267_v58 = vld [vmem:[#allocation2 + $0xb0] sm:$0xff] }
  0x2a   : > { %601 = vmatpush1.bf16.msra.mxu0 %v4249_v12  ;;  %4143 = vmatpush1.bf16.msra.mxu1 %v4249_v12  ;;  %v268_v62 = vld [vmem:[#allocation2] sm:$0xff]  ;;  %v269_v2 = vld [vmem:[#allocation2 + $0x10] sm:$0xff] }
  0x2b   : > { %602 = vmatprep.subr.bf16.mxu0 %v4343_v3  ;;  %4134 = vmatprep.subr.bf16.mxu1 %v4343_v3  ;;  %v271_v10 = vld [vmem:[#allocation2 + $0x60] sm:$0xff] }
  0x2c   : > { %435 = vxpose.xlu1.c.b16.cont [4/8] %v4230_v7, 128 }
  0x2e   : > { %603 = vmatpush1.bf16.msra.mxu0 %v4250_v14  ;;  %4144 = vmatpush1.bf16.msra.mxu1 %v4250_v14  ;;  %v272_v14 = vld [vmem:[#allocation2 + $0x28] sm:$0xff] }
  0x2f   : > { %604 = vmatprep.subr.bf16.mxu0 %v4343_v3  ;;  %4135 = vmatprep.subr.bf16.mxu1 %v4343_v3 }
  0x30   : > { %436 = vxpose.xlu1.c.b16.cont [5/8] %v4233_v9, 128 }
  0x32   : > { %605 = vmatpush1.bf16.msra.mxu0 %v4251_v17  ;;  %4145 = vmatpush1.bf16.msra.mxu1 %v4251_v17 }
  0x33   : > { %606 = vmatprep.subr.bf16.mxu0 %v4343_v3  ;;  %4136 = vmatprep.subr.bf16.mxu1 %v4343_v3 }
  0x34   : > { %437 = vxpose.xlu1.c.b16.cont [6/8] %v4236_v11, 128 }
  0x36   : > { %607 = vmatpush1.bf16.msra.mxu0 %v4252_v20  ;;  %4146 = vmatpush1.bf16.msra.mxu1 %v4252_v20 }
  0x37   : > { %608 = vmatprep.subr.bf16.mxu0 %v4343_v3  ;;  %4137 = vmatprep.subr.bf16.mxu1 %v4343_v3 }
  0x38   : > { %438 = vxpose.xlu1.c.b16.cont [7/8] %v4239_v13, 128 }
  0x3a   : > { %609 = vmatpush1.bf16.msra.mxu0 %v4253_v22  ;;  %4147 = vmatpush1.bf16.msra.mxu1 %v4253_v22  ;;  %v274_v22 = vld [vmem:[#allocation2 + $0x78] sm:$0xff] }
  0x3b   : > { %610 = vmatprep.subr.bf16.mxu0 %v4343_v3  ;;  %4138 = vmatprep.subr.bf16.mxu1 %v4343_v3 }
  0x3c   : > { %439 = vxpose.xlu1.c.b16.end [8/8] %v4242_v15, 128 }
  0x3d   : > { %480 = vxpose.xlu0.c.b16.start [1/2] (short) (narrow) %v4245_v16, 80 }
  0x3e   : > { %611 = vmatpush1.bf16.msra.mxu0 %v4254_v24  ;;  %4148 = vmatpush1.bf16.msra.mxu1 %v4254_v24 }
  0x3f   : > { %624 = vmatprep.subr.bf16.mxu0 %v4343_v3  ;;  %4139 = vmatprep.subr.bf16.mxu1 %v4343_v3 }
  0x40   : > { %448 = vxpose.xlu1.c.b16.start [1/8] (narrow) %v4246_v19, 80 }
  0x41   : > { %481 = vxpose.xlu0.c.b16.end [2/2] (short) (narrow) %v4223_v18, 80  ;;  %v273_v18 = vld [vmem:[#allocation2 + $0x40] sm:$0xff] }
  0x42   : > { %625 = vmatpush2.bf16.msra.mxu0 %v4255_v26  ;;  %4149 = vmatpush2.bf16.msra.mxu1 %v4255_v26 }
  0x43   : > { %626 = vmatprep.subr.bf16.mxu0 %v4343_v3  ;;  %4140 = vmatprep.subr.bf16.mxu1 %v4343_v3 }
  0x44   : > { %449 = vxpose.xlu1.c.b16.cont [2/8] (narrow) %v4226_v21, 80 }
  0x46   : > { %627 = vmatpush2.bf16.msra.mxu0 %v4256_v28  ;;  %4150 = vmatpush2.bf16.msra.mxu1 %v4256_v28 }
  0x48   : > { %450 = vxpose.xlu1.c.b16.cont [3/8] (narrow) %v4229_v23, 80  ;;  %v281_v23 = vld [vmem:[#allocation2 + $0x98] sm:$0xff] }
  0x4c   : > { %451 = vxpose.xlu1.c.b16.cont [4/8] (narrow) %v4232_v25, 80 }
  0x50   : > { %452 = vxpose.xlu1.c.b16.cont [5/8] (narrow) %v4235_v27, 80 }
  0x54   : > { %453 = vxpose.xlu1.c.b16.cont [6/8] (narrow) %v4238_v29, 80 }
  0x58   : > { %454 = vxpose.xlu1.c.b16.cont [7/8] (narrow) %v4241_v30, 80  ;;  %v275_v30 = vld [vmem:[#allocation2 + $0x80] sm:$0xff] }
  0x5c   : > { %455 = vxpose.xlu1.c.b16.end [8/8] (narrow) %v4244_v31, 80  ;;  %v282_v31 = vld [vmem:[#allocation2 + $0xa0] sm:$0xff] }
  0x82   : > { %v472_v32 = vpop.trf.xlu0  ;;  %v440_v33 = vpop.trf.xlu1 }
  0x83   : > { %4001 = vmatprep.mubr.msk.bf16.mxu0 %vm556_vm0, %v472_v32 }
  0x84   : > { %629 = vmatmul.mubr.bf16.vlgmr.msra.gmra.mxu0 %v440_v33 }
  0x86   : > { %v473_v34 = vpop.trf.xlu0  ;;  %v441_v35 = vpop.trf.xlu1 }
  0x87   : > { %4002 = vmatprep.mubr.msk.bf16.mxu0 %vm556_vm0, %v473_v34 }
  0x8a   : > { %v474_v36 = vpop.trf.xlu0  ;;  %v442_v37 = vpop.trf.xlu1 }
  0x8c   : > { %637 = vmatmul.mubr.bf16.gmra.mxu0 %v441_v35 }
  0x8d   : > { %4003 = vmatprep.mubr.msk.bf16.mxu0 %vm556_vm0, %v474_v36 }
  0x8e   : > { %v475_v38 = vpop.trf.xlu0  ;;  %v443_v39 = vpop.trf.xlu1 }
  0x92   : > { %v476_v40 = vpop.trf.xlu0  ;;  %v444_v41 = vpop.trf.xlu1 }
  0x94   : > { %645 = vmatmul.mubr.bf16.gmra.mxu0 %v442_v37 }
  0x95   : > { %4004 = vmatprep.mubr.msk.bf16.mxu0 %vm556_vm0, %v475_v38  ;;  %v276_v38 = vld [vmem:[#allocation2 + $0x88] sm:$0xff] }
  0x96   : > { %v477_v42 = vpop.trf.xlu0  ;;  %v445_v43 = vpop.trf.xlu1 }
  0x9a   : > { %v478_v44 = vpop.trf.xlu0  ;;  %v446_v45 = vpop.trf.xlu1 }
  0x9c   : > { %653 = vmatmul.mubr.bf16.gmra.mxu0 %v443_v39  ;;  %v283_v39 = vld [vmem:[#allocation2 + $0x20] sm:$0xff] }
  0x9d   : > { %4005 = vmatprep.mubr.msk.bf16.mxu0 %vm556_vm0, %v476_v40 }
  0x9e   : > { %v479_v46 = vpop.trf.xlu0  ;;  %v447_v47 = vpop.trf.xlu1 }
  0x9f   : > { %4008 = vmatprep.mubr.msk.bf16.mxu1 %vm556_vm0, %v479_v46  ;;  %v277_v46 = vld [vmem:[#allocation2 + $0xb8] sm:$0xff] }
  0xa0   : > { %685 = vmatmul.mubr.bf16.vlgmr.msra.gmra.mxu1 %v447_v47  ;;  %v284_v47 = vld [vmem:[#allocation2 + $0x30] sm:$0xff] }
  0xa2   : > { %v488_v48 = vpop.trf.xlu0  ;;  %v456_v49 = vpop.trf.xlu1 }
  0xa3   : > { %4009 = vmatprep.mubr.msk.bf16.mxu1 %vm556_vm0, %v488_v48 }
  0xa4   : > { %661 = vmatmul.mubr.bf16.gmra.mxu0 %v444_v41 }
  0xa5   : > { %4006 = vmatprep.mubr.msk.bf16.mxu0 %vm556_vm0, %v477_v42 }
  0xa6   : > { %v489_v50 = vpop.trf.xlu0  ;;  %v457_v51 = vpop.trf.xlu1 }
  0xa8   : > { %693 = vmatmul.mubr.bf16.gmra.mxu1 %v456_v49 }
  0xa9   : > { %4010 = vmatprep.mubr.msk.bf16.mxu1 %vm556_vm0, %v489_v50 }
  0xaa   : > { %v490_v52 = vpop.trf.xlu0  ;;  %v458_v53 = vpop.trf.xlu1 }
  0xac   : > { %669 = vmatmul.mubr.bf16.gmra.mxu0 %v445_v43 }
  0xad   : > { %4007 = vmatprep.mubr.msk.bf16.mxu0 %vm556_vm0, %v478_v44 }
  0xae   : > { %v491_v54 = vpop.trf.xlu0  ;;  %v459_v55 = vpop.trf.xlu1 }
  0xb0   : > { %701 = vmatmul.mubr.bf16.gmra.mxu1 %v457_v51 }
  0xb1   : > { %4011 = vmatprep.mubr.msk.bf16.mxu1 %vm556_vm0, %v490_v52 }
  0xb2   : > { %v492_v56 = vpop.trf.xlu0  ;;  %v460_v57 = vpop.trf.xlu1 }
  0xb4   : > { %677 = vmatmul.mubr.bf16.gmra.mxu0 %v446_v45 }
  0xb8   : > { %709 = vmatmul.mubr.bf16.gmra.mxu1 %v458_v53 }
  0xb9   : > { %4012 = vmatprep.mubr.msk.bf16.mxu1 %vm556_vm0, %v491_v54  ;;  %v278_v54 = vld [vmem:[#allocation2 + $0x70] sm:$0xff] }
  0xc0   : > { %717 = vmatmul.mubr.bf16.gmra.mxu1 %v459_v55  ;;  %v285_v55 = vld [vmem:[#allocation2 + $0x90] sm:$0xff] }
  0xc1   : > { %4013 = vmatprep.mubr.msk.bf16.mxu1 %vm556_vm0, %v492_v56 }
  0xc8   : > { %725 = vmatmul.mubr.bf16.gmra.mxu1 %v460_v57 }
 0x144   : > { %v630_v59 = vpop.f32.mrf.mxu0 }
 0x145   : > { %v732_v60 = vadd.f32 %v630_v59, %v267_v58 }
 0x146   : > { %v632_v61 = vpop.f32.mrf.mxu0 }
 0x147   : > { %757 = vst [vmem:[#allocation2 + $0xb0] sm:$0xff] %v732_v60 }
 0x148   : > { %v633_v63 = vpop.f32.mrf.mxu0 }
 0x149   : > { %v733_v0 = vadd.f32 %v633_v63, %v268_v62  ;;  %v279_v62 = vld [vmem:[#allocation2 + $0x18] sm:$0xff] }
 0x14a   : > { %v635_v1 = vpop.f32.mrf.mxu0  ;;  %v286_v63 = vld [vmem:[#allocation2 + $0x38] sm:$0xff] }
 0x14b   : > { %758 = vst [vmem:[#allocation2] sm:$0xff] %v733_v0 }
 0x14c   : > { %v638_v3 = vpop.f32.mrf.mxu0 }
 0x14d   : > { %v734_v4 = vadd.f32 %v638_v3, %v269_v2 }
 0x14e   : > { %v640_v5 = vpop.f32.mrf.mxu0 }
 0x14f   : > { %759 = vst [vmem:[#allocation2 + $0x10] sm:$0xff] %v734_v4 }
 0x150   : > { %v641_v7 = vpop.f32.mrf.mxu0 }
 0x151   : > { %v735_v8 = vadd.f32 %v641_v7, %v270_v6  ;;  %v280_v6 = vld [vmem:[#allocation2 + $0x68] sm:$0xff]  ;;  %v287_v7 = vld [vmem:[#allocation2 + $0x58] sm:$0xff] }
 0x152   : > { %v643_v9 = vpop.f32.mrf.mxu0 }
 0x153   : > { %760 = vst [vmem:[#allocation2 + $0x48] sm:$0xff] %v735_v8 }
 0x154   : > { %v646_v11 = vpop.f32.mrf.mxu0 }
 0x155   : > { %v736_v12 = vadd.f32 %v646_v11, %v271_v10 }
 0x156   : > { %v648_v13 = vpop.f32.mrf.mxu0 }
 0x157   : > { %761 = vst [vmem:[#allocation2 + $0x60] sm:$0xff] %v736_v12 }
 0x158   : > { %v649_v15 = vpop.f32.mrf.mxu0 }
 0x159   : > { %v737_v16 = vadd.f32 %v649_v15, %v272_v14  ;;  %v288_v14 = vld [vmem:[#allocation2 + $0x50] sm:$0xff] }
 0x15a   : > { %v651_v17 = vpop.f32.mrf.mxu0 }
 0x15b   : > { %762 = vst [vmem:[#allocation2 + $0x28] sm:$0xff] %v737_v16 }
 0x15c   : > { %v654_v19 = vpop.f32.mrf.mxu0 }
 0x15d   : > { %v738_v20 = vadd.f32 %v654_v19, %v273_v18  ;;  %v289_v18 = vld [vmem:[#allocation2 + $0x8] sm:$0xff] }
 0x15e   : > { %v656_v21 = vpop.f32.mrf.mxu0 }
 0x15f   : > { %763 = vst [vmem:[#allocation2 + $0x40] sm:$0xff] %v738_v20 }
 0x160   : > { %v657_v24 = vpop.f32.mrf.mxu0  ;;  %v686_v25 = vpop.f32.mrf.mxu1 }
 0x161   : > { %v739_v26 = vadd.f32 %v657_v24, %v274_v22  ;;  %v746_v27 = vadd.f32 %v686_v25, %v281_v23  ;;  %v290_v22 = vld [vmem:[#allocation2 + $0xa8] sm:$0xff] }
 0x162   : > { %v659_v28 = vpop.f32.mrf.mxu0  ;;  %v688_v29 = vpop.f32.mrf.mxu1 }
 0x163   : > { %764 = vst [vmem:[#allocation2 + $0x78] sm:$0xff] %v739_v26  ;;  %771 = vst [vmem:[#allocation2 + $0x98] sm:$0xff] %v746_v27  ;;  %v291_v26 = vld [vmem:[#allocation2 + $0xc0] sm:$0xf] }
 0x164   : > { %v662_v32 = vpop.f32.mrf.mxu0  ;;  %v689_v33 = vpop.f32.mrf.mxu1 }
 0x165   : > { %v740_v34 = vadd.f32 %v662_v32, %v275_v30  ;;  %v747_v35 = vadd.f32 %v689_v33, %v282_v31 }
 0x166   : > { %v664_v36 = vpop.f32.mrf.mxu0  ;;  %v691_v37 = vpop.f32.mrf.mxu1 }
 0x167   : > { %765 = vst [vmem:[#allocation2 + $0x80] sm:$0xff] %v740_v34  ;;  %772 = vst [vmem:[#allocation2 + $0xa0] sm:$0xff] %v747_v35 }
 0x168   : > { %v665_v40 = vpop.f32.mrf.mxu0  ;;  %v694_v41 = vpop.f32.mrf.mxu1 }
 0x169   : > { %v741_v42 = vadd.f32 %v665_v40, %v276_v38  ;;  %v748_v43 = vadd.f32 %v694_v41, %v283_v39 }
 0x16a   : > { %v667_v44 = vpop.f32.mrf.mxu0  ;;  %v696_v45 = vpop.f32.mrf.mxu1 }
 0x16b   : > { %766 = vst [vmem:[#allocation2 + $0x88] sm:$0xff] %v741_v42  ;;  %773 = vst [vmem:[#allocation2 + $0x20] sm:$0xff] %v748_v43 }
 0x16c   : > { %v670_v48 = vpop.f32.mrf.mxu0  ;;  %v697_v49 = vpop.f32.mrf.mxu1 }
 0x16d   : > { %v742_v50 = vadd.f32 %v670_v48, %v277_v46  ;;  %v749_v51 = vadd.f32 %v697_v49, %v284_v47 }
 0x16e   : > { %v672_v52 = vpop.f32.mrf.mxu0  ;;  %v699_v53 = vpop.f32.mrf.mxu1 }
 0x16f   : > { %767 = vst [vmem:[#allocation2 + $0xb8] sm:$0xff] %v742_v50  ;;  %774 = vst [vmem:[#allocation2 + $0x30] sm:$0xff] %v749_v51 }
 0x170   : > { %v673_v56 = vpop.f32.mrf.mxu0  ;;  %v702_v57 = vpop.f32.mrf.mxu1 }
 0x171   : > { %v743_v58 = vadd.f32 %v673_v56, %v278_v54  ;;  %v750_v59 = vadd.f32 %v702_v57, %v285_v55 }
 0x172   : > { %v675_v60 = vpop.f32.mrf.mxu0  ;;  %v704_v61 = vpop.f32.mrf.mxu1 }
 0x173   : > { %768 = vst [vmem:[#allocation2 + $0x70] sm:$0xff] %v743_v58  ;;  %775 = vst [vmem:[#allocation2 + $0x90] sm:$0xff] %v750_v59 }
 0x174   : > { %v678_v0 = vpop.f32.mrf.mxu0  ;;  %v705_v1 = vpop.f32.mrf.mxu1 }
 0x175   : > { %v744_v2 = vadd.f32 %v678_v0, %v279_v62  ;;  %v751_v3 = vadd.f32 %v705_v1, %v286_v63 }
 0x176   : > { %v680_v4 = vpop.f32.mrf.mxu0  ;;  %v707_v5 = vpop.f32.mrf.mxu1 }
 0x177   : > { %769 = vst [vmem:[#allocation2 + $0x18] sm:$0xff] %v744_v2  ;;  %776 = vst [vmem:[#allocation2 + $0x38] sm:$0xff] %v751_v3 }
 0x178   : > { %v681_v8 = vpop.f32.mrf.mxu0  ;;  %v710_v9 = vpop.f32.mrf.mxu1 }
 0x179   : > { %v745_v10 = vadd.f32 %v681_v8, %v280_v6  ;;  %v752_v11 = vadd.f32 %v710_v9, %v287_v7 }
 0x17a   : > { %v683_v12 = vpop.f32.mrf.mxu0  ;;  %v712_v13 = vpop.f32.mrf.mxu1 }
 0x17b   : > { %770 = vst [vmem:[#allocation2 + $0x68] sm:$0xff] %v745_v10  ;;  %777 = vst [vmem:[#allocation2 + $0x58] sm:$0xff] %v752_v11 }
 0x17c   : > { %v713_v15 = vpop.f32.mrf.mxu1 }
 0x17d   : > { %v753_v16 = vadd.f32 %v713_v15, %v288_v14 }
 0x17e   : > { %v715_v17 = vpop.f32.mrf.mxu1 }
 0x17f   : > { %778 = vst [vmem:[#allocation2 + $0x50] sm:$0xff] %v753_v16 }
 0x180   : > { %v718_v19 = vpop.f32.mrf.mxu1 }
 0x181   : > { %v754_v20 = vadd.f32 %v718_v19, %v289_v18 }
 0x182   : > { %v720_v21 = vpop.f32.mrf.mxu1 }
 0x183   : > { %779 = vst [vmem:[#allocation2 + $0x8] sm:$0xff] %v754_v20 }
 0x184   : > { %v721_v23 = vpop.f32.mrf.mxu1 }
 0x185   : > { %v755_v24 = vadd.f32 %v721_v23, %v290_v22 }
 0x186   : > { %v723_v25 = vpop.f32.mrf.mxu1 }
 0x187   : > { %780 = vst [vmem:[#allocation2 + $0xa8] sm:$0xff] %v755_v24 }
 0x188   : > { %v726_v27 = vpop.f32.mrf.mxu1 }
 0x189   : > { %v756_v28 = vadd.f32 %v726_v27, %v291_v26 }
 0x18a   : > { %v728_v29 = vpop.f32.mrf.mxu1  ;;  %785 = sbr.rel (%p4014_p5) target bundleno = 1238 (0x4d6), region = 48 }
 0x18b   : > { %781 = vst [vmem:[#allocation2 + $0xc0] sm:$0xf] %v756_v28 }
 0x18c   : > { %v729_v30 = vpop.f32.mrf.mxu1 }
 0x18e   : > { %v730_v31 = vpop.f32.mrf.mxu1 }
 0x18f   : > { %v4257_v32 = vld [vmem:[%s7140_s4 + $0xac] ss:$12 sps:$4 sm:$0xff]   ;;  %v4259_v33 = vld [vmem:[%s7140_s4 + $0xa8] ss:$12 sps:$4 sm:$0xff]   ;;  %v7148_v34 = vmov 0   ;;  %v4493_v42 = vld [vmem:[#allocation2] sm:$0xff] }
 0x190   : > { %1202 = vmatprep.mubr.bf16.mxu0 %v7148_v34  ;;  %1170 = vmatprep.subr.bf16.mxu0 %v4257_v32  ;;  %v4260_v35 = vld [vmem:[%s7140_s4 + $0x94] ss:$12 sps:$4 sm:$0xff]   ;;  %v4262_v36 = vld [vmem:[%s7140_s4 + $0x90] ss:$12 sps:$4 sm:$0xff]   ;;  %v4265_v38 = vld [vmem:[%s7140_s4 + $0x78] ss:$12 sps:$4 sm:$0xff]   ;;  %v844_v47 = vmul.f32 %v4493_v42, %v4493_v42 }
 0x191   : > { %1171 = vmatpush1.bf16.msra.mxu0 %v4259_v33  ;;  %v4263_v37 = vld [vmem:[%s7140_s4 + $0x7c] ss:$12 sps:$4 sm:$0xff]   ;;  %v4266_v39 = vld [vmem:[%s7140_s4 + $0x64] ss:$12 sps:$4 sm:$0xff]   ;;  %v4268_v41 = vld [vmem:[%s7140_s4 + $0x60] ss:$12 sps:$4 sm:$0xff]  }
 0x192   : > { %1172 = vmatprep.subr.bf16.mxu0 %v4260_v35  ;;  %v4488_v40 = vld [vmem:[#allocation2 + $0xb0] sm:$0xff]  ;;  %v4269_v45 = vld [vmem:[%s7140_s4 + $0x4c] ss:$12 sps:$4 sm:$0xff]   ;;  %v4514_v52 = vld [vmem:[#allocation2 + $0x60] sm:$0xff]  ;;  %v4345_v28 = vmov 0.0   ;;  %vm4346_vm1 = vmmov 0  }
 0x193   : > { %v4495_v43 = vld [vmem:[#allocation2 + $0x10] sm:$0xff]  ;;  %v843_v44 = vmul.f32 %v4488_v40, %v4488_v40  ;;  %v811_v46 = vadd.f32 %v4493_v42, %v4488_v40  ;;  %v4506_v48 = vld [vmem:[#allocation2 + $0x48] sm:$0xff]  ;;  %v847_v61 = vmul.f32 %v4514_v52, %v4514_v52  ;;  %v4533_v63 = vld [vmem:[#allocation2 + $0x40] sm:$0xff]  ;;  %4063 = vmatprep.subr.bf16.mxu1 %v4345_v28  ;;  %1468 = vst [vmem:[#allocation3 + $0x8] sm:$0xff] %v4345_v28  ;;  %vm834_vm2 = vcmask 1043456   ;;  %s4347_s8 = smov 64  }
 0x194   : > { %v845_v49 = vmul.f32 %v4495_v43, %v4495_v43  ;;  %v4271_v51 = vld [vmem:[%s7140_s4 + $0x48] ss:$12 sps:$4 sm:$0xff]   ;;  %v846_v56 = vmul.f32 %v4506_v48, %v4506_v48  ;;  %v4274_v59 = vld [vmem:[%s7140_s4 + $0x30] ss:$12 sps:$4 sm:$0xff]   ;;  %v4277_v4 = vld [vmem:[%s7140_s4 + $0x18] ss:$12 sps:$4 sm:$0xff]   ;;  %v849_v8 = vmul.f32 %v4533_v63, %v4533_v63  ;;  %4079 = vmatprep.mubr.msk.bf16.mxu1 %vm4346_vm1, %v4345_v28 }
 0x195   : > { %1173 = vmatpush1.bf16.msra.mxu0 %v4262_v36  ;;  %v812_v50 = vadd.f32 %v811_v46, %v4495_v43  ;;  %v868_v53 = vadd.f32 %v844_v47, %v843_v44  ;;  %v4272_v54 = vld [vmem:[%s7140_s4 + $0x34] ss:$12 sps:$4 sm:$0xff]   ;;  %v4522_v57 = vld [vmem:[#allocation2 + $0x28] sm:$0xff]  ;;  %v4535_v0 = vld [vmem:[#allocation2 + $0x78] sm:$0xff]  ;;  %1467 = vst [vmem:[#allocation3] sm:$0xff] %v4345_v28  ;;  %vm3520_vm3 = vcmask 1042432  }
 0x196   : > { %1174 = vmatprep.subr.bf16.mxu0 %v4263_v37  ;;  %v4275_v62 = vld [vmem:[%s7140_s4 + $0x1c] ss:$12 sps:$4 sm:$0xff]   ;;  %v848_v2 = vmul.f32 %v4522_v57, %v4522_v57  ;;  %v4543_v5 = vld [vmem:[#allocation2 + $0x80] sm:$0xff]  ;;  %v850_v11 = vmul.f32 %v4535_v0, %v4535_v0  ;;  %v4567_v22 = vld [vmem:[#allocation2 + $0x70] sm:$0xff]  ;;  %1470 = vst [vmem:[#allocation3 + $0x18] sm:$0x7f] %v4345_v28 }
 0x197   : > { %v813_v55 = vadd.f32 %v812_v50, %v4506_v48  ;;  %v869_v58 = vadd.f32 %v868_v53, %v845_v49  ;;  %v4278_v6 = vld [vmem:[%s7140_s4 + $0x4] ss:$12 sps:$4 sm:$0xff]   ;;  %v4554_v13 = vld [vmem:[#allocation2 + $0x88] sm:$0xff]  ;;  %v4556_v14 = vld [vmem:[#allocation2 + $0xb8] sm:$0xff]  ;;  %v851_v16 = vmul.f32 %v4543_v5, %v4543_v5  ;;  %1475 = vst [vmem:[#allocation3 + $0x278] sm:$0xf8] %v4345_v28  ;;  %v854_v30 = vmul.f32 %v4567_v22, %v4567_v22 }
 0x198   : > { %v4280_v18 = vld [vmem:[%s7140_s4] ss:$12 sps:$4 sm:$0xff]   ;;  %v852_v20 = vmul.f32 %v4554_v13, %v4554_v13  ;;  %v853_v23 = vmul.f32 %v4556_v14, %v4556_v14  ;;  %v4281_v26 = vld [vmem:[%s7140_s4 + $0xb0] ss:$12 sps:$4 sm:$0xff]   ;;  %1480 = vst.msk [vmem:[#allocation3 + $0x298] sm:$0xff] %vm556_vm0, %v4345_v28  ;;  %1482 = vst [vmem:[#allocation3 + $0x2a8] sm:$0xff] %v4345_v28 }
 0x199   : > { %1175 = vmatpush1.bf16.msra.mxu0 %v4265_v38  ;;  %v814_v60 = vadd.f32 %v813_v55, %v4514_v52  ;;  %v870_v3 = vadd.f32 %v869_v58, %v846_v56  ;;  %v4575_v27 = vld [vmem:[#allocation2 + $0x18] sm:$0xff]  ;;  %1483 = vst.msk [vmem:[#allocation3 + $0x2b0] sm:$0xff] %vm556_vm0, %v4345_v28  ;;  %4064 = vmatpush3.bf16.msra.mxu1 %v4281_v26  ;;  %v4593_v33 = vld [vmem:[#allocation2 + $0x68] sm:$0xff]  ;;  %v4607_v46 = vld [vmem:[#allocation2 + $0xa0] sm:$0xff]  ;;  %s4348_s9 = smov 32   ;;  %vm1559_vm12 = vcmask 1046528  }
 0x19a   : > { %1176 = vmatprep.subr.bf16.mxu0 %v4266_v39  ;;  %v4282_v32 = vld [vmem:[%s7140_s4 + $0x98] ss:$12 sps:$4 sm:$0xff]   ;;  %4065 = vmatprep.subr.bf16.mxu1 %v4345_v28  ;;  %v855_v36 = vmul.f32 %v4575_v27, %v4575_v27  ;;  %v4284_v56 = vld [vmem:[%s7140_s4 + $0x68] ss:$12 sps:$4 sm:$0xff]   ;;  %s4349_s10 = smov 96  }
 0x19b   : > { %v815_v1 = vadd.f32 %v814_v60, %v4522_v57  ;;  %v871_v9 = vadd.f32 %v870_v3, %v847_v61  ;;  %v4599_v38 = vld [vmem:[#allocation2 + $0x98] sm:$0xff]  ;;  %v4623_v58 = vld [vmem:[#allocation2 + $0x30] sm:$0xff] }
 0x19c   : > { %v857_v49 = vmul.f32 %v4599_v38, %v4599_v38 }
 0x19d   : > { %1177 = vmatpush1.bf16.msra.mxu0 %v4268_v41  ;;  %v816_v7 = vadd.f32 %v815_v1, %v4533_v63  ;;  %v872_v12 = vadd.f32 %v871_v9, %v848_v2  ;;  %v856_v41 = vmul.f32 %v4593_v33, %v4593_v33  ;;  %4066 = vmatpush3.bf16.msra.mxu1 %v4282_v32 }
 0x19e   : > { %1178 = vmatprep.subr.bf16.mxu0 %v4269_v45  ;;  %v4283_v45 = vld [vmem:[%s7140_s4 + $0x80] ss:$12 sps:$4 sm:$0xff]   ;;  %4067 = vmatprep.subr.bf16.mxu1 %v4345_v28  ;;  %v860_v2 = vmul.f32 %v4623_v58, %v4623_v58 }
 0x19f   : > { %v817_v10 = vadd.f32 %v816_v7, %v4535_v0  ;;  %v873_v17 = vadd.f32 %v872_v12, %v849_v8 }
 0x1a1   : > { %1179 = vmatpush1.bf16.msra.mxu0 %v4271_v51  ;;  %v818_v15 = vadd.f32 %v817_v10, %v4543_v5  ;;  %v874_v21 = vadd.f32 %v873_v17, %v850_v11  ;;  %v4613_v51 = vld [vmem:[#allocation2 + $0x20] sm:$0xff]  ;;  %4068 = vmatpush3.bf16.msra.mxu1 %v4283_v45  ;;  %v4643_v10 = vld [vmem:[#allocation2 + $0x58] sm:$0xff]  ;;  %v4651_v17 = vld [vmem:[#allocation2 + $0x50] sm:$0xff] }
 0x1a2   : > { %1180 = vmatprep.subr.bf16.mxu0 %v4272_v54  ;;  %v858_v54 = vmul.f32 %v4607_v46, %v4607_v46  ;;  %4069 = vmatprep.subr.bf16.mxu1 %v4345_v28  ;;  %v859_v60 = vmul.f32 %v4613_v51, %v4613_v51  ;;  %v4288_v45 = vld [vmem:[%s7140_s4 + $0x8] ss:$12 sps:$4 sm:$0xff]  }
 0x1a3   : > { %v819_v19 = vadd.f32 %v818_v15, %v4554_v13  ;;  %v875_v25 = vadd.f32 %v874_v21, %v851_v16  ;;  %v4286_v16 = vld [vmem:[%s7140_s4 + $0x38] ss:$12 sps:$4 sm:$0xff]   ;;  %v4657_v21 = vld [vmem:[#allocation2 + $0x8] sm:$0xff] }
 0x1a4   : > { %v865_v32 = vmul.f32 %v4657_v21, %v4657_v21 }
 0x1a5   : > { %1181 = vmatpush1.bf16.msra.mxu0 %v4274_v59  ;;  %v820_v24 = vadd.f32 %v819_v19, %v4556_v14  ;;  %v876_v31 = vadd.f32 %v875_v25, %v852_v20  ;;  %4070 = vmatpush3.bf16.msra.mxu1 %v4284_v56  ;;  %v863_v19 = vmul.f32 %v4643_v10, %v4643_v10 }
 0x1a6   : > { %1182 = vmatprep.subr.bf16.mxu0 %v4275_v62  ;;  %v4629_v62 = vld [vmem:[#allocation2 + $0x90] sm:$0xff]  ;;  %4071 = vmatprep.subr.bf16.mxu1 %v4345_v28  ;;  %v864_v25 = vmul.f32 %v4651_v17, %v4651_v17 }
 0x1a7   : > { %v821_v29 = vadd.f32 %v820_v24, %v4567_v22  ;;  %v877_v37 = vadd.f32 %v876_v31, %v853_v23  ;;  %v861_v8 = vmul.f32 %v4629_v62, %v4629_v62  ;;  %v4659_v23 = vld [vmem:[#allocation2 + $0xc0] sm:$0xf] }
 0x1a9   : > { %1183 = vmatpush1.bf16.msra.mxu0 %v4277_v4  ;;  %v822_v35 = vadd.f32 %v821_v29, %v4575_v27  ;;  %v878_v44 = vadd.f32 %v877_v37, %v854_v30  ;;  %v4285_v4 = vld [vmem:[%s7140_s4 + $0x50] ss:$12 sps:$4 sm:$0xff]   ;;  %v4287_v29 = vld [vmem:[%s7140_s4 + $0x20] ss:$12 sps:$4 sm:$0xff]   ;;  %v867_v37 = vmul.f32 %v4659_v23, %v4659_v23 }
 0x1aa   : > { %1184 = vmatprep.subr.bf16.mxu0 %v4278_v6  ;;  %v4637_v6 = vld [vmem:[#allocation2 + $0x38] sm:$0xff]  ;;  %4072 = vmatpush3.bf16.msra.mxu1 %v4285_v4  ;;  %v4667_v30 = vld [vmem:[#allocation2 + $0xa8] sm:$0xff] }
 0x1ab   : > { %v823_v39 = vadd.f32 %v822_v35, %v4593_v33  ;;  %v879_v50 = vadd.f32 %v878_v44, %v855_v36  ;;  %v862_v12 = vmul.f32 %v4637_v6, %v4637_v6  ;;  %4073 = vmatprep.subr.bf16.mxu1 %v4345_v28  ;;  %v835_v36 = vsel %vm834_vm2, %v4659_v23, 0.0 }
 0x1ad   : > { %1185 = vmatpush1.bf16.msra.mxu0 %v4280_v18  ;;  %v824_v47 = vadd.f32 %v823_v39, %v4599_v38  ;;  %v880_v55 = vadd.f32 %v879_v50, %v856_v41  ;;  %v866_v41 = vmul.f32 %v4667_v30, %v4667_v30  ;;  %v891_v50 = vsel %vm834_vm2, %v867_v37, 0.0 }
 0x1ae   : > { %4074 = vmatpush3.bf16.msra.mxu1 %v4286_v16 }
 0x1af   : > { %v825_v53 = vadd.f32 %v824_v47, %v4607_v46  ;;  %v881_v61 = vadd.f32 %v880_v55, %v857_v49  ;;  %4075 = vmatprep.subr.bf16.mxu1 %v4345_v28 }
 0x1b1   : > { %v826_v59 = vadd.f32 %v825_v53, %v4613_v51  ;;  %v882_v3 = vadd.f32 %v881_v61, %v858_v54 }
 0x1b2   : > { %4076 = vmatpush3.bf16.msra.mxu1 %v4287_v29 }
 0x1b3   : > { %v827_v1 = vadd.f32 %v826_v59, %v4623_v58  ;;  %v883_v9 = vadd.f32 %v882_v3, %v859_v60  ;;  %4077 = vmatprep.subr.bf16.mxu1 %v4345_v28 }
 0x1b5   : > { %v828_v7 = vadd.f32 %v827_v1, %v4629_v62  ;;  %v884_v15 = vadd.f32 %v883_v9, %v860_v2 }
 0x1b6   : > { %4078 = vmatpush3.bf16.msra.mxu1 %v4288_v45 }
 0x1b7   : > { %v829_v11 = vadd.f32 %v828_v7, %v4637_v6  ;;  %v885_v20 = vadd.f32 %v884_v15, %v861_v8 }
 0x1b9   : > { %v830_v18 = vadd.f32 %v829_v11, %v4643_v10  ;;  %v886_v26 = vadd.f32 %v885_v20, %v862_v12 }
 0x1bb   : > { %v831_v24 = vadd.f32 %v830_v18, %v4651_v17  ;;  %v887_v35 = vadd.f32 %v886_v26, %v863_v19  ;;  %v911_v19 = vlaneseq }
 0x1bd   : > { %v832_v31 = vadd.f32 %v831_v24, %v4657_v21  ;;  %v888_v44 = vadd.f32 %v887_v35, %v864_v25  ;;  %v4685_v20 = vshrl.u32 %v911_v19, 7  ;;  %v903_v24 = vld [vmem:[%s7138_s2] sm:$0x1] }
 0x1bf   : > { %v833_v39 = vadd.f32 %v832_v31, %v4667_v30  ;;  %v889_v49 = vadd.f32 %v888_v44, %v865_v32  ;;  %v913_v25 = vsub.s32 0, %v4685_v20  ;;  %v907_v31 = vld [vmem:[%s7139_s3] sm:$0x1] }
 0x1c1   : > { %v836_v47 = vadd.f32 %v835_v36, %v833_v39  ;;  %v890_v54 = vadd.f32 %v889_v49, %v866_v41 }
 0x1c3   : > { %v837_v53 = vrot.slane %v836_v47, 4  ;;  %v892_v56 = vadd.f32 %v891_v50, %v890_v54 }
 0x1c5   : > { %v838_v55 = vadd.f32 %v837_v53, %v836_v47  ;;  %v893_v60 = vrot.slane %v892_v56, 4 }
 0x1c7   : > { %v839_v59 = vrot.slane %v838_v55, 2  ;;  %v894_v1 = vadd.f32 %v893_v60, %v892_v56 }
 0x1c9   : > { %v840_v61 = vadd.f32 %v839_v59, %v838_v55  ;;  %v895_v3 = vrot.slane %v894_v1, 2 }
 0x1cb   : > { %v841_v2 = vrot.slane %v840_v61, 1  ;;  %v896_v7 = vadd.f32 %v895_v3, %v894_v1 }
 0x1cd   : > { %v842_v4 = vadd.f32 %v841_v2, %v840_v61  ;;  %v897_v8 = vrot.slane %v896_v7, 1 }
 0x1cf   : > { %v899_v9 = vmul.f32 0.0051020407, %v842_v4  ;;  %v898_v11 = vadd.f32 %v897_v8, %v896_v7 }
 0x1d1   : > { %v901_v12 = vmul.f32 %v899_v9, %v899_v9  ;;  %v900_v15 = vmul.f32 0.0051020407, %v898_v11 }
 0x1d3   : > { %v902_v16 = vsub.f32 %v900_v15, %v901_v12 }
 0x1d5   : > { %v904_v18 = vadd.f32 1e-05, %v902_v16 }
 0x1d7   : > { %4289 = vrsqrt.f32 %v904_v18 }
 0x1e4   : > { %v4290_v26 = vpop.eup %4289 }
 0x1e5   : > { %v906_v29 = vmul.f32 %v4290_v26, %v903_v24 }
 0x1e7   : > { %v908_v32 = vmul.f32 %v906_v29, %v899_v9  ;;  %v4694_v35 = vrot.slane %v906_v29, %v913_v25 }
 0x1e9   : > { %v909_v36 = vsub.f32 %v907_v31, %v908_v32  ;;  %v916_v37 = vmul.f32 %v4694_v35, %v4488_v40  ;;  %v917_v39 = vmul.f32 %v4694_v35, %v4493_v42  ;;  %v918_v44 = vmul.f32 %v4694_v35, %v4495_v43 }
 0x1ea   : > { %v919_v45 = vmul.f32 %v4694_v35, %v4506_v48  ;;  %v920_v43 = vmul.f32 %v4694_v35, %v4514_v52  ;;  %v921_v48 = vmul.f32 %v4694_v35, %v4522_v57  ;;  %v922_v52 = vmul.f32 %v4694_v35, %v4533_v63 }
 0x1eb   : > { %v4700_v41 = vrot.slane %v909_v36, %v913_v25  ;;  %v923_v57 = vmul.f32 %v4694_v35, %v4535_v0  ;;  %v924_v63 = vmul.f32 %v4694_v35, %v4543_v5  ;;  %v925_v0 = vmul.f32 %v4694_v35, %v4554_v13 }
 0x1ec   : > { %v926_v5 = vmul.f32 %v4694_v35, %v4556_v14  ;;  %v927_v13 = vmul.f32 %v4694_v35, %v4567_v22  ;;  %v928_v14 = vmul.f32 %v4694_v35, %v4575_v27  ;;  %v929_v22 = vmul.f32 %v4694_v35, %v4593_v33 }
 0x1ed   : > { %v947_v47 = vadd.f32 %v4700_v41, %v916_v37  ;;  %v948_v49 = vadd.f32 %v4700_v41, %v917_v39  ;;  %v949_v54 = vadd.f32 %v4700_v41, %v918_v44  ;;  %v950_v40 = vadd.f32 %v4700_v41, %v919_v45 }
 0x1ee   : > { %v951_v60 = vadd.f32 %v4700_v41, %v920_v43  ;;  %v952_v61 = vadd.f32 %v4700_v41, %v921_v48  ;;  %v953_v4 = vadd.f32 %v4700_v41, %v922_v52  ;;  %v954_v7 = vadd.f32 %v4700_v41, %v923_v57  ;;  %v3517_v57 = vld [vmem:[#allocation3 + $0x2a8] sm:$0x1] }
 0x1ef   : > { %v972_v50 = vmax.f32 %v947_v47, 0.0  ;;  %v973_v53 = vmax.f32 %v948_v49, 0.0  ;;  %v974_v42 = vmax.f32 %v949_v54, 0.0  ;;  %v975_v56 = vmax.f32 %v950_v40, 0.0 }
 0x1f0   : > { %v976_v1 = vmax.f32 %v951_v60, 0.0  ;;  %v977_v2 = vmax.f32 %v952_v61, 0.0  ;;  %v978_v8 = vmax.f32 %v953_v4, 0.0  ;;  %v979_v9 = vmax.f32 %v954_v7, 0.0 }
 0x1f1   : > { %v997_v55 = vpack.c.bf16 %v973_v53, %v972_v50  ;;  %v998_v59 = vpack.c.bf16 %v975_v56, %v974_v42  ;;  %v955_v12 = vadd.f32 %v4700_v41, %v924_v63  ;;  %v956_v15 = vadd.f32 %v4700_v41, %v925_v0 }
 0x1f2   : > { %v999_v3 = vpack.c.bf16 %v977_v2, %v976_v1  ;;  %v1000_v11 = vpack.c.bf16 %v979_v9, %v978_v8  ;;  %v957_v24 = vadd.f32 %v4700_v41, %v926_v5  ;;  %v958_v25 = vadd.f32 %v4700_v41, %v927_v13 }
 0x1f3   : > { %1203 = vmatmul.mubr.bf16.vlgmr.msra.gmra.mxu0 %v997_v55  ;;  %4080 = vmatmul.mubr.bf16.vlgmr.msra.gmra.mxu1 %v997_v55  ;;  %v980_v16 = vmax.f32 %v955_v12, 0.0  ;;  %v981_v18 = vmax.f32 %v956_v15, 0.0  ;;  %v959_v32 = vadd.f32 %v4700_v41, %v928_v14  ;;  %v960_v36 = vadd.f32 %v4700_v41, %v929_v22 }
 0x1f4   : > { %1212 = vmatprep.mubr.bf16.mxu0 %v7148_v34  ;;  %4083 = vmatprep.mubr.msk.bf16.mxu1 %vm4346_vm1, %v4345_v28  ;;  %v982_v26 = vmax.f32 %v957_v24, 0.0  ;;  %v983_v29 = vmax.f32 %v958_v25, 0.0  ;;  %v930_v27 = vmul.f32 %v4694_v35, %v4599_v38  ;;  %v931_v33 = vmul.f32 %v4694_v35, %v4607_v46 }
 0x1f5   : > { %v1001_v19 = vpack.c.bf16 %v981_v18, %v980_v16  ;;  %v984_v37 = vmax.f32 %v959_v32, 0.0  ;;  %v985_v39 = vmax.f32 %v960_v36, 0.0  ;;  %v932_v38 = vmul.f32 %v4694_v35, %v4613_v51 }
 0x1f6   : > { %v1002_v31 = vpack.c.bf16 %v983_v29, %v982_v26  ;;  %v961_v45 = vadd.f32 %v4700_v41, %v930_v27  ;;  %v962_v47 = vadd.f32 %v4700_v41, %v931_v33  ;;  %v933_v46 = vmul.f32 %v4694_v35, %v4623_v58 }
 0x1f7   : > { %v1003_v44 = vpack.c.bf16 %v985_v39, %v984_v37  ;;  %v963_v54 = vadd.f32 %v4700_v41, %v932_v38  ;;  %v934_v51 = vmul.f32 %v4694_v35, %v4629_v62  ;;  %v935_v58 = vmul.f32 %v4694_v35, %v4637_v6 }
 0x1f8   : > { %v986_v49 = vmax.f32 %v961_v45, 0.0  ;;  %v987_v50 = vmax.f32 %v962_v47, 0.0  ;;  %v964_v40 = vadd.f32 %v4700_v41, %v933_v46  ;;  %v936_v62 = vmul.f32 %v4694_v35, %v4643_v10 }
 0x1f9   : > { %v988_v55 = vmax.f32 %v963_v54, 0.0  ;;  %v965_v43 = vadd.f32 %v4700_v41, %v934_v51  ;;  %v966_v48 = vadd.f32 %v4700_v41, %v935_v58  ;;  %v937_v6 = vmul.f32 %v4694_v35, %v4651_v17 }
 0x1fa   : > { %v1004_v53 = vpack.c.bf16 %v987_v50, %v986_v49  ;;  %v989_v42 = vmax.f32 %v964_v40, 0.0  ;;  %v967_v1 = vadd.f32 %v4700_v41, %v936_v62  ;;  %v4792_v52 = vrot.slane %v4345_v28, 4 }
 0x1fb   : > { %1213 = vmatmul.mubr.bf16.gmra.mxu0 %v998_v59  ;;  %4084 = vmatmul.mubr.bf16.gmra.mxu1 %v998_v59  ;;  %v990_v59 = vmax.f32 %v965_v43, 0.0  ;;  %v991_v60 = vmax.f32 %v966_v48, 0.0  ;;  %v968_v2 = vadd.f32 %v4700_v41, %v937_v6  ;;  %v4797_v10 = vrot.slane %v4345_v28, 5  ;;  %v2667_v43 = vld [vmem:[#allocation3] sm:$0xfc] }
 0x1fc   : > { %1222 = vmatprep.mubr.bf16.mxu0 %v7148_v34  ;;  %4087 = vmatprep.mubr.msk.bf16.mxu1 %vm4346_vm1, %v4345_v28  ;;  %v1005_v56 = vpack.c.bf16 %v989_v42, %v988_v55  ;;  %7258 = vst [vmem:[#allocation4_spill] sm:$0xff] %v4792_v52  ;;  %v3570_v17 = vrot.slane %v3517_v57, 5  ;;  %v938_v9 = vmul.f32 %v4694_v35, %v4657_v21  ;;  %v1868_v13 = vadd.s32 16, %v4685_v20  ;;  %v2491_v48 = vld [vmem:[#allocation3] sm:$0xfe] }
 0x1fd   : > { %v1006_v61 = vpack.c.bf16 %v991_v60, %v990_v59  ;;  %3439 = vrot.lane.b32.xlu1 %v4792_v52, %s4347_s8  ;;  %7259 = vst [vmem:[#allocation5_spill] sm:$0xff] %v4797_v10  ;;  %v993_v4 = vmax.f32 %v968_v2, 0.0  ;;  %v939_v63 = vmul.f32 %v4694_v35, %v4667_v30  ;;  %v940_v21 = vmul.f32 %v4694_v35, %v4659_v23 }
 0x1fe   : > { %v3571_v7 = vsel %vm3520_vm3, %v4797_v10, %v3570_v17  ;;  %v969_v0 = vadd.f32 %v4700_v41, %v938_v9  ;;  %v1867_v25 = vadd.s32 8, %v4685_v20  ;;  %v4842_v55 = vadd.s32 24, %v4685_v20 }
 0x1ff   : > { %v971_v18 = vadd.f32 %v4700_v41, %v940_v21  ;;  %v2518_v9 = vrot.slane %v2491_v48, 1 }
 0x200   : > { %v994_v12 = vmax.f32 %v969_v0, 0.0  ;;  %v4851_v2 = vmul.u32.u64.low 2454267026, %v4842_v55  ;;  %v4852_v57 = vmul.u32.u64.high 2454267026, %v4842_v55, %v4851_v2 }
 0x201   : > { %3620 = vrot.lane.b32.xlu1 %v3571_v7, %s4348_s9  ;;  %v996_v30 = vmax.f32 %v971_v18, 0.0 }
 0x203   : > { %1223 = vmatmul.mubr.bf16.gmra.mxu0 %v999_v3  ;;  %4088 = vmatmul.mubr.bf16.gmra.mxu1 %v999_v3  ;;  %v992_v3 = vmax.f32 %v967_v1, 0.0  ;;  %v1009_v5 = vpack.c.bf16 %v996_v30, %v996_v30 }
 0x204   : > { %1232 = vmatprep.mubr.bf16.mxu0 %v7148_v34  ;;  %4091 = vmatprep.mubr.msk.bf16.mxu1 %vm4346_vm1, %v4345_v28 }
 0x205   : > { %v1007_v8 = vpack.c.bf16 %v993_v4, %v992_v3 }
 0x20b   : > { %1233 = vmatmul.mubr.bf16.gmra.mxu0 %v1000_v11  ;;  %4092 = vmatmul.mubr.bf16.gmra.mxu1 %v1000_v11  ;;  %v970_v11 = vadd.f32 %v4700_v41, %v939_v63  ;;  %v4830_v35 = vmul.u32.u64.low 2454267026, %v1867_v25  ;;  %v4831_v41 = vmul.u32.u64.high 2454267026, %v1867_v25, %v4830_v35 }
 0x20c   : > { %1242 = vmatprep.mubr.bf16.mxu0 %v7148_v34  ;;  %4095 = vmatprep.mubr.msk.bf16.mxu1 %vm4346_vm1, %v4345_v28 }
 0x20d   : > { %v995_v15 = vmax.f32 %v970_v11, 0.0  ;;  %vm1911_vm6 = vc.u32 %v4830_v35, 2454267026 }
 0x20f   : > { %v1008_v16 = vpack.c.bf16 %v995_v15, %v994_v12 }
 0x213   : > { %1243 = vmatmul.mubr.bf16.gmra.mxu0 %v1001_v19  ;;  %4096 = vmatmul.mubr.bf16.gmra.mxu1 %v1001_v19  ;;  %v4821_v19 = vmul.u32.u64.low 2454267026, %v1868_v13  ;;  %v4822_v24 = vmul.u32.u64.high 2454267026, %v1868_v13, %v4821_v19 }
 0x214   : > { %1252 = vmatprep.mubr.bf16.mxu0 %v7148_v34  ;;  %4099 = vmatprep.mubr.msk.bf16.mxu1 %vm4346_vm1, %v4345_v28 }
 0x215   : > { %vm1925_vm4 = vc.u32 %v4821_v19, 2454267026 }
 0x216   : > { %v1926_v23 = vsel %vm1925_vm4, 1, %v7148_v34 }
 0x217   : > { %v1927_v29 = vadd.s32 %v4822_v24, %v1926_v23  ;;  %v4880_v23 = vadd.s32 32, %v4685_v20 }
 0x219   : > { %v1928_v22 = vshrl.u32 %v1927_v29, 3 }
 0x21b   : > { %1253 = vmatmul.mubr.bf16.gmra.mxu0 %v1002_v31  ;;  %4100 = vmatmul.mubr.bf16.gmra.mxu1 %v1002_v31  ;;  %v1912_v31 = vsel %vm1911_vm6, 1, %v7148_v34  ;;  %v1929_v37 = vmul.u32 14, %v1928_v22 }
 0x21c   : > { %1262 = vmatprep.mubr.bf16.mxu0 %v7148_v34  ;;  %4103 = vmatprep.mubr.msk.bf16.mxu1 %vm4346_vm1, %v4345_v28  ;;  %v1913_v36 = vadd.s32 %v4831_v41, %v1912_v31 }
 0x21d   : > { %v1930_v33 = vsub.s32 %v1868_v13, %v1929_v37 }
 0x21e   : > { %v1914_v27 = vshrl.u32 %v1913_v36, 3 }
 0x21f   : > { %vm2243_vm7 = vcmp.ne.s32.totalorder %v1930_v33, 0  ;;  %vm2268_vm8 = vcmp.lt.s32.totalorder %v1930_v33, 0  ;;  %v2318_v49 = vadd.s32 14, %v1930_v33 }
 0x220   : > { %v1915_v45 = vmul.u32 14, %v1914_v27  ;;  %vm2293_vm9 = vmand %vm2268_vm8, %vm2243_vm7  ;;  %vm1939_vm7 = vc.u32 %v4851_v2, 2454267026 }
 0x221   : > { %v4839_v54 = vsel %vm2293_vm9, %v2318_v49, %v1930_v33  ;;  %vm7175_vm9 = vcmask 1040384  }
 0x222   : > { %v1916_v38 = vsub.s32 %v1867_v25, %v1915_v45  ;;  %7260 = vst [vmem:[#allocation6_spill] sm:$0xff] %v4839_v54 }
 0x223   : > { %1263 = vmatmul.mubr.bf16.gmra.mxu0 %v1003_v44  ;;  %4104 = vmatmul.mubr.bf16.gmra.mxu1 %v1003_v44 }
 0x224   : > { %1272 = vmatprep.mubr.bf16.mxu0 %v7148_v34  ;;  %4107 = vmatprep.mubr.msk.bf16.mxu1 %vm4346_vm1, %v4345_v28  ;;  %vm2242_vm13 = vcmp.ne.s32.totalorder %v1916_v38, 0  ;;  %vm2267_vm14 = vcmp.lt.s32.totalorder %v1916_v38, 0  ;;  %v2317_v59 = vadd.s32 14, %v1916_v38 }
 0x225   : > { %vm2292_vm4 = vmand %vm2267_vm14, %vm2242_vm13  ;;  %vm7193_vm14 = vcmp.ne.s32.totalorder %v4839_v54, 13 }
 0x226   : > { %v4862_v11 = vsel %vm2292_vm4, %v2317_v59, %v1916_v38 }
 0x227   : > { %7263 = vst [vmem:[#allocation9_spill] sm:$0xff] %v4862_v11  ;;  %vm2367_vm8 = vcmp.ne.s32.totalorder %v4862_v11, 0 }
 0x22b   : > { %1273 = vmatmul.mubr.bf16.gmra.mxu0 %v1004_v53  ;;  %4108 = vmatmul.mubr.bf16.gmra.mxu1 %v1004_v53 }
 0x22c   : > { %1282 = vmatprep.mubr.bf16.mxu0 %v7148_v34  ;;  %4111 = vmatprep.mubr.msk.bf16.mxu1 %vm4346_vm1, %v4345_v28 }
 0x233   : > { %1283 = vmatmul.mubr.bf16.gmra.mxu0 %v1005_v56  ;;  %4112 = vmatmul.mubr.bf16.gmra.mxu1 %v1005_v56 }
 0x234   : > { %1292 = vmatprep.mubr.bf16.mxu0 %v7148_v34  ;;  %4115 = vmatprep.mubr.msk.bf16.mxu1 %vm4346_vm1, %v4345_v28 }
 0x23b   : > { %1293 = vmatmul.mubr.bf16.gmra.mxu0 %v1006_v61  ;;  %4116 = vmatmul.mubr.bf16.gmra.mxu1 %v1006_v61 }
 0x23c   : > { %1302 = vmatprep.mubr.bf16.mxu0 %v7148_v34  ;;  %4119 = vmatprep.mubr.msk.bf16.mxu1 %vm4346_vm1, %v4345_v28 }
 0x243   : > { %1303 = vmatmul.mubr.bf16.gmra.mxu0 %v1007_v8  ;;  %4120 = vmatmul.mubr.bf16.gmra.mxu1 %v1007_v8  ;;  %v2672_v8 = vrot.slane %v2667_v43, 2 }
 0x244   : > { %1312 = vmatprep.mubr.bf16.mxu0 %v7148_v34  ;;  %4123 = vmatprep.mubr.msk.bf16.mxu1 %vm4346_vm1, %v4345_v28 }
 0x24b   : > { %1313 = vmatmul.mubr.bf16.gmra.mxu0 %v1008_v16  ;;  %4124 = vmatmul.mubr.bf16.gmra.mxu1 %v1008_v16 }
 0x24c   : > { %1322 = vmatprep.mubr.bf16.mxu0 %v7148_v34  ;;  %4127 = vmatprep.mubr.msk.bf16.mxu1 %vm4346_vm1, %v4345_v28  ;;  %v4826_v26 = vmul.u32.u64.low 2454267026, %v4685_v20  ;;  %v4827_v28 = vmul.u32.u64.high 2454267026, %v4685_v20, %v4826_v26  ;;  %vm2368_vm1 = vcmp.ne.s32.totalorder %v4839_v54, 0 }
 0x24e   : > { %vm1897_vm5 = vc.u32 %v4826_v26, 2454267026 }
 0x24f   : > { %v1898_v14 = vsel %vm1897_vm5, 1, %v7148_v34  ;;  %vm2671_vm5 = vcmask 1045504  }
 0x250   : > { %v1899_v32 = vadd.s32 %v4827_v28, %v1898_v14 }
 0x252   : > { %v1900_v39 = vshrl.u32 %v1899_v32, 3  ;;  %v1940_v32 = vsel %vm1939_vm7, 1, %v7148_v34 }
 0x253   : > { %1323 = vmatmul.mubr.bf16.gmra.mxu0 %v1009_v5  ;;  %4128 = vmatmul.mubr.bf16.gmra.mxu1 %v1009_v5 }
 0x254   : > { %v1901_v44 = vmul.u32 14, %v1900_v39 }
 0x256   : > { %v1902_v47 = vsub.s32 %v4685_v20, %v1901_v44 }
 0x258   : > { %vm2241_vm10 = vcmp.ne.s32.totalorder %v1902_v47, 0  ;;  %vm2266_vm11 = vcmp.lt.s32.totalorder %v1902_v47, 0  ;;  %v2316_v51 = vadd.s32 14, %v1902_v47 }
 0x259   : > { %vm2291_vm15 = vmand %vm2266_vm11, %vm2241_vm10  ;;  %vm2854_vm10 = vcmask 1041408   ;;  %vm7196_vm11 = vcmp.ne.s32.totalorder %v4862_v11, 13 }
 0x25a   : > { %v4848_v1 = vsel %vm2291_vm15, %v2316_v51, %v1902_v47 }
 0x25b   : > { %7261 = vst [vmem:[#allocation7_spill] sm:$0xff] %v4848_v1  ;;  %vm7145_vm6 = vcmp.ne.s32.totalorder %v4848_v1, 13 }
 0x2b3   : > { %v1204_v50 = vpop.f32.mrf.mxu0  ;;  %v1365_v60 = vpop.f32.mrf.mxu1 }
 0x2b4   : > { %v1560_v46 = vrot.slane %v1204_v50, 1  ;;  %v4907_v49 = vmul.u32.u64.low 2454267026, %v4880_v23  ;;  %v4908_v50 = vmul.u32.u64.high 2454267026, %v4880_v23, %v4907_v49 }
 0x2b5   : > { %v1206_v53 = vpop.f32.mrf.mxu0  ;;  %v4081_v3 = vpop.f32.mrf.mxu1 }
 0x2b6   : > { %1785 = vst [vmem:[#allocation3 + $0x18] sm:$0x80] %v1560_v46  ;;  %v1561_v40 = vrot.slane %v1206_v53, 1  ;;  %vm1953_vm13 = vc.u32 %v4907_v49, 2454267026 }
 0x2b7   : > { %v1208_v42 = vpop.f32.mrf.mxu0  ;;  %v4864_v12 = vpop.f32.mrf.mxu1 }
 0x2b8   : > { %1786 = vst [vmem:[#allocation3 + $0x20] sm:$0x80] %v1561_v40  ;;  %v1563_v58 = vrot.slane %v1208_v42, 1  ;;  %v1941_v42 = vadd.s32 %v4852_v57, %v1940_v32 }
 0x2b9   : > { %v1210_v56 = vpop.f32.mrf.mxu0  ;;  %v4082_v5 = vpop.f32.mrf.mxu1 }
 0x2ba   : > { %v4846_v62 = vsel %vm1559_vm12, %v1560_v46, %v1563_v58  ;;  %v1565_v6 = vrot.slane %v1210_v56, 1 }
 0x2bb   : > { %v1214_v61 = vpop.f32.mrf.mxu0  ;;  %v4857_v17 = vsel %vm2368_vm1, %v4846_v62, 0.0  ;;  %v2521_v28 = vrot.slane %v4846_v62, 1  ;;  %v4893_v36 = vpop.f32.mrf.mxu1  ;;  %v2675_v47 = vrot.slane %v4846_v62, 2 }
 0x2bc   : > { %v4860_v4 = vsel %vm1559_vm12, %v1561_v40, %v1565_v6  ;;  %v1569_v7 = vrot.slane %v1214_v61, 1 }
 0x2bd   : > { %7262 = vst [vmem:[#allocation8_spill] sm:$0xff] %v4860_v4  ;;  %v1216_v63 = vpop.f32.mrf.mxu0  ;;  %v2417_v0 = vld [vmem:[#allocation3 + $0x18] sm:$0xff]  ;;  %v3186_v22 = vsel %vm7145_vm6, %v4860_v4, 0.0  ;;  %v4085_v38 = vpop.f32.mrf.mxu1  ;;  %v7142_v40 = vrot.slane %v4860_v4, 7 }
 0x2be   : > { %v4867_v15 = vsel %vm1559_vm12, %v1563_v58, %v1569_v7  ;;  %v1571_v16 = vrot.slane %v1216_v63, 1  ;;  %v2673_v21 = vrot.slane %v2417_v0, 2  ;;  %v2519_v18 = vrot.slane %v2417_v0, 1  ;;  %v2846_v27 = vld [vmem:[#allocation3 + $0x18] sm:$0xc0] }
 0x2bf   : > { %v1218_v30 = vpop.f32.mrf.mxu0  ;;  %v2523_v31 = vrot.slane %v4867_v15, 1  ;;  %v4901_v44 = vsel %vm2367_vm8, %v2417_v0, 0.0  ;;  %v2855_v56 = vrot.slane %v2846_v27, 6  ;;  %v2677_v43 = vrot.slane %v4867_v15, 2  ;;  %v4932_v2 = vpop.f32.mrf.mxu1 }
 0x2c0   : > { %v4871_v13 = vsel %vm1559_vm12, %v1565_v6, %v1571_v16  ;;  %v1575_v19 = vrot.slane %v1218_v30, 1  ;;  %v2674_v24 = vsel %vm2671_vm5, %v2672_v8, %v2673_v21  ;;  %v2520_v25 = vsel %vm1559_vm12, %v2518_v9, %v2519_v18 }
 0x2c1   : > { %1793 = vst [vmem:[#allocation3 + $0x50] sm:$0xff] %v4871_v13  ;;  %2721 = vrot.lane.b32.xlu1 %v2674_v24, %s4347_s8  ;;  %2567 = vrot.lane.b32.xlu0 %v2520_v25, %s4349_s10  ;;  %v1220_v26 = vpop.f32.mrf.mxu0  ;;  %v2522_v14 = vsel %vm1559_vm12, %v2519_v18, %v2521_v28  ;;  %v3087_v33 = vrot.slane %v4871_v13, 7  ;;  %v2676_v58 = vsel %vm2671_vm5, %v2673_v21, %v2675_v47  ;;  %v1942_v8 = vshrl.u32 %v1941_v42, 3 }
 0x2c2   : > { %v4884_v35 = vsel %vm1559_vm12, %v1569_v7, %v1575_v19  ;;  %v1577_v41 = vrot.slane %v1220_v26, 1  ;;  %v2524_v60 = vsel %vm1559_vm12, %v2521_v28, %v2523_v31  ;;  %v2856_v7 = vrot.slane %v4846_v62, 6 }
 0x2c3   : > { %v1224_v29 = vpop.f32.mrf.mxu0  ;;  %v4928_v6 = vsel %vm7175_vm9, %v7142_v40, %v3087_v33  ;;  %v2858_v63 = vrot.slane %v4867_v15, 6  ;;  %v4941_v0 = vadd.s32 40, %v4685_v20  ;;  %v2678_v30 = vsel %vm2671_vm5, %v2675_v47, %v2677_v43 }
 0x2c4   : > { %v4896_v37 = vsel %vm1559_vm12, %v1571_v16, %v1577_v41  ;;  %v1581_v39 = vrot.slane %v1224_v29, 1  ;;  %v4086_v16 = vpop.f32.mrf.mxu1  ;;  %v2857_v18 = vsel %vm2854_vm10, %v2855_v56, %v2856_v7  ;;  %v1943_v25 = vmul.u32 14, %v1942_v8 }
 0x2c5   : > { %v1226_v45 = vpop.f32.mrf.mxu0  ;;  %2569 = vrot.lane.b32.xlu0 %v2522_v14, %s4349_s10  ;;  %3236 = vrot.lane.b32.xlu1 %v3186_v22, %s4349_s10  ;;  %v1954_v26 = vsel %vm1953_vm13, 1, %v7148_v34  ;;  %v2859_v28 = vsel %vm2854_vm10, %v2856_v7, %v2858_v63  ;;  %v4959_v14 = vmul.u32.u64.low 2454267026, %v4941_v0  ;;  %v4960_v22 = vmul.u32.u64.high 2454267026, %v4941_v0, %v4959_v14 }
 0x2c6   : > { %v4911_v46 = vsel %vm1559_vm12, %v1575_v19, %v1581_v39  ;;  %v1583_v53 = vrot.slane %v1226_v45, 1  ;;  %v2679_v27 = vrot.slane %v4884_v35, 2  ;;  %v2525_v45 = vrot.slane %v4884_v35, 1  ;;  %v4970_v38 = vpop.f32.mrf.mxu1 }
 0x2c7   : > { %v1228_v51 = vpop.f32.mrf.mxu0  ;;  %v1955_v49 = vadd.s32 %v4908_v50, %v1954_v26  ;;  %v4979_v56 = vsub.s32 %v4842_v55, %v1943_v25  ;;  %vm1967_vm15 = vc.u32 %v4959_v14, 2454267026 }
 0x2c8   : > { %v4918_v48 = vsel %vm1559_vm12, %v1577_v41, %v1583_v53  ;;  %v1587_v59 = vrot.slane %v1228_v51, 1  ;;  %v3187_v41 = vsel %vm7196_vm11, %v4871_v13, 0.0  ;;  %v2860_v51 = vrot.slane %v4884_v35, 6  ;;  %v3336_v55 = vld [vmem:[#allocation3 + $0x50] sm:$0xf0] }
 0x2c9   : > { %v1230_v61 = vpop.f32.mrf.mxu0  ;;  %2723 = vrot.lane.b32.xlu0 %v2676_v58, %s4347_s8  ;;  %2571 = vrot.lane.b32.xlu1 %v2524_v60, %s4349_s10  ;;  %v2680_v50 = vsel %vm2671_vm5, %v2677_v43, %v2679_v27  ;;  %v2526_v60 = vsel %vm1559_vm12, %v2523_v31, %v2525_v45  ;;  %v1956_v8 = vshrl.u32 %v1955_v49, 3  ;;  %v1968_v31 = vsel %vm1967_vm15, 1, %v7148_v34  ;;  %v3516_v26 = vld [vmem:[#allocation3 + $0x50] sm:$0xe0] }
 0x2ca   : > { %v4935_v57 = vsel %vm1559_vm12, %v1581_v39, %v1587_v59  ;;  %v1589_v3 = vrot.slane %v1230_v61, 1  ;;  %vm2244_vm4 = vcmp.ne.s32.totalorder %v4979_v56, 0  ;;  %v3342_v25 = vrot.slane %v3336_v55, 4 }
 0x2cb   : > { %v1234_v9 = vpop.f32.mrf.mxu0  ;;  %v1957_v14 = vmul.u32 14, %v1956_v8  ;;  %vm2269_vm7 = vcmp.lt.s32.totalorder %v4979_v56, 0 }
 0x2cc   : > { %v4944_v21 = vsel %vm1559_vm12, %v1583_v53, %v1589_v3  ;;  %v1593_v5 = vrot.slane %v1234_v9, 1  ;;  %v4993_v9 = vadd.s32 48, %v4685_v20  ;;  %vm5048_vm13 = vmand %vm2269_vm7, %vm2244_vm4 }
 0x2cd   : > { %2906 = vrot.lane.b32.xlu0 %v2857_v18, %s4348_s9  ;;  %2725 = vrot.lane.b32.xlu1 %v2678_v30, %s4347_s8  ;;  %v1236_v62 = vpop.f32.mrf.mxu0  ;;  %v3188_v18 = vsel %vm7193_vm14, %v4896_v37, 0.0  ;;  %v3343_v30 = vrot.slane %v4896_v37, 4  ;;  %v3093_v52 = vrot.slane %v4944_v21, 7 }
 0x2ce   : > { %v4951_v19 = vsel %vm1559_vm12, %v1587_v59, %v1593_v5  ;;  %v1595_v24 = vrot.slane %v1236_v62, 1  ;;  %v4089_v59 = vpop.f32.mrf.mxu1 }
 0x2cf   : > { %v1238_v29 = vpop.f32.mrf.mxu0 }
 0x2d0   : > { %v4963_v32 = vsel %vm1559_vm12, %v1589_v3, %v1595_v24  ;;  %v1599_v39 = vrot.slane %v1238_v29, 1 }
 0x2d1   : > { %2908 = vrot.lane.b32.xlu1 %v2859_v28, %s4348_s9  ;;  %3238 = vrot.lane.b32.xlu0 %v3187_v41, %s4349_s10  ;;  %v1240_v47 = vpop.f32.mrf.mxu0 }
 0x2d2   : > { %v4973_v53 = vsel %vm1559_vm12, %v1593_v5, %v1599_v39  ;;  %v1601_v42 = vrot.slane %v1240_v47, 1  ;;  %v2681_v5 = vrot.slane %v4911_v46, 2 }
 0x2d3   : > { %1807 = vst [vmem:[#allocation3 + $0xc0] sm:$0xff] %v4973_v53  ;;  %v1244_v58 = vpop.f32.mrf.mxu0  ;;  %v5017_v47 = vmul.u32.u64.low 2454267026, %v4993_v9  ;;  %v5018_v49 = vmul.u32.u64.high 2454267026, %v4993_v9, %v5017_v47 }
 0x2d4   : > { %v4988_v61 = vsel %vm1559_vm12, %v1595_v24, %v1601_v42  ;;  %v1605_v3 = vrot.slane %v1244_v58, 1  ;;  %v2861_v24 = vsel %vm2854_vm10, %v2858_v63, %v2860_v51  ;;  %v1567_v58 = vrot.slane %v4864_v12, 1 }
 0x2d5   : > { %2727 = vrot.lane.b32.xlu0 %v2680_v50, %s4347_s8  ;;  %2573 = vrot.lane.b32.xlu1 %v2526_v60, %s4349_s10  ;;  %v1246_v7 = vpop.f32.mrf.mxu0  ;;  %v2682_v59 = vsel %vm2671_vm5, %v2679_v27, %v2681_v5  ;;  %v3521_v50 = vrot.slane %v3516_v26, 5  ;;  %v3522_v60 = vrot.slane %v4896_v37, 5  ;;  %v2319_v27 = vadd.s32 14, %v4979_v56  ;;  %v5055_v26 = vpop.f32.mrf.mxu1 }
 0x2d6   : > { %v4996_v43 = vsel %vm1559_vm12, %v1599_v39, %v1605_v3  ;;  %v1607_v16 = vrot.slane %v1246_v7, 1  ;;  %v1969_v39 = vadd.s32 %v4960_v22, %v1968_v31  ;;  %v7144_v22 = vrot.slane %v4911_v46, 6 }
 0x2d7   : > { %1810 = vst [vmem:[#allocation3 + $0xd8] sm:$0xff] %v4996_v43  ;;  %v1248_v62 = vpop.f32.mrf.mxu0  ;;  %v5042_v31 = vsub.s32 %v4880_v23, %v1957_v14  ;;  %vm1981_vm15 = vc.u32 %v5017_v47, 2454267026 }
 0x2d8   : > { %v5010_v28 = vsel %vm1559_vm12, %v1601_v42, %v1607_v16  ;;  %v1611_v41 = vrot.slane %v1248_v62, 1  ;;  %v2863_v23 = vsel %vm2854_vm10, %v2860_v51, %v7144_v22  ;;  %v5076_v51 = vsel %vm5048_vm13, %v2319_v27, %v4979_v56 }
 0x2d9   : > { %2910 = vrot.lane.b32.xlu0 %v2861_v24, %s4348_s9  ;;  %3240 = vrot.lane.b32.xlu1 %v3188_v18, %s4349_s10  ;;  %1811 = vst [vmem:[#allocation3 + $0xe0] sm:$0xff] %v5010_v28  ;;  %v1250_v29 = vpop.f32.mrf.mxu0  ;;  %v1970_v18 = vshrl.u32 %v1969_v39, 3  ;;  %v7143_v39 = vrot.slane %v4918_v48, 4  ;;  %7266 = vst [vmem:[#allocation10_spill] sm:$0xff] %v5076_v51  ;;  %vm2245_vm4 = vcmp.ne.s32.totalorder %v5042_v31, 0  ;;  %vm7146_vm7 = vcmp.ne.s32.totalorder %v5076_v51, 13 }
 0x2da   : > { %v5022_v63 = vsel %vm1559_vm12, %v1605_v3, %v1611_v41  ;;  %v1613_v42 = vrot.slane %v1250_v29, 1  ;;  %v3344_v3 = vsel %vm834_vm2, %v3342_v25, %v3343_v30  ;;  %v2527_v29 = vrot.slane %v4911_v46, 1 }
 0x2db   : > { %1813 = vst [vmem:[#allocation3 + $0xf0] sm:$0xff] %v5022_v63  ;;  %v1254_v55 = vpop.f32.mrf.mxu0  ;;  %vm2270_vm13 = vcmp.lt.s32.totalorder %v5042_v31, 0  ;;  %v1573_v27 = vrot.slane %v4893_v36, 1  ;;  %v3346_v47 = vsel %vm834_vm2, %v3343_v30, %v7143_v39 }
 0x2dc   : > { %v5035_v7 = vsel %vm1559_vm12, %v1607_v16, %v1613_v42  ;;  %v1617_v8 = vrot.slane %v1254_v55, 1  ;;  %v2528_v56 = vsel %vm1559_vm12, %v2525_v45, %v2527_v29 }
 0x2dd   : > { %3391 = vrot.lane.b32.xlu0 %v3344_v3, %s4347_s8  ;;  %2729 = vrot.lane.b32.xlu1 %v2682_v59, %s4347_s8  ;;  %1814 = vst [vmem:[#allocation3 + $0xf8] sm:$0xff] %v5035_v7  ;;  %v1256_v62 = vpop.f32.mrf.mxu0  ;;  %v4090_v3 = vpop.f32.mrf.mxu1  ;;  %v1574_v40 = vsel %vm1559_vm12, %v1567_v58, %v1573_v27 }
 0x2de   : > { %v5053_v24 = vsel %vm1559_vm12, %v1611_v41, %v1617_v8  ;;  %v1619_v25 = vrot.slane %v1256_v62, 1  ;;  %v3523_v41 = vsel %vm3520_vm3, %v3521_v50, %v3522_v60  ;;  %v1971_v62 = vmul.u32 14, %v1970_v18  ;;  %1794 = vst.msk [vmem:[#allocation3 + $0x58] sm:$0xff] %vm556_vm0, %v1574_v40 }
 0x2df   : > { %1816 = vst [vmem:[#allocation3 + $0x108] sm:$0xff] %v5053_v24  ;;  %v1258_v14 = vpop.f32.mrf.mxu0  ;;  %v3524_v18 = vrot.slane %v4918_v48, 5  ;;  %v2320_v3 = vadd.s32 14, %v5042_v31 }
 0x2e0   : > { %v5069_v59 = vsel %vm1559_vm12, %v1613_v42, %v1619_v25  ;;  %v1623_v55 = vrot.slane %v1258_v14, 1  ;;  %v5110_v36 = vsub.s32 %v4941_v0, %v1971_v62 }
 0x2e1   : > { %3572 = vrot.lane.b32.xlu0 %v3523_v41, %s4348_s9  ;;  %2912 = vrot.lane.b32.xlu1 %v2863_v23, %s4348_s9  ;;  %1817 = vst [vmem:[#allocation3 + $0x110] sm:$0xff] %v5069_v59  ;;  %v1260_v50 = vpop.f32.mrf.mxu0  ;;  %v1982_v41 = vsel %vm1981_vm15, 1, %v7148_v34  ;;  %v5086_v23 = vadd.s32 56, %v4685_v20  ;;  %vm5118_vm15 = vmand %vm2270_vm13, %vm2245_vm4  ;;  %vm7147_vm4 = vcmp.ne.s32.totalorder %v5076_v51, 0 }
 0x2e2   : > { %v5081_v42 = vsel %vm1559_vm12, %v1617_v8, %v1623_v55  ;;  %v1625_v14 = vrot.slane %v1260_v50, 1  ;;  %v1983_v50 = vadd.s32 %v5018_v49, %v1982_v41  ;;  %v3189_v49 = vsel %vm7146_vm7, %v4918_v48, 0.0 }
 0x2e3   : > { %1819 = vst [vmem:[#allocation3 + $0x120] sm:$0xff] %v5081_v42  ;;  %v1264_v8 = vpop.f32.mrf.mxu0  ;;  %v5126_v0 = vmul.u32.u64.low 2454267026, %v5086_v23  ;;  %v5127_v62 = vmul.u32.u64.high 2454267026, %v5086_v23, %v5126_v0  ;;  %v2683_v41 = vrot.slane %v4935_v57, 2  ;;  %v5153_v12 = vsel %vm5118_vm15, %v2320_v3, %v5042_v31 }
 0x2e4   : > { %v5104_v16 = vsel %vm1559_vm12, %v1619_v25, %v1625_v14  ;;  %v1629_v45 = vrot.slane %v1264_v8, 1  ;;  %7269 = vst [vmem:[#allocation11_spill] sm:$0xff] %v5153_v12  ;;  %vm2246_vm13 = vcmp.ne.s32.totalorder %v5110_v36, 0  ;;  %v1984_v58 = vshrl.u32 %v1983_v50, 3 }
 0x2e5   : > { %2575 = vrot.lane.b32.xlu0 %v2528_v56, %s4349_s10  ;;  %3393 = vrot.lane.b32.xlu1 %v3346_v47, %s4347_s8  ;;  %1820 = vst [vmem:[#allocation3 + $0x128] sm:$0xff] %v5104_v16  ;;  %v1266_v30 = vpop.f32.mrf.mxu0  ;;  %vm7158_vm6 = vcmp.ne.s32.totalorder %v5153_v12, 13  ;;  %vm1995_vm7 = vc.u32 %v5126_v0, 2454267026  ;;  %v2684_v31 = vsel %vm2671_vm5, %v2681_v5, %v2683_v41  ;;  %v2864_v3 = vrot.slane %v4935_v57, 6 }
 0x2e6   : > { %v5123_v56 = vsel %vm1559_vm12, %v1623_v55, %v1629_v45  ;;  %v1631_v8 = vrot.slane %v1266_v30, 1  ;;  %v3525_v55 = vsel %vm3520_vm3, %v3522_v60, %v3524_v18  ;;  %v7150_v30 = vrot.slane %v4935_v57, 1 }
 0x2e7   : > { %1822 = vst [vmem:[#allocation3 + $0x138] sm:$0xff] %v5123_v56  ;;  %v1268_v47 = vpop.f32.mrf.mxu0  ;;  %vm2271_vm15 = vcmp.lt.s32.totalorder %v5110_v36, 0  ;;  %v3190_v0 = vsel %vm7158_vm6, %v4944_v21, 0.0 }
 0x2e8   : > { %v5145_v39 = vsel %vm1559_vm12, %v1625_v14, %v1631_v8  ;;  %v1635_v22 = vrot.slane %v1268_v47, 1  ;;  %v1579_v14 = vrot.slane %v4932_v2, 1  ;;  %v5158_v47 = vpop.f32.mrf.mxu1 }
 0x2e9   : > { %3574 = vrot.lane.b32.xlu1 %v3525_v55, %s4348_s9  ;;  %3242 = vrot.lane.b32.xlu0 %v3189_v49, %s4349_s10  ;;  %1823 = vst [vmem:[#allocation3 + $0x140] sm:$0xff] %v5145_v39  ;;  %v1270_v60 = vpop.f32.mrf.mxu0  ;;  %v2530_v55 = vsel %vm1559_vm12, %v2527_v29, %v7150_v30 }
 0x2ea   : > { %v5162_v40 = vsel %vm1559_vm12, %v1629_v45, %v1635_v22  ;;  %v1637_v49 = vrot.slane %v1270_v60, 1  ;;  %v1580_v50 = vsel %vm1559_vm12, %v1573_v27, %v1579_v14  ;;  %v5175_v45 = vsel %vm7147_vm4, %v4867_v15, 0.0  ;;  %v4093_v25 = vpop.f32.mrf.mxu1 }
 0x2eb   : > { %1825 = vst [vmem:[#allocation3 + $0x150] sm:$0xff] %v5162_v40  ;;  %v1274_v2 = vpop.f32.mrf.mxu0  ;;  %1797 = vst.msk [vmem:[#allocation3 + $0x70] sm:$0xff] %vm556_vm0, %v1580_v50  ;;  %v3089_v27 = vrot.slane %v4896_v37, 7  ;;  %v1985_v15 = vmul.u32 14, %v1984_v58  ;;  %v1996_v25 = vsel %vm1995_vm7, 1, %v7148_v34  ;;  %vm7157_vm4 = vcmp.ne.s32.totalorder %v5153_v12, 0 }
 0x2ec   : > { %v5183_v5 = vsel %vm1559_vm12, %v1631_v8, %v1637_v49  ;;  %v1641_v60 = vrot.slane %v1274_v2, 1  ;;  %v7151_v8 = vrot.slane %v4970_v38, 1  ;;  %v7154_v58 = vrot.slane %v4944_v21, 4  ;;  %vm2296_vm7 = vmand %vm2271_vm15, %vm2246_vm13 }
 0x2ed   : > { %2731 = vrot.lane.b32.xlu0 %v2684_v31, %s4347_s8  ;;  %2577 = vrot.lane.b32.xlu1 %v2530_v55, %s4349_s10  ;;  %1826 = vst [vmem:[#allocation3 + $0x158] sm:$0xff] %v5183_v5  ;;  %v1276_v29 = vpop.f32.mrf.mxu0  ;;  %v5200_v37 = vsel %vm7175_vm9, %v3087_v33, %v3089_v27  ;;  %v2321_v31 = vadd.s32 14, %v5110_v36  ;;  %v7270_v33 = vrot.slane %v4911_v46, 6 }
 0x2ee   : > { %v5195_v2 = vsel %vm1559_vm12, %v1635_v22, %v1641_v60  ;;  %v1643_v50 = vrot.slane %v1276_v29, 1  ;;  %v1586_v13 = vsel %vm1559_vm12, %v1579_v14, %v7151_v8  ;;  %v7152_v29 = vrot.slane %v4951_v19, 2 }
 0x2ef   : > { %1828 = vst [vmem:[#allocation3 + $0x168] sm:$0xff] %v5195_v2  ;;  %v1278_v22 = vpop.f32.mrf.mxu0  ;;  %v2865_v55 = vsel %vm2854_vm10, %v7270_v33, %v2864_v3  ;;  %1800 = vst.msk [vmem:[#allocation3 + $0x88] sm:$0xff] %vm556_vm0, %v1586_v13  ;;  %v5229_v14 = vsub.s32 %v4993_v9, %v1985_v15  ;;  %v1997_v33 = vadd.s32 %v5127_v62, %v1996_v25  ;;  %v7155_v62 = vrot.slane %v4944_v21, 5 }
 0x2f0   : > { %v5223_v34 = vsel %vm1559_vm12, %v1637_v49, %v1643_v50  ;;  %v1647_v30 = vrot.slane %v1278_v22, 1  ;;  %v5236_v49 = vsel %vm7157_vm4, %v4884_v35, 0.0  ;;  %v5248_v15 = vsel %vm2296_vm7, %v2321_v31, %v5110_v36 }
 0x2f1   : > { %2914 = vrot.lane.b32.xlu0 %v2865_v55, %s4348_s9  ;;  %3244 = vrot.lane.b32.xlu1 %v3190_v0, %s4349_s10  ;;  %1829 = vst [vmem:[#allocation3 + $0x170] sm:$0xff] %v5223_v34  ;;  %v1280_v8 = vpop.f32.mrf.mxu0  ;;  %v7271_v0 = vrot.slane %v4918_v48, 4  ;;  %7272 = vst [vmem:[#allocation12_spill] sm:$0xff] %v5248_v15  ;;  %v7153_v35 = vrot.slane %v4918_v48, 7  ;;  %vm2247_vm13 = vcmp.ne.s32.totalorder %v5229_v14, 0  ;;  %v1998_v36 = vshrl.u32 %v1997_v33, 3 }
 0x2f2   : > { %v5239_v22 = vsel %vm1559_vm12, %v1641_v60, %v1647_v30  ;;  %v1649_v13 = vrot.slane %v1280_v8, 1  ;;  %v2686_v60 = vsel %vm2671_vm5, %v2683_v41, %v7152_v29  ;;  %v7159_v8 = vrot.slane %v4951_v19, 6 }
 0x2f3   : > { %v3348_v9 = vsel %vm834_vm2, %v7271_v0, %v7154_v58  ;;  %1831 = vst [vmem:[#allocation3 + $0x180] sm:$0xff] %v5239_v22  ;;  %v1284_v25 = vpop.f32.mrf.mxu0  ;;  %v5268_v41 = vsel %vm7175_vm9, %v3089_v27, %v7153_v35  ;;  %vm2272_vm15 = vcmp.lt.s32.totalorder %v5229_v14, 0  ;;  %vm7164_vm7 = vcmp.ne.s32.totalorder %v5248_v15, 0 }
 0x2f4   : > { %v5259_v55 = vsel %vm1559_vm12, %v1643_v50, %v1649_v13  ;;  %v1653_v0 = vrot.slane %v1284_v25, 1  ;;  %v3527_v33 = vsel %vm3520_vm3, %v3524_v18, %v7155_v62  ;;  %v5285_v29 = vadd.s32 64, %v4685_v20  ;;  %vm2297_vm6 = vmand %vm2272_vm15, %vm2247_vm13 }
 0x2f5   : > { %3395 = vrot.lane.b32.xlu0 %v3348_v9, %s4347_s8  ;;  %2733 = vrot.lane.b32.xlu1 %v2686_v60, %s4347_s8  ;;  %1832 = vst [vmem:[#allocation3 + $0x188] sm:$0xff] %v5259_v55  ;;  %v1286_v31 = vpop.f32.mrf.mxu0  ;;  %v5275_v9 = vpop.f32.mrf.mxu1  ;;  %v1591_v18 = vrot.slane %v5055_v26, 1  ;;  %v1999_v27 = vmul.u32 14, %v1998_v36  ;;  %v5300_v4 = vsel %vm7164_vm7, %v4911_v46, 0.0  ;;  %v7274_v26 = vrot.slane %v4970_v38, 1 }
 0x2f6   : > { %v5272_v50 = vsel %vm1559_vm12, %v1647_v30, %v1653_v0  ;;  %v1655_v25 = vrot.slane %v1286_v31, 1  ;;  %v2867_v31 = vsel %vm2854_vm10, %v2864_v3, %v7159_v8  ;;  %v2322_v3 = vadd.s32 14, %v5229_v14 }
 0x2f7   : > { %7273 = vst [vmem:[#allocation13_spill] sm:$0xff] %v5272_v50  ;;  %1834 = vst [vmem:[#allocation3 + $0x198] sm:$0xff] %v5272_v50  ;;  %v1288_v30 = vpop.f32.mrf.mxu0  ;;  %v4094_v62 = vpop.f32.mrf.mxu1  ;;  %vm7165_vm4 = vcmp.ne.s32.totalorder %v5248_v15, 13  ;;  %v7275_v38 = vrot.slane %v4951_v19, 1  ;;  %v7276_v36 = vrot.slane %v4935_v57, 1  ;;  %v1603_v15 = vrot.slane %v5275_v9, 1 }
 0x2f8   : > { %v1656_v35 = vsel %vm1559_vm12, %v1649_v13, %v1655_v25  ;;  %v1659_v58 = vrot.slane %v1288_v30, 1  ;;  %v1592_v62 = vsel %vm1559_vm12, %v7274_v26, %v1591_v18  ;;  %v7278_v26 = vrot.slane %v4944_v21, 4 }
 0x2f9   : > { %3576 = vrot.lane.b32.xlu0 %v3527_v33, %s4348_s9  ;;  %2916 = vrot.lane.b32.xlu1 %v2867_v31, %s4348_s9  ;;  %1835 = vst [vmem:[#allocation3 + $0x1a0] sm:$0xff] %v1656_v35  ;;  %v1290_v60 = vpop.f32.mrf.mxu0  ;;  %v5314_v46 = vmul.u32.u64.low 2454267026, %v5285_v29  ;;  %v5315_v35 = vmul.u32.u64.high 2454267026, %v5285_v29, %v5314_v46  ;;  %1803 = vst.msk [vmem:[#allocation3 + $0xa0] sm:$0xff] %vm556_vm0, %v1592_v62  ;;  %v7277_v31 = vrot.slane %v4963_v32, 4  ;;  %v7319_v11 = vrot.slane %v5259_v55, 4 }
 0x2fa   : > { %v1660_v13 = vsel %vm1559_vm12, %v1653_v0, %v1659_v58  ;;  %v1661_v30 = vrot.slane %v1290_v60, 1  ;;  %v2532_v60 = vsel %vm1559_vm12, %v7276_v36, %v7275_v38  ;;  %v5334_v38 = vsel %vm2297_vm6, %v2322_v3, %v5229_v14 }
 0x2fb   : > { %1837 = vst [vmem:[#allocation3 + $0x1b0] sm:$0xff] %v1660_v13  ;;  %v1294_v0 = vpop.f32.mrf.mxu0  ;;  %v3350_v8 = vsel %vm834_vm2, %v7278_v26, %v7277_v31  ;;  %v2000_v13 = vsub.s32 %v5086_v23, %v1999_v27  ;;  %7279 = vst [vmem:[#allocation14_spill] sm:$0xff] %v5334_v38  ;;  %v7280_v31 = vrot.slane %v4963_v32, 5  ;;  %v3191_v23 = vsel %vm7165_vm4, %v4963_v32, 0.0 }
 0x2fc   : > { %v1662_v33 = vsel %vm1559_vm12, %v1655_v25, %v1661_v30  ;;  %v1665_v1 = vrot.slane %v1294_v0, 1  ;;  %v7281_v25 = vrot.slane %v4944_v21, 5  ;;  %vm2009_vm13 = vc.u32 %v5314_v46, 2454267026 }
 0x2fd   : > { %2579 = vrot.lane.b32.xlu0 %v2532_v60, %s4349_s10  ;;  %3397 = vrot.lane.b32.xlu1 %v3350_v8, %s4347_s8  ;;  %1838 = vst [vmem:[#allocation3 + $0x1b8] sm:$0xff] %v1662_v33  ;;  %v1296_v62 = vpop.f32.mrf.mxu0  ;;  %v2687_v8 = vrot.slane %v4973_v53, 2  ;;  %v7166_v14 = vrot.slane %v4973_v53, 1  ;;  %v7282_v33 = vrot.slane %v4918_v48, 7  ;;  %vm2248_vm6 = vcmp.ne.s32.totalorder %v2000_v13, 0 }
 0x2fe   : > { %v1666_v36 = vsel %vm1559_vm12, %v1659_v58, %v1665_v1  ;;  %v1667_v10 = vrot.slane %v1296_v62, 1  ;;  %v3529_v0 = vsel %vm3520_vm3, %v7281_v25, %v7280_v31  ;;  %vm2273_vm15 = vcmp.lt.s32.totalorder %v2000_v13, 0  ;;  %v5356_v62 = vpop.f32.mrf.mxu1 }
 0x2ff   : > { %1840 = vst [vmem:[#allocation3 + $0x1c8] sm:$0xff] %v1666_v36  ;;  %v1298_v27 = vpop.f32.mrf.mxu0  ;;  %v5351_v21 = vsel %vm7175_vm9, %v7282_v33, %v3093_v52  ;;  %v1597_v26 = vrot.slane %v5158_v47, 1  ;;  %v2323_v31 = vadd.s32 14, %v2000_v13  ;;  %v7283_v25 = vmov 0  }
 0x300   : > { %v1668_v58 = vsel %vm1559_vm12, %v1661_v30, %v1667_v10  ;;  %v1671_v3 = vrot.slane %v1298_v27, 1  ;;  %v5359_v30 = vadd.s32 72, %v4685_v20  ;;  %vm7177_vm7 = vcmp.ne.s32.totalorder %v5334_v38, 0 }
 0x301   : > { %3578 = vrot.lane.b32.xlu1 %v3529_v0, %s4348_s9  ;;  %3246 = vrot.lane.b32.xlu0 %v3191_v23, %s4349_s10  ;;  %1841 = vst [vmem:[#allocation3 + $0x1d0] sm:$0xff] %v1668_v58  ;;  %v1300_v60 = vpop.f32.mrf.mxu0  ;;  %v2010_v0 = vsel %vm2009_vm13, 1, %v7283_v25  ;;  %v1598_v23 = vsel %vm1559_vm12, %v1591_v18, %v1597_v26  ;;  %v4097_v58 = vpop.f32.mrf.mxu1  ;;  %v7284_v47 = vrot.slane %v4951_v19, 2  ;;  %v2868_v46 = vrot.slane %v4973_v53, 6  ;;  %vm2298_vm13 = vmand %vm2273_vm15, %vm2248_vm6 }
 0x302   : > { %v1672_v48 = vsel %vm1559_vm12, %v1665_v1, %v1671_v3  ;;  %v1673_v36 = vrot.slane %v1300_v60, 1  ;;  %v7285_v1 = vrot.slane %v4951_v19, 1  ;;  %1806 = vst.msk [vmem:[#allocation3 + $0xb8] sm:$0xff] %vm556_vm0, %v1598_v23  ;;  %vm7209_vm4 = vcmp.ne.s32.totalorder %v5334_v38, 13 }
 0x303   : > { %1843 = vst [vmem:[#allocation3 + $0x1e0] sm:$0xff] %v1672_v48  ;;  %v1304_v27 = vpop.f32.mrf.mxu0  ;;  %v2688_v33 = vsel %vm2671_vm5, %v7284_v47, %v2687_v8  ;;  %v2011_v58 = vadd.s32 %v5315_v35, %v2010_v0  ;;  %v5392_v23 = vsel %vm2298_vm13, %v2323_v31, %v2000_v13  ;;  %v3351_v35 = vrot.slane %v4988_v61, 4 }
 0x304   : > { %v2534_v60 = vsel %vm1559_vm12, %v7285_v1, %v7166_v14  ;;  %v1674_v18 = vsel %vm1559_vm12, %v1667_v10, %v1673_v36  ;;  %v5384_v47 = vmul.u32.u64.low 2454267026, %v5359_v30  ;;  %v5385_v1 = vmul.u32.u64.high 2454267026, %v5359_v30, %v5384_v47 }
 0x305   : > { %2735 = vrot.lane.b32.xlu0 %v2688_v33, %s4347_s8  ;;  %2581 = vrot.lane.b32.xlu1 %v2534_v60, %s4349_s10  ;;  %1844 = vst [vmem:[#allocation3 + $0x1e8] sm:$0xff] %v1674_v18  ;;  %v1306_v48 = vpop.f32.mrf.mxu0  ;;  %v5390_v10 = vsel %vm7177_vm7, %v4935_v57, 0.0  ;;  %v7287_v33 = vrot.slane %v4951_v19, 6  ;;  %v3192_v18 = vsel %vm7209_vm4, %v4988_v61, 0.0  ;;  %v3095_v57 = vrot.slane %v4963_v32, 7 }
 0x306   : > { %7286 = vst [vmem:[#allocation15_spill] sm:$0xff] %v5390_v10  ;;  %v1677_v13 = vrot.slane %v1304_v27, 1  ;;  %v2012_v14 = vshrl.u32 %v2011_v58, 3  ;;  %vm2023_vm6 = vc.u32 %v5384_v47, 2454267026  ;;  %vm7176_vm15 = vcmp.ne.s32.totalorder %v5392_v23, 0 }
 0x307   : > { %v2869_v60 = vsel %vm2854_vm10, %v7287_v33, %v2868_v46  ;;  %v5405_v31 = vpop.f32.mrf.mxu0  ;;  %v3530_v33 = vrot.slane %v4988_v61, 5  ;;  %v5410_v38 = vsel %vm7175_vm9, %v3093_v52, %v3095_v57  ;;  %v1679_v10 = vrot.slane %v1306_v48, 1 }
 0x308   : > { %v1678_v0 = vsel %vm1559_vm12, %v1671_v3, %v1677_v13  ;;  %v7289_v27 = vrot.slane %v4996_v43, 2  ;;  %v7173_v58 = vrot.slane %v4996_v43, 6  ;;  %v5427_v3 = vsel %vm7176_vm15, %v4951_v19, 0.0 }
 0x309   : > { %2918 = vrot.lane.b32.xlu0 %v2869_v60, %s4348_s9  ;;  %3248 = vrot.lane.b32.xlu1 %v3192_v18, %s4349_s10  ;;  %v7288_v60 = vrot.slane %v4963_v32, 4  ;;  %1846 = vst [vmem:[#allocation3 + $0x1f8] sm:$0xff] %v1678_v0  ;;  %v1680_v52 = vsel %vm1559_vm12, %v1673_v36, %v1679_v10  ;;  %v5429_v48 = vpop.f32.mrf.mxu0  ;;  %v1604_v9 = vsel %vm1559_vm12, %v1597_v26, %v1603_v15  ;;  %v7174_v0 = vrot.slane %v5405_v31, 1 }
 0x30a   : > { %v2690_v50 = vsel %vm2671_vm5, %v2687_v8, %v7289_v27  ;;  %v2024_v8 = vsel %vm2023_vm6, 1, %v7283_v25  ;;  %1847 = vst [vmem:[#allocation3 + $0x200] sm:$0xff] %v1680_v52  ;;  %v2535_v19 = vrot.slane %v4996_v43, 1  ;;  %v5442_v27 = vadd.s32 80, %v4685_v20  ;;  %1809 = vst.msk [vmem:[#allocation3 + $0xd0] sm:$0xff] %vm556_vm0, %v1604_v9 }
 0x30b   : > { %v3352_v18 = vsel %vm834_vm2, %v7288_v60, %v3351_v35  ;;  %v2013_v60 = vmul.u32 14, %v2012_v14  ;;  %v2871_v14 = vsel %vm2854_vm10, %v2868_v46, %v7173_v58  ;;  %v3353_v26 = vrot.slane %v5010_v28, 4 }
 0x30c   : > { %v1684_v47 = vsel %vm1559_vm12, %v1677_v13, %v7174_v0  ;;  %v7178_v9 = vrot.slane %v4988_v61, 7  ;;  %v5462_v13 = vmul.u32.u64.low 2454267026, %v5442_v27  ;;  %v5463_v0 = vmul.u32.u64.high 2454267026, %v5442_v27, %v5462_v13 }
 0x30d   : > { %3399 = vrot.lane.b32.xlu0 %v3352_v18, %s4347_s8  ;;  %2737 = vrot.lane.b32.xlu1 %v2690_v50, %s4347_s8  ;;  %v5435_v18 = vpop.f32.mrf.mxu1  ;;  %v7290_v50 = vrot.slane %v4963_v32, 5  ;;  %v1685_v32 = vrot.slane %v5429_v48, 1  ;;  %1849 = vst [vmem:[#allocation3 + $0x210] sm:$0xff] %v1684_v47  ;;  %v2014_v46 = vsub.s32 %v5285_v29, %v2013_v60  ;;  %v3532_v60 = vrot.slane %v5010_v28, 5 }
 0x30e   : > { %vm7211_vm13 = vcmp.ne.s32.totalorder %v5392_v23, 13  ;;  %vm2037_vm15 = vc.u32 %v5462_v13, 2454267026  ;;  %v2691_v47 = vrot.slane %v5022_v63, 2  ;;  %v5493_v13 = vadd.s32 88, %v4685_v20 }
 0x30f   : > { %v3531_v36 = vsel %vm3520_vm3, %v7290_v50, %v3530_v33  ;;  %v4098_v52 = vpop.f32.mrf.mxu1  ;;  %v2025_v50 = vadd.s32 %v5385_v1, %v2024_v8  ;;  %v1686_v58 = vsel %vm1559_vm12, %v1679_v10, %v1685_v32  ;;  %v1609_v1 = vrot.slane %v5356_v62, 1  ;;  %v1314_v62 = vpop.f32.mrf.mxu0 }
 0x310   : > { %1850 = vst [vmem:[#allocation3 + $0x218] sm:$0xff] %v1686_v58  ;;  %v7291_v8 = vrot.slane %v4973_v53, 1  ;;  %v3354_v10 = vsel %vm834_vm2, %v3351_v35, %v3353_v26  ;;  %vm2249_vm6 = vcmp.ne.s32.totalorder %v2014_v46, 0  ;;  %v2324_v53 = vadd.s32 14, %v2014_v46 }
 0x311   : > { %3580 = vrot.lane.b32.xlu0 %v3531_v36, %s4348_s9  ;;  %2920 = vrot.lane.b32.xlu1 %v2871_v14, %s4348_s9  ;;  %v5468_v36 = vsel %vm7175_vm9, %v3095_v57, %v7178_v9  ;;  %v2026_v57 = vshrl.u32 %v2025_v50, 3  ;;  %v1610_v58 = vsel %vm1559_vm12, %v1603_v15, %v1609_v1  ;;  %vm2274_vm9 = vcmp.lt.s32.totalorder %v2014_v46, 0  ;;  %v5511_v9 = vpop.f32.mrf.mxu1 }
 0x312   : > { %v2536_v29 = vsel %vm1559_vm12, %v7291_v8, %v2535_v19  ;;  %1812 = vst.msk [vmem:[#allocation3 + $0xe8] sm:$0xff] %vm556_vm0, %v1610_v58  ;;  %v3533_v35 = vsel %vm3520_vm3, %v3530_v33, %v3532_v60  ;;  %v3193_v14 = vsel %vm7211_vm13, %v5010_v28, 0.0  ;;  %v7179_v52 = vrot.slane %v5022_v63, 1  ;;  %vm2299_vm7 = vmand %vm2274_vm9, %vm2249_vm6  ;;  %v1316_v8 = vpop.f32.mrf.mxu0 }
 0x313   : > { %v2027_v15 = vmul.u32 14, %v2026_v57  ;;  %v2038_v50 = vsel %vm2037_vm15, 1, %v7283_v25  ;;  %v1615_v33 = vrot.slane %v5435_v18, 1  ;;  %v7180_v57 = vrot.slane %v5022_v63, 6 }
 0x314   : > { %v2538_v58 = vsel %vm1559_vm12, %v2535_v19, %v7179_v52  ;;  %v3355_v52 = vrot.slane %v5035_v7, 4 }
 0x315   : > { %2583 = vrot.lane.b32.xlu0 %v2536_v29, %s4349_s10  ;;  %3401 = vrot.lane.b32.xlu1 %v3354_v10, %s4347_s8  ;;  %v7292_v29 = vrot.slane %v4996_v43, 2  ;;  %v1616_v19 = vsel %vm1559_vm12, %v1609_v1, %v1615_v33 }
 0x316   : > { %1815 = vst.msk [vmem:[#allocation3 + $0x100] sm:$0xff] %vm556_vm0, %v1616_v19 }
 0x317   : > { %v2692_v10 = vsel %vm2671_vm5, %v7292_v29, %v2691_v47  ;;  %v2039_v29 = vadd.s32 %v5463_v0, %v2038_v50  ;;  %v7293_v0 = vrot.slane %v4996_v43, 6  ;;  %v7185_v50 = vrot.slane %v5035_v7, 5 }
 0x319   : > { %3582 = vrot.lane.b32.xlu1 %v3533_v35, %s4348_s9  ;;  %3250 = vrot.lane.b32.xlu0 %v3193_v14, %s4349_s10  ;;  %v5505_v35 = vsel %vm2299_vm7, %v2324_v53, %v2014_v46  ;;  %v2028_v14 = vsub.s32 %v5359_v30, %v2027_v15  ;;  %v5519_v46 = vmul.u32.u64.low 2454267026, %v5493_v13  ;;  %v5520_v53 = vmul.u32.u64.high 2454267026, %v5493_v13, %v5519_v46  ;;  %v4101_v30 = vpop.f32.mrf.mxu1 }
 0x31a   : > { %vm7181_vm9 = vcmp.ne.s32.totalorder %v5505_v35, 13  ;;  %v2873_v15 = vsel %vm2854_vm10, %v7293_v0, %v7180_v57  ;;  %v1691_v30 = vrot.slane %v1316_v8, 1  ;;  %v2040_v57 = vshrl.u32 %v2039_v29, 3 }
 0x31b   : > { %v3194_v1 = vsel %vm7181_vm9, %v5035_v7, 0.0  ;;  %vm2250_vm7 = vcmp.ne.s32.totalorder %v2028_v14, 0  ;;  %vm2275_vm15 = vcmp.lt.s32.totalorder %v2028_v14, 0  ;;  %v2325_v0 = vadd.s32 14, %v2028_v14 }
 0x31c   : > { %vm2051_vm6 = vc.u32 %v5519_v46, 2454267026  ;;  %v3535_v8 = vsel %vm3520_vm3, %v3532_v60, %v7185_v50  ;;  %v2693_v29 = vrot.slane %v5053_v24, 2  ;;  %vm2300_vm9 = vmand %vm2275_vm15, %vm2250_vm7  ;;  %v5567_v60 = vpop.permute.xlu1 %3439  ;;  %v1621_v46 = vrot.slane %v5511_v9, 1 }
 0x31d   : > { %2739 = vrot.lane.b32.xlu0 %v2692_v10, %s4347_s8  ;;  %2585 = vrot.lane.b32.xlu1 %v2538_v58, %s4349_s10  ;;  %v1689_v10 = vrot.slane %v1314_v62, 1  ;;  %v5523_v58 = vpop.f32.mrf.mxu0  ;;  %v7294_v62 = vrot.slane %v5405_v31, 1  ;;  %7295 = vst [vmem:[#allocation16_spill] sm:$0xff] %v5567_v60 }
 0x31e   : > { %v7182_v31 = vrot.slane %v5523_v58, 1 }
 0x31f   : > { %v1690_v19 = vsel %vm1559_vm12, %v7294_v62, %v1689_v10  ;;  %v5539_v43 = vpop.f32.mrf.mxu0  ;;  %v7184_v62 = vrot.slane %v5053_v24, 1 }
 0x320   : > { %1852 = vst [vmem:[#allocation3 + $0x228] sm:$0xff] %v1690_v19  ;;  %v7183_v28 = vrot.slane %v5539_v43, 1  ;;  %v5562_v48 = vsel %vm1559_vm12, %v1689_v10, %v7182_v31  ;;  %v5569_v19 = vsel %vm2300_vm9, %v2325_v0, %v2028_v14  ;;  %v2694_v10 = vsel %vm2671_vm5, %v2691_v47, %v2693_v29  ;;  %v5608_v18 = vpop.permute.xlu1 %3620 }
 0x321   : > { %2922 = vrot.lane.b32.xlu0 %v2873_v15, %s4348_s9  ;;  %3252 = vrot.lane.b32.xlu1 %v3194_v1, %s4349_s10  ;;  %v3356_v15 = vsel %vm834_vm2, %v3353_v26, %v3355_v52  ;;  %v1692_v1 = vsel %vm1559_vm12, %v1685_v32, %v1691_v30  ;;  %v5564_v26 = vpop.f32.mrf.mxu1  ;;  %v2041_v32 = vmul.u32 14, %v2040_v57  ;;  %1855 = vst [vmem:[#allocation3 + $0x240] sm:$0xff] %v5562_v48  ;;  %v7296_v57 = vrot.slane %v5022_v63, 1 }
 0x322   : > { %1853 = vst [vmem:[#allocation3 + $0x230] sm:$0xff] %v1692_v1  ;;  %v2052_v1 = vsel %vm2051_vm6, 1, %v7283_v25  ;;  %v2874_v14 = vrot.slane %v5053_v24, 6  ;;  %vm7187_vm9 = vcmp.ne.s32.totalorder %v5569_v19, 13  ;;  %v5592_v0 = vadd.s32 96, %v4685_v20  ;;  %7298 = vst [vmem:[#allocation17_spill] sm:$0xff] %v5608_v18 }
 0x323   : > { %v2540_v31 = vsel %vm1559_vm12, %v7296_v57, %v7184_v62  ;;  %v2053_v47 = vadd.s32 %v5520_v53, %v2052_v1  ;;  %v3536_v53 = vrot.slane %v5069_v59, 5 }
 0x325   : > { %3403 = vrot.lane.b32.xlu0 %v3356_v15, %s4347_s8  ;;  %3584 = vrot.lane.b32.xlu1 %v3535_v8, %s4348_s9  ;;  %v1698_v15 = vsel %vm1559_vm12, %v1691_v30, %v7183_v28  ;;  %v4102_v8 = vpop.f32.mrf.mxu1  ;;  %v2042_v30 = vsub.s32 %v5442_v27, %v2041_v32  ;;  %v7186_v27 = vrot.slane %v5081_v42, 2 }
 0x326   : > { %1856 = vst [vmem:[#allocation3 + $0x248] sm:$0xff] %v1698_v15  ;;  %v1622_v8 = vsel %vm1559_vm12, %v1615_v33, %v1621_v46  ;;  %v7297_v15 = vrot.slane %v5022_v63, 6  ;;  %v2054_v63 = vshrl.u32 %v2053_v47, 3  ;;  %v1324_v33 = vpop.f32.mrf.mxu0  ;;  %v7188_v47 = vrot.slane %v5564_v26, 1 }
 0x327   : > { %1818 = vst.msk [vmem:[#allocation3 + $0x118] sm:$0xff] %vm556_vm0, %v1622_v8  ;;  %vm2251_vm7 = vcmp.ne.s32.totalorder %v2042_v30, 0  ;;  %vm2276_vm15 = vcmp.lt.s32.totalorder %v2042_v30, 0  ;;  %v5612_v32 = vmul.u32.u64.low 2454267026, %v5592_v0  ;;  %v5613_v1 = vmul.u32.u64.high 2454267026, %v5592_v0, %v5612_v32 }
 0x328   : > { %v2875_v9 = vsel %vm2854_vm10, %v7297_v15, %v2874_v14  ;;  %v2696_v8 = vsel %vm2671_vm5, %v2693_v29, %v7186_v27  ;;  %v7189_v15 = vrot.slane %v5081_v42, 6  ;;  %v1628_v28 = vsel %vm1559_vm12, %v1621_v46, %v7188_v47  ;;  %vm2301_vm6 = vmand %vm2276_vm15, %vm2251_vm7 }
 0x329   : > { %2741 = vrot.lane.b32.xlu1 %v2694_v10, %s4347_s8  ;;  %2587 = vrot.lane.b32.xlu0 %v2540_v31, %s4349_s10  ;;  %v3195_v31 = vsel %vm7187_vm9, %v5069_v59, 0.0  ;;  %v3357_v10 = vrot.slane %v5069_v59, 4  ;;  %v2326_v59 = vadd.s32 14, %v2042_v30  ;;  %v2541_v27 = vrot.slane %v5081_v42, 1  ;;  %1821 = vst.msk [vmem:[#allocation3 + $0x130] sm:$0xff] %vm556_vm0, %v1628_v28 }
 0x32a   : > { %vm2065_vm9 = vc.u32 %v5612_v32, 2454267026  ;;  %v1701_v28 = vrot.slane %v1324_v33, 1  ;;  %v7191_v33 = vrot.slane %v5104_v16, 5 }
 0x32b   : > { %v3358_v57 = vsel %vm834_vm2, %v3355_v52, %v3357_v10  ;;  %v5628_v52 = vpop.f32.mrf.mxu1  ;;  %v5650_v32 = vsel %vm2301_vm6, %v2326_v59, %v2042_v30  ;;  %v7303_v30 = vrot.slane %v5104_v16, 4 }
 0x32c   : > { %vm7190_vm7 = vcmp.ne.s32.totalorder %v5650_v32, 13  ;;  %1861 = vst [vmem:[#allocation3 + $0x270] sm:$0x7] %v1701_v28 }
 0x32d   : > { %2924 = vrot.lane.b32.xlu1 %v2875_v9, %s4348_s9  ;;  %3254 = vrot.lane.b32.xlu0 %v3195_v31, %s4349_s10  ;;  %v1326_v9 = vpop.f32.mrf.mxu0  ;;  %v2055_v31 = vmul.u32 14, %v2054_v63  ;;  %v7299_v63 = vrot.slane %v5035_v7, 5  ;;  %v4105_v47 = vpop.f32.mrf.mxu1 }
 0x32f   : > { %v1328_v62 = vpop.f32.mrf.mxu0  ;;  %v2056_v7 = vsub.s32 %v5493_v13, %v2055_v31  ;;  %v3360_v13 = vsel %vm834_vm2, %v3357_v10, %v7303_v30  ;;  %v3196_v10 = vsel %vm7190_vm7, %v5104_v16, 0.0  ;;  %v5691_v30 = vpop.f32.mrf.mxu1 }
 0x330   : > { %v2877_v62 = vsel %vm2854_vm10, %v2874_v14, %v7189_v15  ;;  %v7301_v15 = vrot.slane %v5053_v24, 1 }
 0x331   : > { %3405 = vrot.lane.b32.xlu1 %v3358_v57, %s4347_s8  ;;  %2743 = vrot.lane.b32.xlu0 %v2696_v8, %s4347_s8  ;;  %v3537_v57 = vsel %vm3520_vm3, %v7299_v63, %v3536_v53  ;;  %v5646_v8 = vadd.s32 104, %v4685_v20  ;;  %v1329_v18 = vpop.f32.mrf.mxu0  ;;  %v2066_v63 = vsel %vm2065_vm9, 1, %v7283_v25  ;;  %vm2252_vm9 = vcmp.ne.s32.totalorder %v2056_v7, 0 }
 0x332   : > { %v2542_v46 = vsel %vm1559_vm12, %v7301_v15, %v2541_v27  ;;  %v7302_v18 = vrot.slane %v5523_v58, 1  ;;  %v2067_v24 = vadd.s32 %v5613_v1, %v2066_v63  ;;  %v1703_v58 = vrot.slane %v1326_v9, 1 }
 0x333   : > { %v5630_v50 = vpop.permute.xlu1 %2721  ;;  %v5632_v29 = vpop.permute.xlu0 %2567  ;;  %v5670_v59 = vmul.u32.u64.low 2454267026, %v5646_v8  ;;  %v5671_v31 = vmul.u32.u64.high 2454267026, %v5646_v8, %v5670_v59  ;;  %vm2277_vm15 = vcmp.lt.s32.totalorder %v2056_v7, 0  ;;  %v2697_v1 = vrot.slane %v5123_v56, 2 }
 0x334   : > { %v5663_v47 = vsel %vm1559_vm12, %v7302_v18, %v1701_v28  ;;  %v7304_v28 = vrot.slane %v5539_v43, 1  ;;  %1862 = vst [vmem:[#allocation3 + $0x278] sm:$0x7] %v1703_v58  ;;  %v7192_v9 = vrot.slane %v5123_v56, 1  ;;  %vm2302_vm7 = vmand %vm2277_vm15, %vm2252_vm9  ;;  %v2068_v43 = vshrl.u32 %v2067_v24, 3 }
 0x335   : > { %3586 = vrot.lane.b32.xlu1 %v3537_v57, %s4348_s9  ;;  %2926 = vrot.lane.b32.xlu0 %v2877_v62, %s4348_s9  ;;  %v2327_v62 = vadd.s32 14, %v2056_v7  ;;  %vm2079_vm6 = vc.u32 %v5670_v59, 2454267026  ;;  %v1633_v63 = vrot.slane %v5628_v52, 1  ;;  %v7305_v59 = vrot.slane %v5564_v26, 1 }
 0x336   : > { %v1704_v18 = vsel %vm1559_vm12, %v7304_v28, %v1703_v58  ;;  %v2878_v58 = vrot.slane %v5123_v56, 6  ;;  %v2080_v28 = vsel %vm2079_vm6, 1, %v7283_v25  ;;  %v7306_v24 = vrot.slane %v5081_v42, 2 }
 0x337   : > { %v2570_v60 = vpop.permute.xlu0 %2569  ;;  %v5654_v14 = vpop.permute.xlu1 %3236  ;;  %1859 = vst [vmem:[#allocation3 + $0x260] sm:$0xff] %v1704_v18  ;;  %v1634_v18 = vsel %vm1559_vm12, %v7305_v59, %v1633_v63  ;;  %v2081_v59 = vadd.s32 %v5671_v31, %v2080_v28  ;;  %v3361_v31 = vrot.slane %v5145_v39, 4  ;;  %v7195_v28 = vrot.slane %v5162_v40, 2 }
 0x338   : > { %7300 = vst [vmem:[#allocation18_spill] sm:$0xff] %v5654_v14  ;;  %v2698_v52 = vsel %vm2671_vm5, %v7306_v24, %v2697_v1  ;;  %1824 = vst.msk [vmem:[#allocation3 + $0x148] sm:$0xff] %vm556_vm0, %v1634_v18  ;;  %v4106_v14 = vpop.f32.mrf.mxu1  ;;  %v2643_v26 = vadd.f32 %v2570_v60, %v4901_v44  ;;  %v5717_v24 = vadd.s32 112, %v4685_v20 }
 0x339   : > { %2589 = vrot.lane.b32.xlu1 %v2542_v46, %s4349_s10  ;;  %3407 = vrot.lane.b32.xlu0 %v3360_v13, %s4347_s8  ;;  %v3539_v46 = vsel %vm3520_vm3, %v3536_v53, %v7191_v33  ;;  %v5708_v33 = vsel %vm2302_vm7, %v2327_v62, %v2056_v7  ;;  %v7307_v14 = vrot.slane %v5081_v42, 6 }
 0x33a   : > { %vm7197_vm9 = vcmp.ne.s32.totalorder %v5708_v33, 13 }
 0x33b   : > { %v2724_v15 = vpop.permute.xlu0 %2723  ;;  %v2572_v57 = vpop.permute.xlu1 %2571  ;;  %v2879_v44 = vsel %vm2854_vm10, %v7307_v14, %v2878_v58 }
 0x33d   : > { %3588 = vrot.lane.b32.xlu0 %v3539_v46, %s4348_s9  ;;  %3256 = vrot.lane.b32.xlu1 %v3196_v10, %s4349_s10  ;;  %v2797_v10 = vsel %vm7196_vm11, %v2724_v15, 0.0  ;;  %v2544_v46 = vsel %vm1559_vm12, %v2541_v27, %v7192_v9  ;;  %v2069_v15 = vmul.u32 14, %v2068_v43  ;;  %v3197_v43 = vsel %vm7197_vm9, %v5145_v39, 0.0 }
 0x33e   : > { %v2822_v27 = vadd.f32 %v2797_v10, %v2643_v26  ;;  %v2082_v10 = vshrl.u32 %v2081_v59, 3  ;;  %v3540_v9 = vrot.slane %v5145_v39, 5  ;;  %v2644_v59 = vadd.f32 %v2572_v57, %v4857_v17 }
 0x33f   : > { %v5693_v13 = vpop.permute.xlu0 %2906  ;;  %v2726_v53 = vpop.permute.xlu1 %2725  ;;  %v2070_v42 = vsub.s32 %v5592_v0, %v2069_v15  ;;  %v2700_v15 = vsel %vm2671_vm5, %v2697_v1, %v7195_v28  ;;  %v7309_v57 = vrot.slane %v5104_v16, 5  ;;  %vm7312_vm11 = vcmp.ne.s32.totalorder %v5076_v51, 0 }
 0x340   : > { %v5760_v1 = vpop.f32.mrf.mxu1 }
 0x341   : > { %2745 = vrot.lane.b32.xlu1 %v2698_v52, %s4347_s8  ;;  %2591 = vrot.lane.b32.xlu0 %v2544_v46, %s4349_s10  ;;  %v5735_v52 = vmul.u32.u64.low 2454267026, %v5717_v24  ;;  %v5736_v46 = vmul.u32.u64.high 2454267026, %v5717_v24, %v5735_v52  ;;  %vm2253_vm7 = vcmp.ne.s32.totalorder %v2070_v42, 0  ;;  %vm2278_vm15 = vcmp.lt.s32.totalorder %v2070_v42, 0 }
 0x342   : > { %v1645_v28 = vrot.slane %v5760_v1, 1  ;;  %v2547_v1 = vrot.slane %v5195_v2, 1 }
 0x343   : > { %v2909_v7 = vpop.permute.xlu1 %2908  ;;  %v5719_v62 = vpop.permute.xlu0 %3238  ;;  %vm2093_vm6 = vc.u32 %v5735_v52, 2454267026  ;;  %v7310_v52 = vrot.slane %v5123_v56, 1 }
 0x344   : > { %v2982_v60 = vsel %vm2367_vm8, %v2909_v7, 0.0 }
 0x345   : > { %v3007_v18 = vadd.f32 %v2982_v60, %v2822_v27  ;;  %2928 = vrot.lane.b32.xlu1 %v2879_v44, %s4348_s9  ;;  %3258 = vrot.lane.b32.xlu0 %v3197_v43, %s4349_s10  ;;  %v1639_v27 = vrot.slane %v5691_v30, 1  ;;  %v2798_v44 = vsel %vm7193_vm14, %v2726_v53, 0.0  ;;  %v7308_v60 = vrot.slane %v5104_v16, 4  ;;  %vm2303_vm14 = vmand %vm2278_vm15, %vm2253_vm7 }
 0x346   : > { %v2083_v30 = vmul.u32 14, %v2082_v10  ;;  %v5757_v53 = vadd.s32 120, %v4685_v20  ;;  %v2823_v43 = vadd.f32 %v2798_v44, %v2644_v59  ;;  %v4109_v44 = vpop.f32.mrf.mxu1  ;;  %v2094_v16 = vsel %vm2093_vm6, 1, %v7283_v25 }
 0x347   : > { %v5739_v26 = vadd.f32 %v4928_v6, %v3007_v18  ;;  %v2728_v7 = vpop.permute.xlu0 %2727  ;;  %v2574_v14 = vpop.permute.xlu1 %2573  ;;  %v3362_v0 = vsel %vm834_vm2, %v7308_v60, %v3361_v31  ;;  %v7194_v6 = vrot.slane %v5162_v40, 6  ;;  %v1640_v39 = vsel %vm1559_vm12, %v1633_v63, %v1639_v27 }
 0x348   : > { %1827 = vst.msk [vmem:[#allocation3 + $0x160] sm:$0xff] %vm556_vm0, %v1640_v39  ;;  %v3541_v60 = vsel %vm3520_vm3, %v7309_v57, %v3540_v9  ;;  %v2545_v63 = vrot.slane %v5162_v40, 1  ;;  %v2328_v39 = vadd.s32 14, %v2070_v42  ;;  %v2084_v57 = vsub.s32 %v5646_v8, %v2083_v30 }
 0x349   : > { %3409 = vrot.lane.b32.xlu1 %v3362_v0, %s4347_s8  ;;  %2747 = vrot.lane.b32.xlu0 %v2700_v15, %s4347_s8  ;;  %v2881_v0 = vsel %vm2854_vm10, %v2878_v58, %v7194_v6  ;;  %v3363_v15 = vrot.slane %v5183_v5, 4  ;;  %v5783_v58 = vmul.u32.u64.low 2454267026, %v5757_v53  ;;  %v5784_v6 = vmul.u32.u64.high 2454267026, %v5757_v53, %v5783_v58 }
 0x34a   : > { %v2546_v44 = vsel %vm1559_vm12, %v7310_v52, %v2545_v63  ;;  %vm7311_vm7 = vcmp.ne.s32.totalorder %v5076_v51, 13  ;;  %vm2254_vm6 = vcmp.ne.s32.totalorder %v2084_v57, 0  ;;  %v5829_v52 = vpop.f32.mrf.mxu1 }
 0x34b   : > { %v2911_v18 = vpop.permute.xlu0 %2910  ;;  %v5762_v17 = vpop.permute.xlu1 %3240  ;;  %v2799_v8 = vsel %vm7311_vm7, %v2728_v7, 0.0  ;;  %vm2279_vm7 = vcmp.lt.s32.totalorder %v2084_v57, 0  ;;  %v1646_v7 = vsel %vm1559_vm12, %v1639_v27, %v1645_v28 }
 0x34c   : > { %v2983_v10 = vsel %vm2368_vm1, %v2911_v18, 0.0  ;;  %v7198_v18 = vrot.slane %v5183_v5, 5  ;;  %1830 = vst.msk [vmem:[#allocation3 + $0x178] sm:$0xff] %vm556_vm0, %v1646_v7  ;;  %vm2304_vm9 = vmand %vm2279_vm7, %vm2254_vm6  ;;  %v2548_v7 = vsel %vm1559_vm12, %v2545_v63, %v2547_v1  ;;  %v7314_v63 = vrot.slane %v5162_v40, 6 }
 0x34d   : > { %v3008_v59 = vadd.f32 %v2983_v10, %v2823_v43  ;;  %3590 = vrot.lane.b32.xlu1 %v3541_v60, %s4348_s9  ;;  %2930 = vrot.lane.b32.xlu0 %v2881_v0, %s4348_s9  ;;  %v2645_v43 = vadd.f32 %v2574_v14, %v5175_v45  ;;  %v3364_v45 = vsel %vm834_vm2, %v3361_v31, %v3363_v15  ;;  %vm7316_vm7 = vcmp.ne.s32.totalorder %v5153_v12, 13 }
 0x34e   : > { %v5803_v14 = vsel %vm2303_vm14, %v2328_v39, %v2070_v42  ;;  %v3543_v56 = vsel %vm3520_vm3, %v3540_v9, %v7198_v18  ;;  %vm2107_vm14 = vc.u32 %v5783_v58, 2454267026  ;;  %v2882_v58 = vrot.slane %v5195_v2, 6 }
 0x34f   : > { %v5788_v60 = vadd.f32 %v5200_v37, %v3008_v59  ;;  %v5790_v10 = vpop.permute.xlu0 %3391  ;;  %v5792_v0 = vpop.permute.xlu1 %2729  ;;  %v2095_v37 = vadd.s32 %v5736_v46, %v2094_v16  ;;  %vm7240_vm15 = vcmp.ne.s32.totalorder %v5803_v14, 13  ;;  %v2824_v30 = vadd.f32 %v2799_v8, %v2645_v43 }
 0x350   : > { %v2701_v46 = vrot.slane %v5195_v2, 2  ;;  %v3198_v9 = vsel %vm7240_vm15, %v5183_v5, 0.0  ;;  %v2329_v59 = vadd.s32 14, %v2084_v57  ;;  %v2108_v43 = vsel %vm2107_vm14, 1, %v7283_v25 }
 0x351   : > { %2593 = vrot.lane.b32.xlu1 %v2546_v44, %s4349_s10  ;;  %3411 = vrot.lane.b32.xlu0 %v3364_v45, %s4347_s8  ;;  %v2096_v27 = vshrl.u32 %v2095_v37, 3  ;;  %v3312_v44 = vadd.f32 %v5719_v62, %v5739_v26  ;;  %v7313_v37 = vrot.slane %v5162_v40, 2  ;;  %v5847_v62 = vadd.s32 128, %v4685_v20  ;;  %v4110_v26 = vpop.f32.mrf.mxu1 }
 0x353   : > { %v5813_v31 = vpop.permute.xlu0 %3572  ;;  %v2913_v42 = vpop.permute.xlu1 %2912 }
 0x354   : > { %v2984_v39 = vsel %vm7312_vm11, %v2913_v42, 0.0 }
 0x355   : > { %v3009_v16 = vadd.f32 %v2984_v39, %v2824_v30  ;;  %3592 = vrot.lane.b32.xlu0 %v3543_v56, %s4348_s9  ;;  %3260 = vrot.lane.b32.xlu1 %v3198_v9, %s4349_s10  ;;  %v2702_v56 = vsel %vm2671_vm5, %v7313_v37, %v2701_v46  ;;  %v5844_v39 = vsel %vm2304_vm9, %v2329_v59, %v2084_v57  ;;  %v2097_v9 = vmul.u32 14, %v2096_v27 }
 0x356   : > { %vm7230_vm11 = vcmp.ne.s32.totalorder %v5844_v39, 13  ;;  %v2883_v57 = vsel %vm2854_vm10, %v7314_v63, %v2882_v58  ;;  %v3365_v59 = vrot.slane %v5223_v34, 4  ;;  %v1651_v37 = vrot.slane %v5829_v52, 1 }
 0x357   : > { %v2576_v8 = vpop.permute.xlu0 %2575  ;;  %v3394_v45 = vpop.permute.xlu1 %3393  ;;  %v5840_v30 = vadd.f32 %v5268_v41, %v3009_v16  ;;  %v2109_v41 = vadd.s32 %v5784_v6, %v2108_v43  ;;  %v7199_v6 = vrot.slane %v5663_v47, 6  ;;  %v3199_v40 = vsel %vm7230_vm11, %v5223_v34, 0.0 }
 0x358   : > { %v3467_v42 = vsel %vm2367_vm8, %v3394_v45, 0.0  ;;  %v7200_v45 = vrot.slane %v5562_v48, 6  ;;  %v2098_v43 = vsub.s32 %v5717_v24, %v2097_v9  ;;  %v1652_v26 = vsel %vm1559_vm12, %v1645_v28, %v1651_v37 }
 0x359   : > { %v5849_v18 = vadd.f32 %v3467_v42, %v3312_v44  ;;  %2749 = vrot.lane.b32.xlu1 %v2702_v56, %s4347_s8  ;;  %2595 = vrot.lane.b32.xlu0 %v2548_v7, %s4349_s10  ;;  %v7201_v44 = vrot.slane %v5239_v22, 2  ;;  %v5874_v56 = vmul.u32.u64.low 2454267026, %v5847_v62  ;;  %v5875_v7 = vmul.u32.u64.high 2454267026, %v5847_v62, %v5874_v56  ;;  %1833 = vst.msk [vmem:[#allocation3 + $0x190] sm:$0xff] %vm556_vm0, %v1652_v26 }
 0x35a   : > { %v2110_v42 = vshrl.u32 %v2109_v41, 3  ;;  %v5885_v52 = vsel %vm2854_vm10, %v7200_v45, %v7199_v6  ;;  %v2646_v24 = vadd.f32 %v2576_v8, %v5236_v49  ;;  %v3544_v41 = vrot.slane %v5223_v34, 5  ;;  %v5904_v34 = vpop.f32.mrf.mxu1 }
 0x35b   : > { %v5861_v27 = vpop.permute.xlu1 %3574  ;;  %v5863_v16 = vpop.permute.xlu0 %3242  ;;  %v2704_v28 = vsel %vm2671_vm5, %v2701_v46, %v7201_v44  ;;  %vm2255_vm8 = vcmp.ne.s32.totalorder %v2098_v43, 0  ;;  %vm2280_vm9 = vcmp.lt.s32.totalorder %v2098_v43, 0  ;;  %vm2121_vm6 = vc.u32 %v5874_v56, 2454267026 }
 0x35c   : > { %7315 = vst [vmem:[#allocation19_spill] sm:$0xff] %v5861_v27  ;;  %v2549_v49 = vrot.slane %v5239_v22, 1  ;;  %v2111_v8 = vmul.u32 14, %v2110_v42  ;;  %v2330_v26 = vadd.s32 14, %v2098_v43  ;;  %vm2305_vm14 = vmand %vm2280_vm9, %vm2255_vm8  ;;  %v2122_v42 = vsel %vm2121_vm6, 1, %v7283_v25 }
 0x35d   : > { %2932 = vrot.lane.b32.xlu1 %v2883_v57, %s4348_s9  ;;  %3262 = vrot.lane.b32.xlu0 %v3199_v40, %s4349_s10  ;;  %v3366_v57 = vsel %vm834_vm2, %v3363_v15, %v3365_v59  ;;  %v7203_v40 = vrot.slane %v5239_v22, 6  ;;  %v2800_v15 = vsel %vm7316_vm7, %v5792_v0, 0.0  ;;  %vm7318_vm7 = vcmp.ne.s32.totalorder %v5153_v12, 0 }
 0x35e   : > { %v2825_v6 = vadd.f32 %v2800_v15, %v2646_v24  ;;  %v5923_v15 = vadd.s32 136, %v4685_v20  ;;  %v2112_v56 = vsub.s32 %v5757_v53, %v2111_v8  ;;  %v5936_v27 = vsel %vm2305_vm14, %v2330_v26, %v2098_v43 }
 0x35f   : > { %v2732_v9 = vpop.permute.xlu0 %2731  ;;  %v2578_v63 = vpop.permute.xlu1 %2577  ;;  %v2885_v24 = vsel %vm2854_vm10, %v2882_v58, %v7203_v40  ;;  %v3368_v58 = vsel %vm834_vm2, %v3365_v59, %v7319_v11  ;;  %v7206_v40 = vrot.slane %v5259_v55, 5  ;;  %v7320_v11 = vld [vmem:[#allocation12_spill] sm:$0xff]  ;;  %vm7229_vm9 = vcmp.ne.s32.totalorder %v5936_v27, 13 }
 0x360   : > { %vm7321_vm8 = vcmp.ne.s32.totalorder %v7320_v11, 13  ;;  %vm2256_vm6 = vcmp.ne.s32.totalorder %v2112_v56, 0  ;;  %vm2281_vm14 = vcmp.lt.s32.totalorder %v2112_v56, 0  ;;  %vm7379_vm11 = vcmp.ne.s32.totalorder %v5392_v23, 0 }
 0x361   : > { %3413 = vrot.lane.b32.xlu1 %v3366_v57, %s4347_s8  ;;  %2751 = vrot.lane.b32.xlu0 %v2704_v28, %s4347_s8  ;;  %v7317_v57 = vrot.slane %v5183_v5, 5  ;;  %v1657_v5 = vrot.slane %v5904_v34, 1  ;;  %v3313_v34 = vadd.f32 %v5762_v17, %v5788_v60  ;;  %v2801_v59 = vsel %vm7321_vm8, %v2732_v9, 0.0 }
 0x363   : > { %v2915_v45 = vpop.permute.xlu0 %2914  ;;  %v5906_v44 = vpop.permute.xlu1 %3244  ;;  %v3545_v28 = vsel %vm3520_vm3, %v7317_v57, %v3544_v41  ;;  %v1658_v8 = vsel %vm1559_vm12, %v1651_v37, %v1657_v5 }
 0x364   : > { %v2985_v0 = vsel %vm7318_vm7, %v2915_v45, 0.0  ;;  %v4113_v57 = vpop.f32.mrf.mxu1  ;;  %v2550_v45 = vsel %vm1559_vm12, %v2547_v1, %v2549_v49  ;;  %1836 = vst.msk [vmem:[#allocation3 + $0x1a8] sm:$0xff] %vm556_vm0, %v1658_v8  ;;  %vm5976_vm7 = vmand %vm2281_vm14, %vm2256_vm6  ;;  %vm7328_vm6 = vcmp.ne.s32.totalorder %v5076_v51, 0 }
 0x365   : > { %v3010_v46 = vadd.f32 %v2985_v0, %v2825_v6  ;;  %3594 = vrot.lane.b32.xlu1 %v3545_v28, %s4348_s9  ;;  %2934 = vrot.lane.b32.xlu0 %v2885_v24, %s4348_s9  ;;  %v2123_v6 = vadd.s32 %v5875_v7, %v2122_v42  ;;  %v2647_v28 = vadd.f32 %v2578_v63, %v5300_v4  ;;  %v2331_v42 = vadd.s32 14, %v2112_v56  ;;  %v5971_v24 = vld [vmem:[#allocation3 + $0x188] sm:$0xff] }
 0x366   : > { %v5953_v7 = vmul.u32.u64.low 2454267026, %v5923_v15  ;;  %v5954_v26 = vmul.u32.u64.high 2454267026, %v5923_v15, %v5953_v7  ;;  %v3200_v57 = vsel %vm7229_vm9, %v5971_v24, 0.0 }
 0x367   : > { %v5943_v2 = vadd.f32 %v5351_v21, %v3010_v46  ;;  %v3396_v1 = vpop.permute.xlu0 %3395  ;;  %v5945_v53 = vpop.permute.xlu1 %2733  ;;  %v7322_v21 = vld [vmem:[#allocation13_spill] sm:$0xff]  ;;  %v2826_v37 = vadd.f32 %v2801_v59, %v2647_v28  ;;  %v3547_v46 = vsel %vm3520_vm3, %v3544_v41, %v7206_v40  ;;  %v7327_v28 = vrot.slane %v5239_v22, 2  ;;  %v5990_v59 = vld [vmem:[#allocation3 + $0x198] sm:$0xff] }
 0x368   : > { %v3468_v43 = vsel %vm2368_vm1, %v3396_v1, 0.0  ;;  %v2705_v17 = vrot.slane %v7322_v21, 2  ;;  %v7204_v60 = vrot.slane %v7322_v21, 1  ;;  %vm7324_vm1 = vcmp.ne.s32.totalorder %v7320_v11, 0  ;;  %v5982_v41 = vpop.f32.mrf.mxu1 }
 0x369   : > { %v5957_v4 = vadd.f32 %v3468_v43, %v3313_v34  ;;  %2597 = vrot.lane.b32.xlu1 %v2550_v45, %s4349_s10  ;;  %3415 = vrot.lane.b32.xlu0 %v3368_v58, %s4347_s8  ;;  %v2124_v58 = vshrl.u32 %v2123_v6, 3  ;;  %vm2135_vm8 = vc.u32 %v5953_v7, 2454267026  ;;  %v2886_v6 = vrot.slane %v5990_v59, 6 }
 0x36a   : > { %v2706_v1 = vsel %vm2671_vm5, %v7327_v28, %v2705_v17  ;;  %v2552_v8 = vsel %vm1559_vm12, %v2549_v49, %v7204_v60  ;;  %v7205_v43 = vrot.slane %v5982_v41, 1  ;;  %v2136_v49 = vsel %vm2135_vm8, 1, %v7283_v25 }
 0x36b   : > { %v5964_v9 = vpop.permute.xlu0 %3576  ;;  %v2917_v63 = vpop.permute.xlu1 %2916  ;;  %v2125_v59 = vmul.u32 14, %v2124_v58  ;;  %v6008_v60 = vadd.s32 144, %v4685_v20  ;;  %v7331_v45 = vrot.slane %v5239_v22, 6  ;;  %v6027_v58 = vld [vmem:[#allocation3 + $0x1a0] sm:$0xff] }
 0x36c   : > { %7323 = vst [vmem:[#allocation13_spill] sm:$0xff] %v5964_v9  ;;  %v2986_v0 = vsel %vm7324_vm1, %v2917_v63, 0.0 }
 0x36d   : > { %v3011_v34 = vadd.f32 %v2986_v0, %v2826_v37  ;;  %3596 = vrot.lane.b32.xlu0 %v3547_v46, %s4348_s9  ;;  %3264 = vrot.lane.b32.xlu1 %v3200_v57, %s4349_s10  ;;  %v3314_v37 = vadd.f32 %v5863_v16, %v5840_v30  ;;  %v6001_v57 = vsel %vm5976_vm7, %v2331_v42, %v2112_v56 }
 0x36e   : > { %v1664_v30 = vsel %vm1559_vm12, %v1657_v5, %v7205_v43  ;;  %vm7227_vm14 = vcmp.ne.s32.totalorder %v6001_v57, 13  ;;  %v2137_v56 = vadd.s32 %v5954_v26, %v2136_v49  ;;  %v2887_v5 = vsel %vm2854_vm10, %v7331_v45, %v2886_v6 }
 0x36f   : > { %v2580_v63 = vpop.permute.xlu0 %2579  ;;  %v3398_v46 = vpop.permute.xlu1 %3397  ;;  %v5997_v0 = vadd.f32 %v5410_v38, %v3011_v34  ;;  %1839 = vst.msk [vmem:[#allocation3 + $0x1c0] sm:$0xff] %vm556_vm0, %v1664_v30  ;;  %v3369_v34 = vrot.slane %v6027_v58, 4  ;;  %v3201_v26 = vsel %vm7227_vm14, %v6027_v58, 0.0  ;;  %v7333_v43 = vrot.slane %v5259_v55, 4 }
 0x370   : > { %v3469_v28 = vsel %vm7328_vm6, %v3398_v46, 0.0  ;;  %v4114_v38 = vpop.f32.mrf.mxu1  ;;  %v6038_v46 = vmul.u32.u64.low 2454267026, %v6008_v60  ;;  %v6039_v49 = vmul.u32.u64.high 2454267026, %v6008_v60, %v6038_v46  ;;  %v2138_v22 = vshrl.u32 %v2137_v56, 3  ;;  %v7334_v56 = vld [vmem:[#allocation14_spill] sm:$0xff] }
 0x371   : > { %v6013_v16 = vadd.f32 %v3469_v28, %v3314_v37  ;;  %2753 = vrot.lane.b32.xlu1 %v2706_v1, %s4347_s8  ;;  %2599 = vrot.lane.b32.xlu0 %v2552_v8, %s4349_s10  ;;  %v6030_v1 = vld [vmem:[#allocation3 + $0x1b0] sm:$0xff]  ;;  %v2126_v37 = vsub.s32 %v5847_v62, %v2125_v59  ;;  %v3370_v40 = vsel %vm834_vm2, %v7333_v43, %v3369_v34  ;;  %v3548_v59 = vrot.slane %v6027_v58, 5 }
 0x372   : > { %v7208_v8 = vrot.slane %v6030_v1, 2  ;;  %v7332_v28 = vld [vmem:[#allocation15_spill] sm:$0xff]  ;;  %vm2149_vm8 = vc.u32 %v6038_v46, 2454267026  ;;  %v2802_v43 = vsel %vm7209_vm4, %v5945_v53, 0.0  ;;  %vm7335_vm4 = vcmp.ne.s32.totalorder %v7334_v56, 0 }
 0x373   : > { %7329 = vst [vmem:[#allocation20_spill] sm:$0xff] %v6013_v16  ;;  %v6020_v7 = vpop.permute.xlu1 %3578  ;;  %v6022_v42 = vpop.permute.xlu0 %3246  ;;  %v2648_v30 = vadd.f32 %v2580_v63, %v7332_v28  ;;  %vm2257_vm1 = vcmp.ne.s32.totalorder %v2126_v37, 0  ;;  %vm2282_vm7 = vcmp.lt.s32.totalorder %v2126_v37, 0  ;;  %v2139_v28 = vmul.u32 14, %v2138_v22 }
 0x374   : > { %7330 = vst [vmem:[#allocation21_spill] sm:$0xff] %v6020_v7  ;;  %v2708_v62 = vsel %vm2671_vm5, %v2705_v17, %v7208_v8  ;;  %v6061_v8 = vpop.f32.mrf.mxu1  ;;  %vm2307_vm6 = vmand %vm2282_vm7, %vm2257_vm1  ;;  %v7336_v17 = vrot.slane %v5259_v55, 5  ;;  %v6079_v63 = vadd.s32 152, %v4685_v20  ;;  %v7338_v46 = vrot.slane %v6030_v1, 1 }
 0x375   : > { %2936 = vrot.lane.b32.xlu1 %v2887_v5, %s4348_s9  ;;  %3266 = vrot.lane.b32.xlu0 %v3201_v26, %s4349_s10  ;;  %v6058_v5 = vld [vmem:[#allocation3 + $0x1b8] sm:$0xff]  ;;  %v2332_v26 = vadd.s32 14, %v2126_v37  ;;  %v2827_v51 = vadd.f32 %v2802_v43, %v2648_v30  ;;  %v1669_v53 = vrot.slane %v6061_v8, 1  ;;  %v7337_v30 = vrot.slane %v6030_v1, 6 }
 0x376   : > { %v3549_v22 = vsel %vm3520_vm3, %v7336_v17, %v3548_v59  ;;  %v4117_v54 = vpop.f32.mrf.mxu1  ;;  %v3550_v17 = vrot.slane %v6058_v5, 5  ;;  %vm7342_vm1 = vcmp.ne.s32.totalorder %v5153_v12, 0 }
 0x377   : > { %v2736_v38 = vpop.permute.xlu0 %2735  ;;  %v2582_v45 = vpop.permute.xlu1 %2581  ;;  %v2889_v43 = vsel %vm2854_vm10, %v2886_v6, %v7337_v30  ;;  %v7340_v6 = vrot.slane %v5982_v41, 1  ;;  %v7341_v54 = vrot.slane %v6058_v5, 4 }
 0x379   : > { %3417 = vrot.lane.b32.xlu1 %v3370_v40, %s4347_s8  ;;  %2755 = vrot.lane.b32.xlu0 %v2708_v62, %s4347_s8  ;;  %v2150_v40 = vsel %vm2149_vm8, 1, %v7283_v25  ;;  %v1670_v30 = vsel %vm1559_vm12, %v7340_v6, %v1669_v53 }
 0x37a   : > { %1842 = vst.msk [vmem:[#allocation3 + $0x1d8] sm:$0xff] %vm556_vm0, %v1670_v30 }
 0x37b   : > { %v2919_v7 = vpop.permute.xlu0 %2918  ;;  %v6063_v16 = vpop.permute.xlu1 %3248 }
 0x37c   : > { %v2987_v62 = vsel %vm7335_vm4, %v2919_v7, 0.0  ;;  %v7339_v7 = vrot.slane %v7322_v21, 1  ;;  %v2151_v21 = vadd.s32 %v6039_v49, %v2150_v40  ;;  %v3551_v40 = vsel %vm3520_vm3, %v3548_v59, %v3550_v17 }
 0x37d   : > { %v3012_v9 = vadd.f32 %v2987_v62, %v2827_v51  ;;  %3598 = vrot.lane.b32.xlu1 %v3549_v22, %s4348_s9  ;;  %2938 = vrot.lane.b32.xlu0 %v2889_v43, %s4348_s9  ;;  %v3372_v51 = vsel %vm834_vm2, %v3369_v34, %v7341_v54  ;;  %v6097_v62 = vsel %vm2307_vm6, %v2332_v26, %v2126_v37  ;;  %vm7345_vm6 = vcmp.ne.s32.totalorder %v5392_v23, 0 }
 0x37e   : > { %v2554_v55 = vsel %vm1559_vm12, %v7339_v7, %v7338_v46  ;;  %v2140_v22 = vsub.s32 %v5923_v15, %v2139_v28  ;;  %v3315_v43 = vadd.f32 %v5906_v44, %v5943_v2  ;;  %v2649_v46 = vadd.f32 %v2582_v45, %v5427_v3  ;;  %v6123_v3 = vld [vmem:[#allocation3 + $0x1c8] sm:$0xff]  ;;  %v6126_v2 = vld [vmem:[#allocation3 + $0xe0] sm:$0xff] }
 0x37f   : > { %v6106_v41 = vadd.f32 %v5468_v36, %v3012_v9  ;;  %v3400_v7 = vpop.permute.xlu0 %3399  ;;  %v6108_v6 = vpop.permute.xlu1 %2737  ;;  %vm7219_vm4 = vcmp.ne.s32.totalorder %v6097_v62, 13  ;;  %v2803_v15 = vsel %vm7211_vm13, %v2736_v38, 0.0  ;;  %v7212_v36 = vrot.slane %v6123_v3, 2 }
 0x380   : > { %v3470_v34 = vsel %vm7342_vm1, %v3400_v7, 0.0  ;;  %v6116_v37 = vmul.u32.u64.low 2454267026, %v6079_v63  ;;  %v6117_v49 = vmul.u32.u64.high 2454267026, %v6079_v63, %v6116_v37  ;;  %v7213_v9 = vrot.slane %v6126_v2, 7 }
 0x381   : > { %v6119_v44 = vadd.f32 %v3470_v34, %v3315_v43  ;;  %2601 = vrot.lane.b32.xlu1 %v2554_v55, %s4349_s10  ;;  %3419 = vrot.lane.b32.xlu0 %v3372_v51, %s4347_s8  ;;  %vm2258_vm7 = vcmp.ne.s32.totalorder %v2140_v22, 0  ;;  %vm2283_vm8 = vcmp.lt.s32.totalorder %v2140_v22, 0  ;;  %v2152_v38 = vshrl.u32 %v2151_v21, 3 }
 0x382   : > { %v2828_v45 = vadd.f32 %v2803_v15, %v2649_v46  ;;  %v3202_v55 = vsel %vm7219_vm4, %v6058_v5, 0.0  ;;  %v7215_v30 = vrot.slane %v6123_v3, 1  ;;  %v2333_v51 = vadd.s32 14, %v2140_v22  ;;  %vm2308_vm13 = vmand %vm2283_vm8, %vm2258_vm7 }
 0x383   : > { %7343 = vst [vmem:[#allocation15_spill] sm:$0xff] %v6119_v44  ;;  %v6129_v26 = vpop.permute.xlu0 %3580  ;;  %v2921_v28 = vpop.permute.xlu1 %2920  ;;  %vm2163_vm1 = vc.u32 %v6116_v37, 2454267026  ;;  %v6141_v21 = vadd.s32 160, %v4685_v20  ;;  %v7346_v59 = vrot.slane %v6030_v1, 2  ;;  %v7347_v7 = vrot.slane %v4988_v61, 7 }
 0x384   : > { %7344 = vst [vmem:[#allocation22_spill] sm:$0xff] %v6129_v26  ;;  %v2988_v54 = vsel %vm7345_vm6, %v2921_v28, 0.0  ;;  %vm7348_vm6 = vcmask 1040384   ;;  %v7214_v34 = vrot.slane %v6123_v3, 6  ;;  %v3316_v28 = vadd.f32 %v6022_v42, %v5997_v0 }
 0x385   : > { %v3013_v43 = vadd.f32 %v2988_v54, %v2828_v45  ;;  %3600 = vrot.lane.b32.xlu0 %v3551_v40, %s4348_s9  ;;  %3268 = vrot.lane.b32.xlu1 %v3202_v55, %s4349_s10  ;;  %v2710_v46 = vsel %vm2671_vm5, %v7346_v59, %v7212_v36  ;;  %v3100_v15 = vsel %vm7348_vm6, %v7347_v7, %v7213_v9  ;;  %v2153_v45 = vmul.u32 14, %v2152_v38 }
 0x386   : > { %v7349_v54 = vrot.slane %v6030_v1, 1  ;;  %v2164_v61 = vsel %vm2163_vm1, 1, %v7283_v25  ;;  %vm7350_vm7 = vcmp.ne.s32.totalorder %v7320_v11, 0  ;;  %v6171_v38 = vsel %vm2308_vm13, %v2333_v51, %v2140_v22 }
 0x387   : > { %v2584_v40 = vpop.permute.xlu0 %2583  ;;  %v3402_v55 = vpop.permute.xlu1 %3401  ;;  %v6165_v36 = vadd.f32 %v3100_v15, %v3013_v43  ;;  %v6174_v0 = vmul.u32.u64.low 2454267026, %v6141_v21  ;;  %v6175_v42 = vmul.u32.u64.high 2454267026, %v6141_v21, %v6174_v0  ;;  %vm7216_vm8 = vcmp.ne.s32.totalorder %v6171_v38, 13 }
 0x388   : > { %v2556_v59 = vsel %vm1559_vm12, %v7349_v54, %v7215_v30  ;;  %v3471_v7 = vsel %vm7350_vm7, %v3402_v55, 0.0  ;;  %v6182_v43 = vpop.f32.mrf.mxu1  ;;  %v2154_v37 = vsub.s32 %v6008_v60, %v2153_v45  ;;  %v2165_v15 = vadd.s32 %v6117_v49, %v2164_v61  ;;  %v6197_v54 = vld [vmem:[#allocation3 + $0x1d0] sm:$0xff] }
 0x389   : > { %v6177_v9 = vadd.f32 %v3471_v7, %v3316_v28  ;;  %2757 = vrot.lane.b32.xlu1 %v2710_v46, %s4347_s8  ;;  %2603 = vrot.lane.b32.xlu0 %v2556_v59, %s4349_s10  ;;  %v7217_v22 = vrot.slane %v6182_v43, 1  ;;  %vm2374_vm13 = vcmp.ne.s32.totalorder %v5505_v35, 0  ;;  %v7353_v46 = vrot.slane %v6030_v1, 6  ;;  %v4299_v7 = vld [vmem:[#allocation3 + $0xc0] sm:$0xff] }
 0x38a   : > { %v7221_v60 = vrot.slane %v6197_v54, 4  ;;  %v3203_v49 = vsel %vm7216_vm8, %v6197_v54, 0.0  ;;  %v7220_v45 = vrot.slane %v6197_v54, 5  ;;  %vm2177_vm1 = vc.u32 %v6174_v0, 2454267026  ;;  %v4118_v1 = vpop.f32.mrf.mxu1  ;;  %v6245_v0 = vld [vmem:[#allocation3 + $0xf8] sm:$0xff] }
 0x38b   : > { %7351 = vst [vmem:[#allocation23_spill] sm:$0xff] %v6177_v9  ;;  %v6188_v51 = vpop.permute.xlu1 %3582  ;;  %v6190_v28 = vpop.permute.xlu0 %3250  ;;  %v2891_v55 = vsel %vm2854_vm10, %v7353_v46, %v7214_v34  ;;  %v1676_v59 = vsel %vm1559_vm12, %v1669_v53, %v7217_v22  ;;  %v6210_v61 = vadd.s32 192, %v4685_v20  ;;  %v2449_v46 = vsel %vm2374_vm13, %v4299_v7, 0.0  ;;  %v6222_v1 = vld [vmem:[#allocation3 + $0x1e0] sm:$0xff] }
 0x38c   : > { %7352 = vst [vmem:[#allocation24_spill] sm:$0xff] %v6188_v51  ;;  %1845 = vst.msk [vmem:[#allocation3 + $0x1f0] sm:$0xff] %vm556_vm0, %v1676_v59  ;;  %vm2259_vm6 = vcmp.ne.s32.totalorder %v2154_v37, 0  ;;  %vm2284_vm7 = vcmp.lt.s32.totalorder %v2154_v37, 0  ;;  %v2166_v34 = vshrl.u32 %v2165_v15, 3  ;;  %v2650_v8 = vadd.f32 %v2584_v40, %v2449_v46 }
 0x38d   : > { %2940 = vrot.lane.b32.xlu1 %v2891_v55, %s4348_s9  ;;  %3270 = vrot.lane.b32.xlu0 %v3203_v49, %s4349_s10  ;;  %vm2375_vm8 = vcmp.ne.s32.totalorder %v5569_v19, 0  ;;  %v2711_v55 = vrot.slane %v6222_v1, 2  ;;  %v2178_v49 = vsel %vm2177_vm1, 1, %v7283_v25  ;;  %v7354_v59 = vrot.slane %v6058_v5, 4  ;;  %vm2309_vm1 = vmand %vm2284_vm7, %vm2259_vm6 }
 0x38e   : > { %v3553_v40 = vsel %vm3520_vm3, %v3550_v17, %v7220_v45  ;;  %v2334_v46 = vadd.s32 14, %v2154_v37  ;;  %v6239_v22 = vmul.u32.u64.low 2454267026, %v6210_v61  ;;  %v6240_v11 = vmul.u32.u64.high 2454267026, %v6210_v61, %v6239_v22 }
 0x38f   : > { %v6217_v30 = vpop.permute.xlu0 %2739  ;;  %v6220_v53 = vpop.permute.xlu1 %2585  ;;  %v3374_v15 = vsel %vm834_vm2, %v7354_v59, %v7221_v60  ;;  %vm7355_vm4 = vcmp.ne.s32.totalorder %v5505_v35, 13  ;;  %v2167_v45 = vmul.u32 14, %v2166_v34  ;;  %v2179_v60 = vadd.s32 %v6175_v42, %v2178_v49  ;;  %v6269_v49 = vld [vmem:[#allocation3 + $0x1e8] sm:$0xff] }
 0x390   : > { %v2804_v5 = vsel %vm7355_vm4, %v6108_v6, 0.0  ;;  %v7356_v59 = vrot.slane %v6123_v3, 2  ;;  %v7357_v6 = vrot.slane %v6222_v1, 1  ;;  %v7358_v34 = vrot.slane %v6123_v3, 1 }
 0x391   : > { %3421 = vrot.lane.b32.xlu1 %v3374_v15, %s4347_s8  ;;  %3602 = vrot.lane.b32.xlu0 %v3553_v40, %s4348_s9  ;;  %v2829_v7 = vadd.f32 %v2804_v5, %v2650_v8  ;;  %v4302_v15 = vld [vmem:[#allocation3 + $0xd8] sm:$0xff]  ;;  %v6267_v8 = vsel %vm2309_vm1, %v2334_v46, %v2154_v37  ;;  %v7360_v17 = vrot.slane %v6245_v0, 7  ;;  %vm7362_vm4 = vcmask 1040384  }
 0x392   : > { %v2450_v40 = vsel %vm2375_vm8, %v4302_v15, 0.0  ;;  %v2712_v12 = vsel %vm2671_vm5, %v7356_v59, %v2711_v55  ;;  %v2558_v42 = vsel %vm1559_vm12, %v7358_v34, %v7357_v6  ;;  %7359 = vst [vmem:[#allocation25_spill] sm:$0xff] %v6267_v8  ;;  %v7361_v59 = vrot.slane %v6126_v2, 7 }
 0x393   : > { %v2923_v51 = vpop.permute.xlu0 %2922  ;;  %v3253_v9 = vpop.permute.xlu1 %3252  ;;  %vm7226_vm6 = vcmp.ne.s32.totalorder %v6267_v8, 13  ;;  %vm2376_vm7 = vcmp.ne.s32.totalorder %v5650_v32, 0  ;;  %v7363_v37 = vrot.slane %v6222_v1, 6  ;;  %v6290_v46 = vsub.s32 %v6079_v63, %v2167_v45  ;;  %v4305_v45 = vld [vmem:[#allocation3 + $0xf0] sm:$0xff] }
 0x394   : > { %v2989_v26 = vsel %vm2374_vm13, %v2923_v51, 0.0  ;;  %v3102_v44 = vsel %vm7362_vm4, %v7361_v59, %v7360_v17  ;;  %v7364_v51 = vrot.slane %v6123_v3, 6  ;;  %v1445_v17 = vpop.f32.mrf.mxu1  ;;  %v3317_v6 = vadd.f32 %v6063_v16, %v6106_v41 }
 0x395   : > { %v3014_v15 = vadd.f32 %v2989_v26, %v2829_v7  ;;  %2759 = vrot.lane.b32.xlu0 %v2712_v12, %s4347_s8  ;;  %2605 = vrot.lane.b32.xlu1 %v2558_v42, %s4349_s10  ;;  %v6286_v7 = vld [vmem:[#allocation3 + $0x1f8] sm:$0xff]  ;;  %v2180_v12 = vshrl.u32 %v2179_v60, 3  ;;  %v6295_v5 = vadd.s32 168, %v4685_v20  ;;  %v1681_v3 = vrot.slane %v1445_v17, 1 }
 0x396   : > { %v2893_v26 = vsel %vm2854_vm10, %v7364_v51, %v7363_v37  ;;  %vm7365_vm1 = vcmp.ne.s32.totalorder %v7334_v56, 0  ;;  %v3204_v63 = vsel %vm7226_vm6, %v6269_v49, 0.0  ;;  %v2451_v60 = vsel %vm2376_vm7, %v4305_v45, 0.0 }
 0x397   : > { %v3168_v34 = vadd.f32 %v3102_v44, %v3014_v15  ;;  %v3404_v42 = vpop.permute.xlu0 %3403  ;;  %v3585_v59 = vpop.permute.xlu1 %3584  ;;  %v7366_v16 = vrot.slane %v6269_v49, 4  ;;  %v7367_v41 = vrot.slane %v6197_v54, 4  ;;  %v7368_v2 = vrot.slane %v6182_v43, 1 }
 0x398   : > { %v3472_v37 = vsel %vm7365_vm1, %v3404_v42, 0.0  ;;  %v4121_v15 = vpop.f32.mrf.mxu1  ;;  %v3554_v42 = vrot.slane %v6269_v49, 5  ;;  %v7369_v56 = vrot.slane %v6286_v7, 2  ;;  %vm2260_vm4 = vcmp.ne.s32.totalorder %v6290_v46, 0 }
 0x399   : > { %v3376_v44 = vsel %vm834_vm2, %v7367_v41, %v7366_v16  ;;  %v6309_v51 = vadd.f32 %v3253_v9, %v3168_v34  ;;  %v3497_v17 = vadd.f32 %v3472_v37, %v3317_v6  ;;  %2942 = vrot.lane.b32.xlu0 %v2893_v26, %s4348_s9  ;;  %3272 = vrot.lane.b32.xlu1 %v3204_v63, %s4349_s10  ;;  %v2181_v9 = vmul.u32 14, %v2180_v12  ;;  %v6345_v15 = vld [vmem:[#allocation3 + $0x200] sm:$0xff] }
 0x39a   : > { %v1682_v45 = vsel %vm1559_vm12, %v7368_v2, %v1681_v3  ;;  %v2714_v8 = vsel %vm2671_vm5, %v2711_v55, %v7369_v56  ;;  %v2651_v26 = vadd.f32 %v6220_v53, %v2450_v40  ;;  %vm7370_vm1 = vcmp.ne.s32.totalorder %v5569_v19, 13  ;;  %v6336_v63 = vpop.f32.mrf.mxu1  ;;  %v6340_v53 = vld [vmem:[#allocation3 + $0x110] sm:$0xff] }
 0x39b   : > { %1848 = vst.msk [vmem:[#allocation3 + $0x208] sm:$0xff] %vm556_vm0, %v1682_v45  ;;  %v6324_v6 = vadd.f32 %v3585_v59, %v3497_v17  ;;  %v2742_v34 = vpop.permute.xlu1 %2741  ;;  %v2588_v37 = vpop.permute.xlu0 %2587  ;;  %v6327_v43 = vmul.u32.u64.low 2454267026, %v6295_v5  ;;  %v6328_v2 = vmul.u32.u64.high 2454267026, %v6295_v5, %v6327_v43  ;;  %v2805_v56 = vsel %vm7370_vm1, %v6217_v30, 0.0 }
 0x39c   : > { %vm7371_vm6 = vcmp.ne.s32.totalorder %v5650_v32, 13  ;;  %v2652_v12 = vadd.f32 %v2588_v37, %v2451_v60  ;;  %vm2285_vm14 = vcmp.lt.s32.totalorder %v6290_v46, 0  ;;  %v2559_v59 = vrot.slane %v6286_v7, 1 }
 0x39d   : > { %v2806_v55 = vsel %vm7371_vm6, %v2742_v34, 0.0  ;;  %3423 = vrot.lane.b32.xlu0 %v3376_v44, %s4347_s8  ;;  %2761 = vrot.lane.b32.xlu1 %v2714_v8, %s4347_s8  ;;  %v7228_v30 = vrot.slane %v6336_v63, 1  ;;  %v7232_v60 = vrot.slane %v6345_v15, 5  ;;  %v2335_v17 = vadd.s32 14, %v6290_v46  ;;  %v4122_v44 = vpop.f32.mrf.mxu1  ;;  %vm2310_vm6 = vmand %vm2285_vm14, %vm2260_vm4 }
 0x39e   : > { %v2831_v41 = vadd.f32 %v2806_v55, %v2652_v12  ;;  %v2182_v45 = vsub.s32 %v6141_v21, %v2181_v9  ;;  %v2830_v34 = vadd.f32 %v2805_v56, %v2651_v26  ;;  %v7372_v16 = vrot.slane %v6197_v54, 5 }
 0x39f   : > { %v2925_v8 = vpop.permute.xlu1 %2924  ;;  %v3255_v37 = vpop.permute.xlu0 %3254  ;;  %v1688_v55 = vsel %vm1559_vm12, %v1681_v3, %v7228_v30  ;;  %v7373_v9 = vrot.slane %v6286_v7, 6  ;;  %v7374_v26 = vrot.slane %v6222_v1, 6  ;;  %vm2191_vm1 = vc.u32 %v6327_v43, 2454267026 }
 0x3a0   : > { %v3555_v40 = vsel %vm3520_vm3, %v7372_v16, %v3554_v42  ;;  %v2990_v21 = vsel %vm2375_vm8, %v2925_v8, 0.0  ;;  %v6368_v16 = vadd.s32 176, %v4685_v20  ;;  %1851 = vst.msk [vmem:[#allocation3 + $0x220] sm:$0xff] %vm556_vm0, %v1688_v55  ;;  %v7375_v12 = vrot.slane %v6340_v53, 7 }
 0x3a1   : > { %v2895_v54 = vsel %vm2854_vm10, %v7374_v26, %v7373_v9  ;;  %v3015_v56 = vadd.f32 %v2990_v21, %v2830_v34  ;;  %v7376_v3 = vrot.slane %v6245_v0, 7  ;;  %vm7377_vm14 = vcmask 1040384   ;;  %3604 = vrot.lane.b32.xlu0 %v3555_v40, %s4348_s9  ;;  %v6381_v26 = vld [vmem:[#allocation3 + $0x210] sm:$0xff] }
 0x3a2   : > { %2944 = vrot.lane.b32.xlu1 %v2895_v54, %s4348_s9  ;;  %v7378_v8 = vrot.slane %v6222_v1, 1  ;;  %v7231_v30 = vrot.slane %v6381_v26, 1  ;;  %v3557_v34 = vsel %vm3520_vm3, %v3554_v42, %v7232_v60  ;;  %v6388_v0 = vsel %vm2310_vm6, %v2335_v17, %v6290_v46 }
 0x3a3   : > { %v3104_v44 = vsel %vm7377_vm14, %v7376_v3, %v7375_v12  ;;  %vm2261_vm4 = vcmp.ne.s32.totalorder %v2182_v45, 0  ;;  %vm2286_vm14 = vcmp.lt.s32.totalorder %v2182_v45, 0  ;;  %v3318_v40 = vadd.f32 %v6190_v28, %v6165_v36  ;;  %v3406_v1 = vpop.permute.xlu1 %3405  ;;  %v2744_v21 = vpop.permute.xlu0 %2743 }
 0x3a4   : > { %v2560_v9 = vsel %vm1559_vm12, %v7378_v8, %v2559_v59  ;;  %v3169_v55 = vadd.f32 %v3104_v44, %v3015_v56  ;;  %vm2410_vm9 = vcmp.ne.s32.totalorder %v6388_v0, 13  ;;  %v2192_v54 = vsel %vm2191_vm1, 1, %v7283_v25  ;;  %vm2311_vm6 = vmand %vm2286_vm14, %vm2261_vm4 }
 0x3a5   : > { %v3473_v12 = vsel %vm7379_vm11, %v3406_v1, 0.0  ;;  %v2336_v42 = vadd.s32 14, %v2182_v45  ;;  %v6398_v46 = vmul.u32.u64.low 2454267026, %v6368_v16  ;;  %v6399_v17 = vmul.u32.u64.high 2454267026, %v6368_v16, %v6398_v46  ;;  %2607 = vrot.lane.b32.xlu0 %v2560_v9, %s4349_s10 }
 0x3a6   : > { %v6401_v3 = vadd.f32 %v3255_v37, %v3169_v55  ;;  %v3498_v8 = vadd.f32 %v3473_v12, %v3318_v40  ;;  %3606 = vrot.lane.b32.xlu1 %v3557_v34, %s4348_s9  ;;  %vm2233_vm1 = vc.u32 %v6239_v22, 2454267026  ;;  %v2193_v36 = vadd.s32 %v6328_v2, %v2192_v54  ;;  %v6426_v40 = vld [vmem:[#allocation3 + $0x128] sm:$0xff] }
 0x3a7   : > { %v3587_v28 = vpop.permute.xlu1 %3586  ;;  %v2927_v43 = vpop.permute.xlu0 %2926  ;;  %v3205_v56 = vsel %vm2410_vm9, %v6345_v15, 0.0  ;;  %v2562_v37 = vsel %vm1559_vm12, %v2559_v59, %v7231_v30  ;;  %vm2377_vm11 = vcmp.ne.s32.totalorder %v5708_v33, 0  ;;  %v3377_v44 = vrot.slane %v6345_v15, 4  ;;  %v4310_v12 = vld [vmem:[#allocation3 + $0x108] sm:$0xff] }
 0x3a8   : > { %v6417_v9 = vadd.f32 %v3587_v28, %v3498_v8  ;;  %v2991_v34 = vsel %vm2376_vm7, %v2927_v43, 0.0  ;;  %v6421_v2 = vsel %vm2311_vm6, %v2336_v42, %v2182_v45  ;;  %vm2205_vm4 = vc.u32 %v6398_v46, 2454267026  ;;  %v6435_v43 = vld [vmem:[#allocation3 + $0x218] sm:$0xff] }
 0x3a9   : > { %7380 = vst [vmem:[#allocation26_spill] sm:$0xff] %v6421_v2  ;;  %3274 = vrot.lane.b32.xlu0 %v3205_v56, %s4349_s10  ;;  %vm7236_vm14 = vcmp.ne.s32.totalorder %v6421_v2, 13  ;;  %v3105_v59 = vrot.slane %v6426_v40, 7  ;;  %v2234_v55 = vsel %vm2233_vm1, 1, %v7283_v25  ;;  %v3016_v1 = vadd.f32 %v2991_v34, %v2831_v41 }
 0x3aa   : > { %2609 = vrot.lane.b32.xlu1 %v2562_v37, %s4349_s10  ;;  %v2194_v54 = vshrl.u32 %v2193_v36, 3  ;;  %v2452_v45 = vsel %vm2377_vm11, %v4310_v12, 0.0  ;;  %v2715_v28 = vrot.slane %v6381_v26, 2  ;;  %v2206_v37 = vsel %vm2205_vm4, 1, %v7283_v25 }
 0x3ab   : > { %v2590_v42 = vpop.permute.xlu1 %2589  ;;  %v3408_v8 = vpop.permute.xlu0 %3407  ;;  %v7381_v41 = vrot.slane %v6269_v49, 4  ;;  %v3206_v34 = vsel %vm7236_vm14, %v6435_v43, 0.0  ;;  %v2235_v12 = vadd.s32 %v6240_v11, %v2234_v55  ;;  %vm7382_vm6 = vcmp.ne.s32.totalorder %v5708_v33, 13 }
 0x3ac   : > { %v2653_v30 = vadd.f32 %v2590_v42, %v2452_v45  ;;  %v3474_v22 = vsel %vm2374_vm13, %v3408_v8, 0.0  ;;  %v2807_v60 = vsel %vm7382_vm6, %v2744_v21, 0.0  ;;  %v7383_v45 = vrot.slane %v6340_v53, 7  ;;  %v6460_v55 = vpop.f32.mrf.mxu1 }
 0x3ad   : > { %v3378_v36 = vsel %vm834_vm2, %v7381_v41, %v3377_v44  ;;  %v3499_v46 = vadd.f32 %v3474_v22, %v6309_v51  ;;  %vm7384_vm13 = vcmask 1040384   ;;  %v2195_v56 = vmul.u32 14, %v2194_v54 }
 0x3ae   : > { %3425 = vrot.lane.b32.xlu0 %v3378_v36, %s4347_s8  ;;  %3276 = vrot.lane.b32.xlu1 %v3206_v34, %s4349_s10  ;;  %v3106_v42 = vsel %vm7384_vm13, %v7383_v45, %v3105_v59  ;;  %v2832_v8 = vadd.f32 %v2807_v60, %v2653_v30  ;;  %v2207_v11 = vadd.s32 %v6399_v17, %v2206_v37  ;;  %v7385_v51 = vrot.slane %v6286_v7, 2  ;;  %v6475_v17 = vld [vmem:[#allocation3 + $0x228] sm:$0xff]  ;;  %v4125_v37 = vpop.f32.mrf.mxu1 }
 0x3af   : > { %v3170_v41 = vadd.f32 %v3106_v42, %v3016_v1  ;;  %v3589_v21 = vpop.permute.xlu0 %3588  ;;  %v3257_v2 = vpop.permute.xlu1 %3256  ;;  %v7386_v36 = vrot.slane %v6435_v43, 4  ;;  %v2896_v53 = vrot.slane %v6381_v26, 6  ;;  %v7238_v30 = vrot.slane %v6460_v55, 1  ;;  %7387 = vst [vmem:[#allocation27_spill] sm:$0xff] %v6475_v17 }
 0x3b0   : > { %v2716_v22 = vsel %vm2671_vm5, %v7385_v51, %v2715_v28  ;;  %v6470_v60 = vadd.f32 %v3589_v21, %v3499_v46  ;;  %vm2378_vm1 = vcmp.ne.s32.totalorder %v5803_v14, 0  ;;  %v7235_v54 = vrot.slane %v6475_v17, 2  ;;  %v4313_v21 = vld [vmem:[#allocation3 + $0x120] sm:$0xff] }
 0x3b1   : > { %v3380_v34 = vsel %vm834_vm2, %v3377_v44, %v7386_v36  ;;  %v6472_v1 = vadd.f32 %v3257_v2, %v3170_v41  ;;  %v2236_v45 = vshrl.u32 %v2235_v12, 3  ;;  %v7388_v44 = vrot.slane %v6336_v63, 1 }
 0x3b2   : > { %2763 = vrot.lane.b32.xlu0 %v2716_v22, %s4347_s8  ;;  %3427 = vrot.lane.b32.xlu1 %v3380_v34, %s4347_s8  ;;  %v2196_v2 = vsub.s32 %v6295_v5, %v2195_v56  ;;  %v2208_v42 = vshrl.u32 %v2207_v11, 3  ;;  %v2453_v12 = vsel %vm2378_vm1, %v4313_v21, 0.0  ;;  %v7389_v22 = vrot.slane %v6286_v7, 6  ;;  %v6504_v7 = vld [vmem:[#allocation3 + $0x140] sm:$0xff] }
 0x3b3   : > { %v1694_v46 = vsel %vm1559_vm12, %v7388_v44, %v7238_v30  ;;  %v2746_v41 = vpop.permute.xlu1 %2745  ;;  %v2592_v51 = vpop.permute.xlu0 %2591  ;;  %v3558_v34 = vrot.slane %v6435_v43, 5  ;;  %v7237_v63 = vrot.slane %v6475_v17, 6  ;;  %v2718_v11 = vsel %vm2671_vm5, %v2715_v28, %v7235_v54  ;;  %v6541_v30 = vld [vmem:[#allocation3 + $0x240] sm:$0x3f] }
 0x3b4   : > { %1854 = vst.msk [vmem:[#allocation3 + $0x238] sm:$0xff] %vm556_vm0, %v1694_v46  ;;  %v2897_v36 = vsel %vm2854_vm10, %v7389_v22, %v2896_v53  ;;  %v2808_v5 = vsel %vm7240_vm15, %v2746_v41, 0.0  ;;  %v2654_v56 = vadd.f32 %v2592_v51, %v2453_v12  ;;  %v6500_v37 = vadd.s32 184, %v4685_v20 }
 0x3b5   : > { %v2237_v44 = vmul.u32 14, %v2236_v45  ;;  %v3107_v46 = vrot.slane %v6504_v7, 7  ;;  %vm2262_vm4 = vcmp.ne.s32.totalorder %v2196_v2, 0  ;;  %vm2287_vm6 = vcmp.lt.s32.totalorder %v2196_v2, 0 }
 0x3b6   : > { %2946 = vrot.lane.b32.xlu0 %v2897_v36, %s4348_s9  ;;  %2765 = vrot.lane.b32.xlu1 %v2718_v11, %s4347_s8  ;;  %v2833_v21 = vadd.f32 %v2808_v5, %v2654_v56  ;;  %v2209_v41 = vmul.u32 14, %v2208_v42  ;;  %v7390_v28 = vrot.slane %v6345_v15, 5  ;;  %v2899_v45 = vsel %vm2854_vm10, %v2896_v53, %v7237_v63  ;;  %v6514_v36 = vld [vmem:[#allocation3 + $0x230] sm:$0xff]  ;;  %vm2312_vm13 = vmand %vm2287_vm6, %vm2262_vm4 }
 0x3b7   : > { %v2929_v12 = vpop.permute.xlu1 %2928  ;;  %v3259_v51 = vpop.permute.xlu0 %3258  ;;  %v2563_v22 = vrot.slane %v6475_v17, 1  ;;  %7391 = vst [vmem:[#allocation28_spill] sm:$0xff] %v6514_v36  ;;  %v7241_v11 = vrot.slane %v6514_v36, 5  ;;  %v2337_v42 = vadd.s32 14, %v2196_v2  ;;  %vm7392_vm14 = vcmask 1040384  }
 0x3b8   : > { %v3559_v20 = vsel %vm3520_vm3, %v7390_v28, %v3558_v34  ;;  %v2992_v5 = vsel %vm2377_vm11, %v2929_v12, 0.0  ;;  %v6520_v56 = vmul.u32.u64.low 2454267026, %v6500_v37  ;;  %v6521_v54 = vmul.u32.u64.high 2454267026, %v6500_v37, %v6520_v56 }
 0x3b9   : > { %v3017_v15 = vadd.f32 %v2992_v5, %v2832_v8  ;;  %v3108_v53 = vsel %vm7392_vm14, %v3105_v59, %v3107_v46  ;;  %v2210_v12 = vsub.s32 %v6368_v16, %v2209_v41  ;;  %v6534_v28 = vsub.s32 %v6210_v61, %v2237_v44  ;;  %v6550_v59 = vld [vmem:[#allocation3 + $0x240] sm:$0x1f]  ;;  %v6552_v44 = vpop.f32.mrf.mxu1 }
 0x3ba   : > { %3608 = vrot.lane.b32.xlu0 %v3559_v20, %s4348_s9  ;;  %2948 = vrot.lane.b32.xlu1 %v2899_v45, %s4348_s9  ;;  %v7393_v20 = vrot.slane %v6381_v26, 1  ;;  %v3561_v16 = vsel %vm3520_vm3, %v3558_v34, %v7241_v11  ;;  %v6548_v61 = vsel %vm2312_vm13, %v2337_v42, %v2196_v2  ;;  %vm2219_vm14 = vc.u32 %v6520_v56, 2454267026 }
 0x3bb   : > { %v3171_v63 = vadd.f32 %v3108_v53, %v3017_v15  ;;  %v3410_v8 = vpop.permute.xlu1 %3409  ;;  %v2748_v5 = vpop.permute.xlu0 %2747  ;;  %7394 = vst [vmem:[#allocation29_spill] sm:$0xff] %v6548_v61  ;;  %v1699_v15 = vrot.slane %v6552_v44, 1  ;;  %v2719_v2 = vrot.slane %v6541_v30, 2  ;;  %vm2379_vm4 = vcmp.ne.s32.totalorder %v5844_v39, 0 }
 0x3bc   : > { %v2564_v45 = vsel %vm1559_vm12, %v7393_v20, %v2563_v22  ;;  %v3475_v40 = vsel %vm2375_vm8, %v3410_v8, 0.0  ;;  %vm7239_vm8 = vcmp.ne.s32.totalorder %v6548_v61, 13  ;;  %vm2263_vm6 = vcmp.ne.s32.totalorder %v2210_v12, 0  ;;  %v4126_v34 = vpop.f32.mrf.mxu1 }
 0x3bd   : > { %v6554_v41 = vadd.f32 %v3259_v51, %v3171_v63  ;;  %v3500_v26 = vadd.f32 %v3475_v40, %v6401_v3  ;;  %vm2288_vm13 = vcmp.lt.s32.totalorder %v2210_v12, 0  ;;  %v3381_v51 = vrot.slane %v6514_v36, 4 }
 0x3be   : > { %2611 = vrot.lane.b32.xlu0 %v2564_v45, %s4349_s10  ;;  %3610 = vrot.lane.b32.xlu1 %v3561_v16, %s4348_s9  ;;  %v2565_v3 = vrot.slane %v6550_v59, 1  ;;  %v2220_v53 = vsel %vm2219_vm14, 1, %v7283_v25  ;;  %v7395_v8 = vrot.slane %v6460_v55, 1  ;;  %v3207_v16 = vsel %vm7239_vm8, %v6514_v36, 0.0  ;;  %v6584_v25 = vld [vmem:[#allocation3 + $0x158] sm:$0xff]  ;;  %vm2313_vm14 = vmand %vm2288_vm13, %vm2263_vm6 }
 0x3bf   : > { %v3591_v42 = vpop.permute.xlu1 %3590  ;;  %v2931_v63 = vpop.permute.xlu0 %2930  ;;  %v2338_v34 = vadd.s32 14, %v2210_v12  ;;  %v3109_v55 = vrot.slane %v6584_v25, 7  ;;  %v2221_v59 = vadd.s32 %v6521_v54, %v2220_v53  ;;  %vm2265_vm8 = vcmp.ne.s32.totalorder %v6534_v28, 0 }
 0x3c0   : > { %v1700_v20 = vsel %vm1559_vm12, %v7395_v8, %v1699_v15  ;;  %v6572_v45 = vadd.f32 %v3591_v42, %v3500_v26  ;;  %v2993_v40 = vsel %vm2378_vm1, %v2931_v63, 0.0  ;;  %vm2290_vm15 = vcmp.lt.s32.totalorder %v6534_v28, 0 }
 0x3c1   : > { %1857 = vst.msk [vmem:[#allocation3 + $0x250] sm:$0xff] %vm556_vm0, %v1700_v20  ;;  %v3018_v56 = vadd.f32 %v2993_v40, %v2833_v21  ;;  %v4317_v21 = vld [vmem:[#allocation3 + $0x138] sm:$0xff]  ;;  %v7396_v8 = vrot.slane %v6435_v43, 4  ;;  %v2566_v53 = vsel %vm1559_vm12, %v2563_v22, %v2565_v3  ;;  %vm7398_vm6 = vcmp.ne.s32.totalorder %v5844_v39, 13 }
 0x3c2   : > { %3278 = vrot.lane.b32.xlu0 %v3207_v16, %s4349_s10  ;;  %2769 = vrot.lane.b32.xlu1 %v2719_v2, %s4347_s8  ;;  %v2454_v26 = vsel %vm2379_vm4, %v4317_v21, 0.0  ;;  %v6604_v16 = vsel %vm2313_vm14, %v2338_v34, %v2210_v12  ;;  %v2809_v21 = vsel %vm7398_vm6, %v2748_v5, 0.0  ;;  %v2340_v22 = vadd.s32 14, %v6534_v28  ;;  %vm2315_vm14 = vmand %vm2290_vm15, %vm2265_vm8 }
 0x3c3   : > { %v2594_v42 = vpop.permute.xlu1 %2593  ;;  %v3412_v63 = vpop.permute.xlu0 %3411  ;;  %v3382_v20 = vsel %vm834_vm2, %v7396_v8, %v3381_v51  ;;  %7397 = vst [vmem:[#allocation30_spill] sm:$0xff] %v6604_v16  ;;  %vm2413_vm13 = vcmp.ne.s32.totalorder %v6604_v16, 13  ;;  %vm2380_vm6 = vcmp.ne.s32.totalorder %v5936_v27, 0  ;;  %vm7402_vm8 = vcmp.ne.s32.totalorder %v5936_v27, 13 }
 0x3c4   : > { %v2655_v40 = vadd.f32 %v2594_v42, %v2454_v26  ;;  %v3476_v54 = vsel %vm2376_vm7, %v3412_v63, 0.0  ;;  %vm7399_vm7 = vcmask 1040384   ;;  %v2222_v42 = vshrl.u32 %v2221_v59, 3  ;;  %v6623_v63 = vld [vmem:[#allocation3 + $0x248] sm:$0xff]  ;;  %v1461_v59 = vpop.f32.mrf.mxu1 }
 0x3c5   : > { %v3501_v11 = vadd.f32 %v3476_v54, %v6472_v1  ;;  %v3110_v26 = vsel %vm7399_vm7, %v3107_v46, %v3109_v55  ;;  %7400 = vst [vmem:[#allocation31_spill] sm:$0xff] %v6623_v63  ;;  %v3383_v7 = vrot.slane %v6623_v63, 4  ;;  %vm1863_vm7 = vcmask 256000  }
 0x3c6   : > { %3429 = vrot.lane.b32.xlu0 %v3382_v20, %s4347_s8  ;;  %2613 = vrot.lane.b32.xlu1 %v2566_v53, %s4349_s10  ;;  %v2834_v12 = vadd.f32 %v2809_v21, %v2655_v40  ;;  %v3172_v34 = vadd.f32 %v3110_v26, %v3018_v56  ;;  %v3208_v56 = vsel %vm2413_vm13, %v6623_v63, 0.0  ;;  %v1705_v20 = vrot.slane %v1461_v59, 1  ;;  %v4129_v53 = vpop.f32.mrf.mxu1  ;;  %v4319_v21 = vld [vmem:[#allocation3 + $0x150] sm:$0xff] }
 0x3c7   : > { %v3593_v1 = vpop.permute.xlu0 %3592  ;;  %v3261_v5 = vpop.permute.xlu1 %3260  ;;  %v6636_v40 = vsel %vm2315_vm14, %v2340_v22, %v6534_v28  ;;  %v2223_v54 = vmul.u32 14, %v2222_v42  ;;  %v2455_v26 = vsel %vm2380_vm6, %v4319_v21, 0.0  ;;  %v7403_v42 = vrot.slane %v6475_v17, 2  ;;  %v6659_v59 = vld [vmem:[#allocation3 + $0x170] sm:$0xff] }
 0x3c8   : > { %v6626_v46 = vadd.f32 %v3593_v1, %v3501_v11  ;;  %v6628_v8 = vadd.f32 %v3261_v5, %v3172_v34  ;;  %7401 = vst [vmem:[#allocation32_spill] sm:$0xff] %v6636_v40  ;;  %vm2415_vm15 = vcmp.ne.s32.totalorder %v6636_v40, 13  ;;  %v3185_v1 = vld [vmem:[#allocation3 + $0x278] sm:$0xf]  ;;  %1864 = vst.msk [vmem:[#allocation3 + $0x280] sm:$0x7] %vm1863_vm7, %v1705_v20  ;;  %v1464_v44 = vpop.f32.mrf.mxu1 }
 0x3c9   : > { %v2720_v5 = vsel %vm2671_vm5, %v7403_v42, %v2719_v2  ;;  %v3111_v30 = vrot.slane %v6659_v59, 7  ;;  %v3210_v2 = vsel %vm2415_vm15, %v3185_v1, 0.0  ;;  %v7407_v44 = vrot.slane %v6514_v36, 5  ;;  %v6830_v40 = vld [vmem:[#allocation3 + $0x1d8] sm:$0xff] }
 0x3ca   : > { %2615 = vrot.lane.b32.xlu0 %v2565_v3, %s4349_s10  ;;  %3280 = vrot.lane.b32.xlu1 %v3208_v56, %s4349_s10  ;;  %v1706_v3 = vsel %vm1559_vm12, %v1699_v15, %v1705_v20  ;;  %v3384_v56 = vsel %vm834_vm2, %v3381_v51, %v3383_v7  ;;  %v2224_v20 = vsub.s32 %v6500_v37, %v2223_v54  ;;  %v4130_v53 = vpop.f32.mrf.mxu1  ;;  %v6675_v37 = vld [vmem:[#allocation3 + $0x278] sm:$0xff] }
 0x3cb   : > { %v2750_v11 = vpop.permute.xlu1 %2749  ;;  %v2596_v34 = vpop.permute.xlu0 %2595  ;;  %1860 = vst.msk [vmem:[#allocation3 + $0x268] sm:$0xff] %vm556_vm0, %v1706_v3  ;;  %vm7406_vm0 = vcmask 1040384   ;;  %v3566_v53 = vrot.slane %v6675_v37, 5 }
 0x3cc   : > { %v2810_v28 = vsel %vm7402_vm8, %v2750_v11, 0.0  ;;  %v2656_v22 = vadd.f32 %v2596_v34, %v2455_v26  ;;  %v7404_v26 = vrot.slane %v5562_v48, 6  ;;  %v7405_v34 = vrot.slane %v6475_v17, 6 }
 0x3cd   : > { %v3112_v48 = vsel %vm7406_vm0, %v3109_v55, %v3111_v30  ;;  %vm2264_vm12 = vcmp.ne.s32.totalorder %v2224_v20, 0  ;;  %vm2289_vm5 = vcmp.lt.s32.totalorder %v2224_v20, 0  ;;  %v7408_v55 = vld [vmem:[#allocation5_spill] sm:$0xff]  ;;  %vm1476_vm8 = vcmask 261123  }
 0x3ce   : > { %2767 = vrot.lane.b32.xlu0 %v2720_v5, %s4347_s8  ;;  %3431 = vrot.lane.b32.xlu1 %v3384_v56, %s4347_s8  ;;  %v2835_v15 = vadd.f32 %v2810_v28, %v2656_v22  ;;  %v2901_v3 = vsel %vm2854_vm10, %v7405_v34, %v7404_v26  ;;  %v3562_v28 = vrot.slane %v6623_v63, 5  ;;  %v2849_v22 = vld [vmem:[#allocation3 + $0x270] sm:$0x3]  ;;  %vm2314_vm14 = vmand %vm2289_vm5, %vm2264_vm12  ;;  %v3569_v26 = vsel %vm3520_vm3, %v3566_v53, %v7408_v55 }
 0x3cf   : > { %v2933_v11 = vpop.permute.xlu1 %2932  ;;  %v3263_v51 = vpop.permute.xlu0 %3262  ;;  %v2904_v56 = vrot.slane %v2849_v22, 6  ;;  %v7409_v22 = vrot.slane %v5663_v47, 6  ;;  %v3113_v47 = vrot.slane %v5971_v24, 7  ;;  %v4323_v24 = vld [vmem:[#allocation3 + $0x8] sm:$0xff]  ;;  %vm7412_vm0 = vcmp.ne.s32.totalorder %v6001_v57, 13 }
 0x3d0   : > { %v2994_v21 = vsel %vm2379_vm4, %v2933_v11, 0.0  ;;  %v2339_v11 = vadd.s32 14, %v2224_v20  ;;  %1477 = vst.msk [vmem:[#allocation3 + $0x280] sm:$0xf8] %vm1476_vm8, %v4323_v24 }
 0x3d1   : > { %v3019_v42 = vadd.f32 %v2994_v21, %v2834_v12 }
 0x3d2   : > { %2950 = vrot.lane.b32.xlu0 %v2901_v3, %s4348_s9  ;;  %3284 = vrot.lane.b32.xlu1 %v3210_v2, %s4349_s10  ;;  %v3563_v2 = vsel %vm3520_vm3, %v7407_v44, %v3562_v28 }
 0x3d3   : > { %v3173_v54 = vadd.f32 %v3112_v48, %v3019_v42  ;;  %v3414_v1 = vpop.permute.xlu1 %3413  ;;  %v2752_v5 = vpop.permute.xlu0 %2751  ;;  %v2905_v42 = vsel %vm2854_vm10, %v7409_v22, %v2904_v56  ;;  %v4322_v56 = vld [vmem:[#allocation3 + $0x168] sm:$0xff] }
 0x3d4   : > { %v3477_v12 = vsel %vm2377_vm11, %v3414_v1, 0.0  ;;  %vm2381_vm11 = vcmp.ne.s32.totalorder %v6001_v57, 0  ;;  %v6708_v1 = vsel %vm2314_vm14, %v2339_v11, %v2224_v20  ;;  %vm7425_vm14 = vcmp.ne.s32.totalorder %v6097_v62, 13 }
 0x3d5   : > { %v6688_v21 = vadd.f32 %v3263_v51, %v3173_v54  ;;  %v3502_v25 = vadd.f32 %v3477_v12, %v6554_v41  ;;  %v6700_v51 = vld [vmem:[#allocation3 + $0x260] sm:$0xff]  ;;  %v3387_v54 = vrot.slane %v6675_v37, 4  ;;  %7411 = vst [vmem:[#allocation33_spill] sm:$0xff] %v6708_v1  ;;  %vm2414_vm7 = vcmp.ne.s32.totalorder %v6708_v1, 13 }
 0x3d6   : > { %3612 = vrot.lane.b32.xlu0 %v3563_v2, %s4348_s9  ;;  %2952 = vrot.lane.b32.xlu1 %v5885_v52, %s4348_s9  ;;  %7410 = vst [vmem:[#allocation5_spill] sm:$0xff] %v6700_v51  ;;  %v3385_v41 = vrot.slane %v6700_v51, 4  ;;  %v2456_v44 = vsel %vm2381_vm11, %v4322_v56, 0.0  ;;  %v3564_v55 = vrot.slane %v6700_v51, 5  ;;  %v3209_v11 = vsel %vm2414_vm7, %v6700_v51, 0.0 }
 0x3d7   : > { %v3595_v34 = vpop.permute.xlu1 %3594  ;;  %v2935_v3 = vpop.permute.xlu0 %2934 }
 0x3d8   : > { %v6703_v48 = vadd.f32 %v3595_v34, %v3502_v25  ;;  %v2995_v52 = vsel %vm2380_vm6, %v2935_v3, 0.0  ;;  %v3388_v37 = vsel %vm834_vm2, %v3385_v41, %v3387_v54 }
 0x3d9   : > { %v3020_v12 = vadd.f32 %v2995_v52, %v2835_v15 }
 0x3da   : > { %2954 = vrot.lane.b32.xlu0 %v2905_v42, %s4348_s9  ;;  %3618 = vrot.lane.b32.xlu1 %v3569_v26, %s4348_s9  ;;  %v2811_v26 = vsel %vm7412_vm0, %v2752_v5, 0.0  ;;  %v7414_v5 = vld [vmem:[#allocation4_spill] sm:$0xff] }
 0x3db   : > { %v2598_v2 = vpop.permute.xlu1 %2597  ;;  %v3416_v25 = vpop.permute.xlu0 %3415 }
 0x3dc   : > { %v2657_v20 = vadd.f32 %v2598_v2, %v2456_v44  ;;  %v3478_v15 = vsel %vm2378_vm1, %v3416_v25, 0.0  ;;  %vm7413_vm1 = vcmask 1040384   ;;  %v3565_v25 = vsel %vm3520_vm3, %v3562_v28, %v3564_v55 }
 0x3dd   : > { %v3503_v34 = vadd.f32 %v3478_v15, %v6628_v8  ;;  %v3114_v3 = vsel %vm7413_vm1, %v3111_v30, %v3113_v47  ;;  %v3390_v8 = vsel %vm834_vm2, %v3387_v54, %v7414_v5  ;;  %v3386_v30 = vsel %vm834_vm2, %v3383_v7, %v3385_v41  ;;  %vm7416_vm2 = vmmov %vm7413_vm1 }
 0x3de   : > { %3435 = vrot.lane.b32.xlu1 %v3388_v37, %s4347_s8  ;;  %3282 = vrot.lane.b32.xlu0 %v3209_v11, %s4349_s10  ;;  %v2836_v22 = vadd.f32 %v2811_v26, %v2657_v20  ;;  %v3174_v42 = vadd.f32 %v3114_v3, %v3020_v12  ;;  %v7242_v12 = vrot.slane %v6027_v58, 7  ;;  %v7415_v20 = vld [vmem:[#allocation7_spill] sm:$0xff]  ;;  %v3567_v11 = vsel %vm3520_vm3, %v3564_v55, %v3566_v53 }
 0x3df   : > { %v3597_v52 = vpop.permute.xlu0 %3596  ;;  %v3265_v56 = vpop.permute.xlu1 %3264  ;;  %vm2366_vm12 = vcmp.ne.s32.totalorder %v7415_v20, 0  ;;  %vm7417_vm3 = vcmp.ne.s32.totalorder %v7415_v20, 13  ;;  %v7426_v20 = vld [vmem:[#allocation19_spill] sm:$0xff] }
 0x3e0   : > { %v6731_v44 = vadd.f32 %v3597_v52, %v3503_v34  ;;  %v3325_v2 = vadd.f32 %v3265_v56, %v3174_v42  ;;  %v2441_v34 = vsel %vm2366_vm12, %v4323_v24, 0.0  ;;  %v3116_v7 = vsel %vm7416_vm2, %v3113_v47, %v7242_v12  ;;  %vm7423_vm5 = vmmov %vm7417_vm3 }
 0x3e1   : > { %v2642_v56 = vadd.f32 %v5632_v29, %v2441_v34  ;;  %v2796_v24 = vsel %vm7417_vm3, %v5630_v50, 0.0  ;;  %v2981_v5 = vsel %vm2366_vm12, %v5693_v13, 0.0  ;;  %v7418_v50 = vld [vmem:[#allocation8_spill] sm:$0xff] }
 0x3e2   : > { %3614 = vrot.lane.b32.xlu1 %v3565_v25, %s4348_s9  ;;  %3437 = vrot.lane.b32.xlu0 %v3390_v8, %s4347_s8  ;;  %v3672_v13 = vld [vmem:[#allocation3 + $0x58] sm:$0xc0] }
 0x3e3   : > { %v6738_v15 = vpop.permute.xlu1 %2753  ;;  %v2600_v59 = vpop.permute.xlu0 %2599 }
 0x3e6   : > { %3433 = vrot.lane.b32.xlu0 %v3386_v30, %s4347_s8  ;;  %v2821_v30 = vadd.f32 %v2796_v24, %v2642_v56  ;;  %v7422_v24 = vld [vmem:[#allocation18_spill] sm:$0xff] }
 0x3e7   : > { %v2937_v28 = vpop.permute.xlu1 %2936  ;;  %v3267_v37 = vpop.permute.xlu0 %3266 }
 0x3e8   : > { %v2996_v54 = vsel %vm2381_vm11, %v2937_v28, 0.0  ;;  %v3006_v29 = vadd.f32 %v2981_v5, %v2821_v30 }
 0x3e9   : > { %v3021_v26 = vadd.f32 %v2996_v54, %v2836_v22  ;;  %v3031_v22 = vld [vmem:[#allocation3 + $0x20] sm:$0x80] }
 0x3ea   : > { %3616 = vrot.lane.b32.xlu0 %v3567_v11, %s4348_s9  ;;  %v3084_v28 = vrot.slane %v3031_v22, 7 }
 0x3eb   : > { %v3175_v41 = vadd.f32 %v3116_v7, %v3021_v26  ;;  %v3418_v3 = vpop.permute.xlu1 %3417  ;;  %v6755_v42 = vpop.permute.xlu0 %2755  ;;  %v7419_v26 = vrot.slane %v7418_v50, 7 }
 0x3ec   : > { %v3479_v52 = vsel %vm2379_vm4, %v3418_v3, 0.0  ;;  %vm7420_vm4 = vmmov %vm7413_vm1 }
 0x3ed   : > { %v6760_v53 = vadd.f32 %v3267_v37, %v3175_v41  ;;  %v3504_v55 = vadd.f32 %v3479_v52, %v6688_v21  ;;  %v3086_v34 = vsel %vm7420_vm4, %v3084_v28, %v7419_v26  ;;  %v3673_v52 = vld [vmem:[#allocation3 + $0x70] sm:$0xff]  ;;  %v3674_v28 = vld [vmem:[#allocation3 + $0x88] sm:$0xff]  ;;  %vm7441_vm4 = vmmov %vm7425_vm14 }
 0x3ee   : > { %v3160_v7 = vadd.f32 %v3086_v34, %v3006_v29 }
 0x3ef   : > { %v3599_v25 = vpop.permute.xlu1 %3598  ;;  %v2939_v47 = vpop.permute.xlu0 %2938 }
 0x3f0   : > { %v6769_v8 = vadd.f32 %v3599_v25, %v3504_v55  ;;  %v3466_v55 = vsel %vm2366_vm12, %v5790_v10, 0.0  ;;  %v3311_v22 = vadd.f32 %v7422_v24, %v3160_v7  ;;  %v3724_v25 = vrot.slane %v3672_v13, 6  ;;  %v3675_v10 = vld [vmem:[#allocation3 + $0xa0] sm:$0xff] }
 0x3f1   : > { %v4324_v7 = vld [vmem:[#allocation3 + $0x180] sm:$0xff]  ;;  %vm2383_vm12 = vcmp.ne.s32.totalorder %v6171_v38, 0 }
 0x3f2   : > { %v3491_v29 = vadd.f32 %v3466_v55, %v3311_v22 }
 0x3f3   : > { %v6771_v37 = vpop.permute.xlu1 %2601  ;;  %v3420_v54 = vpop.permute.xlu0 %3419 }
 0x3f4   : > { %v3480_v21 = vsel %vm2380_vm6, %v3420_v54, 0.0  ;;  %vm2382_vm6 = vcmp.ne.s32.totalorder %v6097_v62, 0  ;;  %v3647_v26 = vadd.f32 %v5813_v31, %v3491_v29  ;;  %v2812_v31 = vsel %vm7425_vm14, %v6738_v15, 0.0  ;;  %v3677_v15 = vld [vmem:[#allocation3 + $0xd0] sm:$0xff] }
 0x3f5   : > { %v3505_v11 = vadd.f32 %v3480_v21, %v3325_v2  ;;  %v3725_v2 = vrot.slane %v3673_v52, 6  ;;  %v3727_v21 = vrot.slane %v3674_v28, 6  ;;  %v3729_v52 = vrot.slane %v3675_v10, 6 }
 0x3f6   : > { %v3648_v29 = vadd.f32 %v7426_v20, %v5849_v18 }
 0x3f7   : > { %v3601_v41 = vpop.permute.xlu0 %3600  ;;  %v6778_v3 = vpop.permute.xlu1 %3268  ;;  %v3726_v54 = vsel %vm2854_vm10, %v3724_v25, %v3725_v2  ;;  %v3728_v13 = vsel %vm2854_vm10, %v3725_v2, %v3727_v21  ;;  %v3676_v25 = vld [vmem:[#allocation3 + $0xb8] sm:$0xff]  ;;  %v2997_v2 = vsel %vm2382_vm6, %v2939_v47, 0.0  ;;  %v6825_v47 = vld [vmem:[#allocation3 + $0x1f0] sm:$0xff] }
 0x3f8   : > { %v6780_v56 = vadd.f32 %v3601_v41, %v3505_v11  ;;  %v3800_v34 = vsel %vm7423_vm5, %v3726_v54, 0.0  ;;  %v2457_v41 = vsel %vm2382_vm6, %v4324_v7, 0.0  ;;  %v7427_v54 = vld [vmem:[#allocation9_spill] sm:$0xff]  ;;  %v3731_v10 = vrot.slane %v3676_v25, 6 }
 0x3f9   : > { %v2658_v55 = vadd.f32 %v2600_v59, %v2457_v41  ;;  %v3825_v28 = vadd.f32 %v3800_v34, %v3647_v26  ;;  %vm7428_vm8 = vcmp.ne.s32.totalorder %v7427_v54, 13  ;;  %v3730_v59 = vsel %vm2854_vm10, %v3727_v21, %v3729_v52  ;;  %v6820_v26 = vld [vmem:[#allocation3 + $0x1b8] sm:$0xff]  ;;  %v7430_v21 = vld [vmem:[#allocation6_spill] sm:$0xff] }
 0x3fa   : > { %7421 = vst [vmem:[#allocation4_spill] sm:$0xff] %v6780_v56  ;;  %v3801_v7 = vsel %vm7428_vm8, %v3728_v13, 0.0  ;;  %v7252_v18 = vrot.slane %v6820_v26, 7  ;;  %v7429_v13 = vld [vmem:[#allocation13_spill] sm:$0xff]  ;;  %vm7431_vm0 = vcmp.ne.s32.totalorder %v7430_v21, 13  ;;  %v3732_v25 = vsel %vm2854_vm10, %v3729_v52, %v3731_v10  ;;  %v7435_v21 = vld [vmem:[#allocation10_spill] sm:$0xff] }
 0x3fb   : > { %v6786_v5 = vpop.permute.xlu1 %2757  ;;  %v6788_v30 = vpop.permute.xlu0 %2603  ;;  %v2837_v41 = vadd.f32 %v2812_v31, %v2658_v55  ;;  %v3826_v34 = vadd.f32 %v3801_v7, %v3648_v29  ;;  %v3649_v20 = vadd.f32 %v7429_v13, %v5957_v4  ;;  %v3802_v55 = vsel %vm7431_vm0, %v3730_v59, 0.0  ;;  %v3678_v29 = vld [vmem:[#allocation3 + $0xe8] sm:$0xff]  ;;  %v7434_v52 = vld [vmem:[#allocation21_spill] sm:$0xff]  ;;  %vm7451_vm0 = vmmov %vm7413_vm1 }
 0x3fc   : > { %v3733_v31 = vrot.slane %v3677_v15, 6  ;;  %v7432_v4 = vrot.slane %v6027_v58, 7  ;;  %vm7436_vm2 = vcmp.ne.s32.totalorder %v7435_v21, 13  ;;  %v3735_v51 = vrot.slane %v3678_v29, 6  ;;  %v7438_v29 = vld [vmem:[#allocation22_spill] sm:$0xff] }
 0x3fd   : > { %v3022_v54 = vadd.f32 %v2997_v2, %v2837_v41  ;;  %v7257_v2 = vrot.slane %v6825_v47, 6  ;;  %v3827_v59 = vadd.f32 %v3802_v55, %v3649_v20  ;;  %v7433_v41 = vld [vmem:[#allocation20_spill] sm:$0xff]  ;;  %v3803_v63 = vsel %vm7436_vm2, %v3732_v25, 0.0  ;;  %v3679_v20 = vld [vmem:[#allocation3 + $0x100] sm:$0xff] }
 0x3fe   : > { %v3118_v7 = vsel %vm7413_vm1, %v7432_v4, %v7252_v18  ;;  %v3650_v15 = vadd.f32 %v7434_v52, %v7433_v41  ;;  %v3734_v16 = vsel %vm2854_vm10, %v3731_v10, %v3733_v31  ;;  %v4326_v55 = vld [vmem:[#allocation3 + $0x198] sm:$0xff]  ;;  %v3737_v17 = vrot.slane %v3679_v20, 6 }
 0x3ff   : > { %v6792_v11 = vpop.permute.xlu1 %2940  ;;  %v6794_v50 = vpop.permute.xlu0 %3270  ;;  %v3176_v13 = vadd.f32 %v3118_v7, %v3022_v54  ;;  %v2458_v41 = vsel %vm2383_vm12, %v4326_v55, 0.0  ;;  %v3736_v55 = vsel %vm2854_vm10, %v3733_v31, %v3735_v51  ;;  %v7443_v31 = vld [vmem:[#allocation23_spill] sm:$0xff]  ;;  %v7444_v20 = vld [vmem:[#allocation24_spill] sm:$0xff]  ;;  %vm7453_vm2 = vcmp.ne.s32.totalorder %v5392_v23, 13 }
 0x400   : > { %v3828_v25 = vadd.f32 %v3803_v63, %v3650_v15  ;;  %v3680_v63 = vld [vmem:[#allocation3 + $0x118] sm:$0xff] }
 0x401   : > { %v3327_v58 = vadd.f32 %v6778_v3, %v3176_v13  ;;  %v7437_v3 = vld [vmem:[#allocation15_spill] sm:$0xff] }
 0x402   : > { %v3651_v7 = vadd.f32 %v7438_v29, %v7437_v3  ;;  %v7439_v13 = vld [vmem:[#allocation11_spill] sm:$0xff]  ;;  %v7447_v3 = vld [vmem:[#allocation25_spill] sm:$0xff] }
 0x403   : > { %v6802_v24 = vpop.permute.xlu1 %3421  ;;  %v6804_v22 = vpop.permute.xlu0 %3602  ;;  %vm7440_vm3 = vcmp.ne.s32.totalorder %v7439_v13, 13  ;;  %vm2384_vm14 = vcmp.ne.s32.totalorder %v7447_v3, 0  ;;  %vm7452_vm1 = vcmp.ne.s32.totalorder %v7447_v3, 13 }
 0x404   : > { %7424 = vst [vmem:[#allocation7_spill] sm:$0xff] %v6804_v22  ;;  %v3804_v21 = vsel %vm7440_vm3, %v3734_v16, 0.0  ;;  %vm7455_vm3 = vcmp.ne.s32.totalorder %v5505_v35, 13 }
 0x407   : > { %v6816_v12 = vpop.permute.xlu0 %2759  ;;  %v6818_v36 = vpop.permute.xlu1 %2605 }
 0x408   : > { %3850 = vxpose.xlu0.b32.start [1/16] (narrow) %v3825_v28, 32 }
 0x40b   : > { %v6832_v28 = vpop.permute.xlu0 %2942  ;;  %v6834_v61 = vpop.permute.xlu1 %3272 }
 0x40c   : > { %3851 = vxpose.xlu0.b32.cont [2/16] (narrow) %v3826_v34, 32  ;;  %v7256_v34 = vrot.slane %v6830_v40, 6 }
 0x40e   : > { %v3758_v10 = vsel %vm2854_vm10, %v7256_v34, %v7257_v2  ;;  %v3739_v34 = vrot.slane %v3680_v63, 6  ;;  %v3681_v2 = vld [vmem:[#allocation3 + $0x130] sm:$0xff]  ;;  %v7450_v63 = vrot.slane %v6820_v26, 7  ;;  %v2999_v26 = vsel %vm2384_vm14, %v6832_v28, 0.0  ;;  %v3683_v28 = vld [vmem:[#allocation3 + $0x160] sm:$0xff] }
 0x40f   : > { %v3424_v4 = vpop.permute.xlu0 %3423  ;;  %v6850_v18 = vpop.permute.xlu1 %2761 }
 0x410   : > { %3852 = vxpose.xlu0.b32.cont [3/16] (narrow) %v3827_v59, 32  ;;  %v3482_v54 = vsel %vm2382_vm6, %v3424_v4, 0.0  ;;  %v2659_v59 = vadd.f32 %v6771_v37, %v2458_v41  ;;  %v3816_v4 = vsel %vm7441_vm4, %v3758_v10, 0.0  ;;  %vm7442_vm6 = vcmp.ne.s32.totalorder %v6171_v38, 13 }
 0x411   : > { %v3507_v52 = vadd.f32 %v3482_v54, %v3327_v58  ;;  %v2813_v15 = vsel %vm7442_vm6, %v6755_v42, 0.0  ;;  %v2998_v37 = vsel %vm2383_vm12, %v6792_v11, 0.0  ;;  %v3829_v58 = vadd.f32 %v3804_v21, %v3651_v7  ;;  %v7445_v54 = vld [vmem:[#allocation12_spill] sm:$0xff]  ;;  %v3690_v7 = vld [vmem:[#allocation3 + $0x208] sm:$0xff]  ;;  %vm7456_vm4 = vmmov %vm7442_vm6 }
 0x412   : > { %v3652_v41 = vadd.f32 %v7444_v20, %v7443_v31  ;;  %v2838_v62 = vadd.f32 %v2813_v15, %v2659_v59  ;;  %vm7446_vm5 = vcmp.ne.s32.totalorder %v7445_v54, 13  ;;  %v3738_v42 = vsel %vm2854_vm10, %v3735_v51, %v3737_v17  ;;  %vm7457_vm6 = vmmov %vm7451_vm0 }
 0x413   : > { %v3605_v1 = vpop.permute.xlu0 %3604  ;;  %v3805_v10 = vsel %vm7446_vm5, %v3736_v55, 0.0  ;;  %v7448_v55 = vld [vmem:[#allocation14_spill] sm:$0xff]  ;;  %vm2385_vm5 = vcmp.ne.s32.totalorder %v6388_v0, 0 }
 0x414   : > { %v6869_v22 = vpop.permute.xlu1 %2944  ;;  %3853 = vxpose.xlu0.b32.cont [4/16] (narrow) %v3828_v25, 32  ;;  %v3663_v16 = vadd.f32 %v3605_v1, %v3507_v52  ;;  %v4327_v25 = vld [vmem:[#allocation3 + $0x1d0] sm:$0xff]  ;;  %v3023_v56 = vadd.f32 %v2998_v37, %v2838_v62  ;;  %v3830_v59 = vadd.f32 %v3805_v10, %v3652_v41  ;;  %vm7449_vm8 = vcmp.ne.s32.totalorder %v7448_v55, 13 }
 0x415   : > { %v3119_v29 = vrot.slane %v4327_v25, 7  ;;  %v4328_v52 = vld [vmem:[#allocation3 + $0x1b0] sm:$0xff]  ;;  %v3806_v15 = vsel %vm7449_vm8, %v3738_v42, 0.0  ;;  %v3759_v62 = vrot.slane %v3690_v7, 6  ;;  %v3121_v25 = vrot.slane %v6269_v49, 7 }
 0x416   : > { %v3841_v13 = vadd.f32 %v3816_v4, %v3663_v16  ;;  %v2459_v21 = vsel %vm2384_vm14, %v4328_v52, 0.0  ;;  %v3741_v4 = vrot.slane %v3681_v2, 6  ;;  %v3740_v16 = vsel %vm2854_vm10, %v3737_v17, %v3739_v34  ;;  %v3682_v2 = vld [vmem:[#allocation3 + $0x148] sm:$0xff] }
 0x417   : > { %v6883_v11 = vpop.permute.xlu0 %2607  ;;  %v2660_v51 = vadd.f32 %v6788_v30, %v2459_v21  ;;  %v3120_v37 = vsel %vm7451_vm0, %v7450_v63, %v3119_v29  ;;  %v3831_v30 = vadd.f32 %v3806_v15, %v6324_v6  ;;  %v3807_v17 = vsel %vm7453_vm2, %v3740_v16, 0.0  ;;  %v6918_v21 = vld [vmem:[#allocation3 + $0x220] sm:$0xff]  ;;  %v3684_v16 = vld [vmem:[#allocation3 + $0x178] sm:$0xff] }
 0x418   : > { %v3607_v1 = vpop.permute.xlu1 %3606  ;;  %3854 = vxpose.xlu0.b32.cont [5/16] (narrow) %v3829_v58, 32  ;;  %3882 = vxpose.xlu1.b32.start [1/9] (short) (narrow) %v3841_v13, 32  ;;  %v2814_v58 = vsel %vm7452_vm1, %v6786_v5, 0.0  ;;  %v3177_v31 = vadd.f32 %v3120_v37, %v3023_v56  ;;  %v3742_v54 = vsel %vm2854_vm10, %v3739_v34, %v3741_v4  ;;  %v3743_v56 = vrot.slane %v3682_v2, 6 }
 0x419   : > { %v2839_v5 = vadd.f32 %v2814_v58, %v2660_v51  ;;  %v7454_v6 = vrot.slane %v6825_v47, 6  ;;  %v3832_v34 = vadd.f32 %v3807_v17, %v6417_v9  ;;  %v3745_v15 = vrot.slane %v3683_v28, 6  ;;  %v3685_v17 = vld [vmem:[#allocation3 + $0x190] sm:$0xff]  ;;  %v3686_v28 = vld [vmem:[#allocation3 + $0x1a8] sm:$0xff] }
 0x41a   : > { %v3328_v10 = vadd.f32 %v6794_v50, %v3177_v31  ;;  %v3808_v50 = vsel %vm7455_vm3, %v3742_v54, 0.0  ;;  %v3744_v47 = vsel %vm2854_vm10, %v3741_v4, %v3743_v56  ;;  %v3122_v51 = vsel %vm7457_vm6, %v3119_v29, %v3121_v25  ;;  %vm7464_vm3 = vmmov %vm7457_vm6 }
 0x41b   : > { %v6897_v20 = vpop.permute.xlu0 %3274  ;;  %v3760_v7 = vsel %vm2854_vm10, %v7454_v6, %v3759_v62  ;;  %v3761_v35 = vrot.slane %v6918_v21, 6  ;;  %v3833_v31 = vadd.f32 %v3808_v50, %v6470_v60  ;;  %v3746_v2 = vsel %vm2854_vm10, %v3743_v56, %v3745_v15  ;;  %v4329_v56 = vld [vmem:[#allocation3 + $0x1c8] sm:$0xff] }
 0x41c   : > { %v6899_v41 = vpop.permute.xlu1 %2609  ;;  %3855 = vxpose.xlu0.b32.cont [6/16] (narrow) %v3830_v59, 32  ;;  %v3024_v59 = vadd.f32 %v2999_v26, %v2839_v5  ;;  %v3817_v55 = vsel %vm7456_vm4, %v3760_v7, 0.0  ;;  %vm7459_vm8 = vcmp.ne.s32.totalorder %v5650_v32, 13  ;;  %v3749_v7 = vrot.slane %v3685_v17, 6  ;;  %v4331_v17 = vld [vmem:[#allocation3 + $0x1e0] sm:$0xff] }
 0x41d   : > { %v3810_v5 = vsel %vm7459_vm8, %v3746_v2, 0.0  ;;  %v2815_v32 = vsel %vm2410_vm9, %v6816_v12, 0.0  ;;  %vm7461_vm0 = vcmp.ne.s32.totalorder %v5708_v33, 13  ;;  %v3751_v50 = vrot.slane %v3686_v28, 6  ;;  %v3687_v12 = vld [vmem:[#allocation3 + $0x1c0] sm:$0xff] }
 0x41e   : > { %v3178_v58 = vadd.f32 %v3122_v51, %v3024_v59  ;;  %vm7465_vm4 = vcmp.ne.s32.totalorder %v5844_v39, 13  ;;  %vm7467_vm6 = vcmp.ne.s32.totalorder %v5936_v27, 13  ;;  %v3125_v28 = vrot.slane %v6435_v43, 7  ;;  %v7470_v27 = vld [vmem:[#allocation7_spill] sm:$0xff] }
 0x420   : > { %v3426_v13 = vpop.permute.xlu0 %3425  ;;  %v6910_v42 = vpop.permute.xlu1 %3276  ;;  %3856 = vxpose.xlu0.b32.cont [7/16] (narrow) %v3831_v30, 32  ;;  %v3747_v30 = vrot.slane %v3684_v16, 6  ;;  %v3329_v60 = vadd.f32 %v6834_v61, %v3178_v58  ;;  %v3752_v58 = vsel %vm2854_vm10, %v3749_v7, %v3751_v50 }
 0x421   : > { %v3483_v23 = vsel %vm2383_vm12, %v3426_v13, 0.0  ;;  %vm7458_vm12 = vcmp.ne.s32.totalorder %v5569_v19, 13  ;;  %v3762_v19 = vsel %vm2854_vm10, %v3759_v62, %v3761_v35 }
 0x422   : > { %v3508_v52 = vadd.f32 %v3483_v23, %v3328_v10  ;;  %v3809_v4 = vsel %vm7458_vm12, %v3744_v47, 0.0  ;;  %v2460_v10 = vsel %vm2385_vm5, %v4329_v56, 0.0  ;;  %v3748_v6 = vsel %vm2854_vm10, %v3745_v15, %v3747_v30  ;;  %vm7472_vm12 = vmmov %vm7464_vm3 }
 0x423   : > { %v3834_v54 = vadd.f32 %v3809_v4, %v6572_v45  ;;  %v2661_v61 = vadd.f32 %v6818_v36, %v2460_v10  ;;  %v3000_v36 = vsel %vm2385_vm5, %v6869_v22, 0.0 }
 0x424   : > { %v3664_v63 = vadd.f32 %v3607_v1, %v3508_v52  ;;  %v6928_v37 = vpop.permute.xlu0 %2763  ;;  %v3428_v9 = vpop.permute.xlu1 %3427  ;;  %3857 = vxpose.xlu0.b32.cont [8/16] (narrow) %v3832_v34, 32  ;;  %v3835_v34 = vadd.f32 %v3810_v5, %v6626_v46  ;;  %v3811_v52 = vsel %vm7461_vm0, %v3748_v6, 0.0  ;;  %v6969_v46 = vld [vmem:[#allocation3 + $0x238] sm:$0xff] }
 0x425   : > { %v3484_v29 = vsel %vm2384_vm14, %v3428_v9, 0.0  ;;  %vm7460_vm14 = vmmov %vm7452_vm1  ;;  %v2840_v47 = vadd.f32 %v2815_v32, %v2661_v61  ;;  %v3836_v33 = vadd.f32 %v3811_v52, %v6703_v48  ;;  %vm7462_vm1 = vcmp.ne.s32.totalorder %v5803_v14, 13  ;;  %v7020_v52 = vld [vmem:[#allocation3 + $0x250] sm:$0xff] }
 0x426   : > { %v3842_v38 = vadd.f32 %v3817_v55, %v3664_v63  ;;  %v3509_v13 = vadd.f32 %v3484_v29, %v3329_v60  ;;  %v3818_v59 = vsel %vm7460_vm14, %v3762_v19, 0.0  ;;  %v3750_v55 = vsel %vm2854_vm10, %v3747_v30, %v3749_v7  ;;  %v4330_v63 = vld [vmem:[#allocation3 + $0x200] sm:$0xff] }
 0x427   : > { %v3123_v9 = vrot.slane %v4330_v63, 7  ;;  %v3025_v16 = vadd.f32 %v3000_v36, %v2840_v47  ;;  %v3812_v22 = vsel %vm7462_vm1, %v3750_v55, 0.0  ;;  %v3763_v30 = vrot.slane %v6969_v46, 6  ;;  %v7474_v46 = vld [vmem:[#allocation27_spill] sm:$0xff]  ;;  %vm7480_vm1 = vmmov %vm7464_vm3 }
 0x428   : > { %v6938_v1 = vpop.permute.xlu0 %2946  ;;  %v6940_v26 = vpop.permute.xlu1 %2765  ;;  %3883 = vxpose.xlu1.b32.cont [2/9] (short) (narrow) %v3842_v38, 32  ;;  %3858 = vxpose.xlu0.b32.cont [9/16] (narrow) %v3833_v31, 32  ;;  %v7463_v31 = vld [vmem:[#allocation26_spill] sm:$0xff]  ;;  %v3753_v38 = vrot.slane %v3687_v12, 6  ;;  %v3837_v29 = vadd.f32 %v3812_v22, %v6731_v44  ;;  %v3813_v14 = vsel %vm7465_vm4, %v3752_v58, 0.0  ;;  %v7468_v7 = vrot.slane %v6830_v40, 6  ;;  %vm7484_vm4 = vmmov %vm7480_vm1 }
 0x429   : > { %vm2386_vm2 = vcmp.ne.s32.totalorder %v7463_v31, 0  ;;  %v3124_v48 = vsel %vm7464_vm3, %v3121_v25, %v3123_v9  ;;  %v3764_v39 = vsel %vm2854_vm10, %v3761_v35, %v3763_v30  ;;  %v3838_v10 = vadd.f32 %v3813_v14, %v6769_v8  ;;  %v7476_v14 = vld [vmem:[#allocation30_spill] sm:$0xff] }
 0x42a   : > { %v2461_v60 = vsel %vm2386_vm2, %v4331_v17, 0.0  ;;  %v3179_v19 = vadd.f32 %v3124_v48, %v3025_v16  ;;  %v3754_v49 = vsel %vm2854_vm10, %v3751_v50, %v3753_v38  ;;  %v3819_v8 = vsel %vm2410_vm9, %v3764_v39, 0.0  ;;  %v7475_v48 = vld [vmem:[#allocation5_spill] sm:$0xff] }
 0x42b   : > { %v2662_v5 = vadd.f32 %v6883_v11, %v2461_v60  ;;  %v3814_v21 = vsel %vm7467_vm6, %v3754_v49, 0.0  ;;  %vm7471_vm9 = vcmp.ne.s32.totalorder %v6001_v57, 13  ;;  %v3126_v40 = vsel %vm7472_vm12, %v3123_v9, %v3125_v28  ;;  %vm7486_vm6 = vmmov %vm7480_vm1 }
 0x42c   : > { %v3609_v62 = vpop.permute.xlu0 %3608  ;;  %v6955_v23 = vpop.permute.xlu1 %2948  ;;  %3859 = vxpose.xlu0.b32.cont [10/16] (narrow) %v3834_v54, 32  ;;  %v3481_v54 = vsel %vm2381_vm11, %v6802_v24, 0.0  ;;  %v3330_v25 = vadd.f32 %v6897_v20, %v3179_v19  ;;  %vm7466_vm11 = vcmp.ne.s32.totalorder %v7463_v31, 13  ;;  %v3001_v20 = vsel %vm2386_vm2, %v6938_v1, 0.0 }
 0x42d   : > { %v3665_v45 = vadd.f32 %v3609_v62, %v3509_v13  ;;  %v3506_v24 = vadd.f32 %v3481_v54, %v6760_v53  ;;  %v2816_v11 = vsel %vm7466_vm11, %v6850_v18, 0.0  ;;  %v3756_v53 = vsel %vm2854_vm10, %v3753_v38, %v7468_v7  ;;  %v7469_v62 = vld [vmem:[#allocation4_spill] sm:$0xff]  ;;  %vm7477_vm14 = vmmov %vm7466_vm11 }
 0x42e   : > { %v2841_v35 = vadd.f32 %v2816_v11, %v2662_v5  ;;  %v3839_v32 = vadd.f32 %v3814_v21, %v7469_v62  ;;  %v3815_v0 = vsel %vm7471_vm9, %v3756_v53, 0.0  ;;  %v3765_v55 = vrot.slane %v7020_v52, 6  ;;  %v7478_v5 = vld [vmem:[#allocation31_spill] sm:$0xff]  ;;  %vm7485_vm11 = vmmov %vm7480_vm1 }
 0x42f   : > { %v3843_v3 = vadd.f32 %v3818_v59, %v3665_v45  ;;  %v3662_v45 = vadd.f32 %v7470_v27, %v3506_v24  ;;  %vm2388_vm8 = vcmp.ne.s32.totalorder %v7476_v14, 0  ;;  %v3129_v49 = vrot.slane %v7478_v5, 7  ;;  %v2440_v24 = vld [vmem:[#allocation3 + $0x240] sm:$0xf]  ;;  %v7483_v27 = vld [vmem:[#allocation28_spill] sm:$0xff] }
 0x430   : > { %v6967_v15 = vpop.permute.xlu0 %2611  ;;  %v3611_v51 = vpop.permute.xlu1 %3610  ;;  %3860 = vxpose.xlu0.b32.cont [11/16] (narrow) %v3835_v34, 32  ;;  %v3026_v1 = vadd.f32 %v3001_v20, %v2841_v35  ;;  %v3766_v22 = vsel %vm2854_vm10, %v3763_v30, %v3765_v55 }
 0x431   : > { %3884 = vxpose.xlu1.b32.cont [3/9] (short) (narrow) %v3843_v3, 32  ;;  %v3840_v47 = vadd.f32 %v3815_v0, %v3662_v45  ;;  %v3820_v60 = vsel %vm7477_vm14, %v3766_v22, 0.0  ;;  %v3127_v45 = vrot.slane %v7483_v27, 7 }
 0x432   : > { %v3180_v3 = vadd.f32 %v3126_v40, %v3026_v1 }
 0x434   : > { %v6976_v4 = vpop.permute.xlu0 %3278  ;;  %v6978_v2 = vpop.permute.xlu1 %2769  ;;  %3861 = vxpose.xlu0.b32.cont [12/16] (narrow) %v3836_v33, 32  ;;  %v3331_v16 = vadd.f32 %v6910_v42, %v3180_v3  ;;  %v3128_v3 = vsel %vm7484_vm4, %v3125_v28, %v3127_v45 }
 0x438   : > { %v3430_v56 = vpop.permute.xlu0 %3429  ;;  %v2614_v44 = vpop.permute.xlu1 %2613  ;;  %3862 = vxpose.xlu0.b32.cont [13/16] (narrow) %v3837_v29, 32  ;;  %v3131_v29 = vrot.slane %v7475_v48, 7  ;;  %v3695_v48 = vld [vmem:[#allocation3 + $0x280] sm:$0xff] }
 0x439   : > { %v3485_v13 = vsel %vm2385_vm5, %v3430_v56, 0.0  ;;  %v7479_v56 = vld [vmem:[#allocation29_spill] sm:$0xff] }
 0x43a   : > { %v3510_v6 = vadd.f32 %v3485_v13, %v3330_v25  ;;  %vm2387_vm0 = vcmp.ne.s32.totalorder %v7479_v56, 0  ;;  %v3132_v13 = vsel %vm7480_vm1, %v3129_v49, %v3131_v29 }
 0x43b   : > { %v3002_v53 = vsel %vm2387_vm0, %v6955_v23, 0.0  ;;  %v2820_v23 = vsel %vm2415_vm15, %v6978_v2, 0.0 }
 0x43c   : > { %v3666_v61 = vadd.f32 %v3611_v51, %v3510_v6  ;;  %v2616_v18 = vpop.permute.xlu0 %2615  ;;  %v7016_v59 = vpop.permute.xlu1 %3280  ;;  %3863 = vxpose.xlu0.b32.cont [14/16] (narrow) %v3838_v10, 32  ;;  %v7473_v51 = vld [vmem:[#allocation33_spill] sm:$0xff]  ;;  %v4333_v6 = vld [vmem:[#allocation3 + $0x1f8] sm:$0xff] }
 0x43d   : > { %vm2389_vm5 = vcmp.ne.s32.totalorder %v7473_v51, 0  ;;  %v2462_v21 = vsel %vm2387_vm0, %v4333_v6, 0.0  ;;  %v7488_v6 = vld [vmem:[#allocation16_spill] sm:$0xff] }
 0x43e   : > { %v3844_v34 = vadd.f32 %v3819_v8, %v3666_v61  ;;  %v2464_v9 = vsel %vm2389_vm5, %v7474_v46, 0.0  ;;  %v7482_v8 = vld [vmem:[#allocation32_spill] sm:$0xff]  ;;  %v2663_v7 = vadd.f32 %v6899_v41, %v2462_v21 }
 0x43f   : > { %v2665_v58 = vadd.f32 %v2614_v44, %v2464_v9  ;;  %v4332_v44 = vld [vmem:[#allocation3 + $0x210] sm:$0xff]  ;;  %vm2390_vm3 = vcmp.ne.s32.totalorder %v7482_v8, 0 }
 0x440   : > { %v2768_v50 = vpop.permute.xlu0 %2767  ;;  %v3432_v36 = vpop.permute.xlu1 %3431  ;;  %3885 = vxpose.xlu1.b32.cont [4/9] (short) (narrow) %v3844_v34, 32  ;;  %3864 = vxpose.xlu0.b32.cont [15/16] (narrow) %v3839_v32, 32  ;;  %v2463_v39 = vsel %vm2388_vm8, %v4332_v44, 0.0  ;;  %v2465_v61 = vsel %vm2390_vm3, %v2440_v24, 0.0  ;;  %v3490_v21 = vsel %vm2390_vm3, %v7488_v6, 0.0 }
 0x441   : > { %v3486_v12 = vsel %vm2386_vm2, %v3432_v36, 0.0  ;;  %v2819_v33 = vsel %vm2414_vm7, %v2768_v50, 0.0  ;;  %v2664_v31 = vadd.f32 %v6967_v15, %v2463_v39  ;;  %vm7481_vm2 = vcmp.ne.s32.totalorder %v7479_v56, 13  ;;  %v3694_v50 = vld [vmem:[#allocation3 + $0x268] sm:$0xff] }
 0x442   : > { %v3511_v38 = vadd.f32 %v3486_v12, %v3331_v16  ;;  %v2844_v17 = vadd.f32 %v2819_v33, %v2665_v58  ;;  %v2817_v35 = vsel %vm7481_vm2, %v6928_v37, 0.0  ;;  %v2818_v15 = vsel %vm2413_vm13, %v6940_v26, 0.0  ;;  %v3056_v26 = vld [vmem:[#allocation3 + $0x278] sm:$0x7]  ;;  %vm7487_vm9 = vmmov %vm7481_vm2 }
 0x443   : > { %v2842_v62 = vadd.f32 %v2817_v35, %v2663_v7  ;;  %v2843_v32 = vadd.f32 %v2818_v15, %v2664_v31  ;;  %v2666_v41 = vadd.f32 %v2616_v18, %v2465_v61  ;;  %v3130_v18 = vsel %vm7485_vm11, %v3127_v45, %v3129_v49  ;;  %v3697_v31 = vld [vmem:[#allocation3 + $0x2b0] sm:$0x3] }
 0x444   : > { %v2951_v63 = vpop.permute.xlu0 %2950  ;;  %v7031_v57 = vpop.permute.xlu1 %3284  ;;  %3865 = vxpose.xlu0.b32.end [16/16] (narrow) %v3840_v47, 32  ;;  %v3133_v46 = vrot.slane %v3056_v26, 7  ;;  %v3767_v16 = vrot.slane %v3694_v50, 6 }
 0x445   : > { %v3003_v1 = vsel %vm2388_vm8, %v2951_v63, 0.0  ;;  %v3027_v0 = vadd.f32 %v3002_v53, %v2842_v62  ;;  %v2845_v47 = vadd.f32 %v2820_v23, %v2666_v41 }
 0x446   : > { %v3028_v40 = vadd.f32 %v3003_v1, %v2843_v32  ;;  %v3134_v28 = vsel %vm7486_vm6, %v3131_v29, %v3133_v46  ;;  %v7489_v1 = vld [vmem:[#allocation17_spill] sm:$0xff] }
 0x447   : > { %v3181_v22 = vadd.f32 %v3128_v3, %v3027_v0 }
 0x448   : > { %v3613_v19 = vpop.permute.xlu0 %3612  ;;  %v2953_v54 = vpop.permute.xlu1 %2952  ;;  %v3182_v2 = vadd.f32 %v3130_v18, %v3028_v40 }
 0x449   : > { %v3667_v25 = vadd.f32 %v3613_v19, %v3511_v38  ;;  %v3004_v42 = vsel %vm2389_vm5, %v2953_v54, 0.0  ;;  %v3332_v43 = vadd.f32 %v6976_v4, %v3181_v22  ;;  %v3768_v54 = vsel %vm2854_vm10, %v3765_v55, %v3767_v16 }
 0x44a   : > { %v3029_v30 = vadd.f32 %v3004_v42, %v2844_v17  ;;  %v3333_v49 = vadd.f32 %v7016_v59, %v3182_v2  ;;  %v3769_v42 = vrot.slane %v3695_v48, 6 }
 0x44b   : > { %v3845_v10 = vadd.f32 %v3820_v60, %v3667_v25 }
 0x44c   : > { %v2955_v11 = vpop.permute.xlu0 %2954  ;;  %v3183_v20 = vadd.f32 %v3132_v13, %v3029_v30  ;;  %v3619_v37 = vpop.permute.xlu1 %3618  ;;  %v3696_v30 = vld [vmem:[#allocation3 + $0x298] sm:$0xff]  ;;  %v3770_v52 = vsel %vm2854_vm10, %v3767_v16, %v3769_v42 }
 0x44d   : > { %3886 = vxpose.xlu1.b32.cont [5/9] (short) (narrow) %v3845_v10, 32  ;;  %v3005_v36 = vsel %vm2390_vm3, %v2955_v11, 0.0  ;;  %v3821_v10 = vsel %vm7487_vm9, %v3768_v54, 0.0  ;;  %v3771_v13 = vrot.slane %v3696_v30, 6  ;;  %v3822_v56 = vsel %vm2413_vm13, %v3770_v52, 0.0 }
 0x44e   : > { %v3030_v58 = vadd.f32 %v3005_v36, %v2845_v47 }
 0x44f   : > { %v3772_v59 = vsel %vm2854_vm10, %v3769_v42, %v3771_v13 }
 0x450   : > { %v3283_v34 = vpop.permute.xlu0 %3282  ;;  %v3436_v9 = vpop.permute.xlu1 %3435  ;;  %v3184_v5 = vadd.f32 %v3134_v28, %v3030_v58 }
 0x451   : > { %v3334_v12 = vadd.f32 %v3283_v34, %v3183_v20  ;;  %v3488_v60 = vsel %vm2388_vm8, %v3436_v9, 0.0  ;;  %v3773_v20 = vrot.slane %v3697_v31, 6 }
 0x452   : > { %v3513_v44 = vadd.f32 %v3488_v60, %v3333_v49  ;;  %v3335_v24 = vadd.f32 %v7031_v57, %v3184_v5  ;;  %v3823_v57 = vsel %vm2414_vm7, %v3772_v59, 0.0 }
 0x453   : > { %v3774_v53 = vsel %vm2854_vm10, %v3771_v13, %v3773_v20  ;;  %vm3915_vm10 = vcmask 556032  }
 0x454   : > { %v3438_v63 = vpop.permute.xlu0 %3437  ;;  %v3615_v4 = vpop.permute.xlu1 %3614  ;;  %v3515_v35 = vadd.f32 %v3490_v21, %v3335_v24  ;;  %v3824_v32 = vsel %vm2415_vm15, %v3774_v53, 0.0 }
 0x455   : > { %v3489_v33 = vsel %vm2389_vm5, %v3438_v63, 0.0 }
 0x456   : > { %v3514_v38 = vadd.f32 %v3489_v33, %v3334_v12  ;;  %v3671_v62 = vadd.f32 %v7489_v1, %v3515_v35 }
 0x458   : > { %v3434_v17 = vpop.permute.xlu0 %3433  ;;  %v3670_v7 = vadd.f32 %v3619_v37, %v3514_v38  ;;  %v3849_v27 = vadd.f32 %v3824_v32, %v3671_v62 }
 0x459   : > { %v3487_v19 = vsel %vm2387_vm0, %v3434_v17, 0.0 }
 0x45a   : > { %v3512_v25 = vadd.f32 %v3487_v19, %v3332_v43  ;;  %v3848_v61 = vadd.f32 %v3823_v57, %v3670_v7 }
 0x45c   : > { %v3668_v39 = vadd.f32 %v3615_v4, %v3512_v25  ;;  %v3617_v29 = vpop.permute.xlu0 %3616 }
 0x45d   : > { %v3669_v55 = vadd.f32 %v3617_v29, %v3513_v44 }
 0x45e   : > { %v3846_v11 = vadd.f32 %v3821_v10, %v3668_v39 }
 0x45f   : > { %v3847_v15 = vadd.f32 %v3822_v56, %v3669_v55 }
 0x460   : > { %3887 = vxpose.xlu1.b32.cont [6/9] (short) (narrow) %v3846_v11, 32 }
 0x464   : > { %3888 = vxpose.xlu1.b32.cont [7/9] (short) (narrow) %v3847_v15, 32 }
 0x468   : > { %3889 = vxpose.xlu1.b32.cont [8/9] (short) (narrow) %v3848_v61, 32 }
 0x46c   : > { %3890 = vxpose.xlu1.b32.end [9/9] (short) (narrow) %v3849_v27, 32 }
 0x484   : > { %v3866_v14 = vpop.trf.xlu0 }
 0x485   : > { %3914 = vst [vmem:[%s7141_s5] sm:$0xff] %v3866_v14 }
 0x488   : > { %v3867_v37 = vpop.trf.xlu0 }
 0x489   : > { %3917 = vst [vmem:[%s7141_s5 + $0x10] sm:$0xff] %v3867_v37 }
 0x48c   : > { %v3868_v51 = vpop.trf.xlu0 }
 0x48d   : > { %3919 = vst [vmem:[%s7141_s5 + $0x20] sm:$0xff] %v3868_v51 }
 0x490   : > { %v3869_v8 = vpop.trf.xlu0 }
 0x491   : > { %3921 = vst [vmem:[%s7141_s5 + $0x30] sm:$0xff] %v3869_v8 }
 0x4c8   : > { %v3898_v45 = vpop.trf.xlu1 }
 0x4c9   : > { %3916 = vst.msk [vmem:[%s7141_s5 + $0x8] sm:$0xff] %vm3915_vm10, %v3898_v45 }
 0x4cc   : > { %v3899_v41 = vpop.trf.xlu1 }
 0x4cd   : > { %3918 = vst.msk [vmem:[%s7141_s5 + $0x18] sm:$0xff] %vm3915_vm10, %v3899_v41 }
 0x4d0   : > { %v3900_v34 = vpop.trf.xlu1 }
 0x4d1   : > { %3920 = vst.msk [vmem:[%s7141_s5 + $0x28] sm:$0xff] %vm3915_vm10, %v3900_v34 }
 0x4d4   : > { %v3901_v0 = vpop.trf.xlu1 }
 0x4d5   : > { %3922 = vst.msk [vmem:[%s7141_s5 + $0x38] sm:$0xff] %vm3915_vm10, %v3901_v0 }
 0x4d6 PF: > { %s15_s18 = sadd.s32 1, %s4340_s18  }
 0x4d7   : > { %p12_p6 = scmp.ge.s32.totalorder %s15_s18, 5  }
 0x4d9   :  { %14 = sbr.rel (!%p12_p6) target bundleno = 1 (0x1), region = 77 }

</bundles_post_ra>
